<compile_context>
chip_gen: v6e
topology: v6e:2x2x1
jax: 0.10.0
libtpu: 0.0.40
codegen_flags: <defaults>
</compile_context>

<pallas_src>
import math
import functools

import jax
import jax.numpy as jnp
from jax import lax
from jax.experimental import pallas as pl
from jax.experimental.pallas import tpu as pltpu


# ----------------------------- in-kernel helpers -----------------------------

def _unbiased_layernorm(x, gamma, beta, eps):
    # Matches torch LayerNorm in this module: a*(x-mean)/(std+eps)+b,
    # std is the *unbiased* standard deviation (divide by D-1).
    d = x.shape[-1]
    mean = jnp.mean(x, axis=-1, keepdims=True)
    xc = x - mean
    var = jnp.sum(xc * xc, axis=-1, keepdims=True) * (1.0 / (d - 1))
    # Reciprocal of the (rows,1) std instead of dividing the whole (rows,D) tensor.
    inv = pl.reciprocal(jnp.sqrt(var) + eps, approx=False)
    return gamma * (xc * inv) + beta


def _softmax_rows(s):
    # Row softmax with max subtraction; normalization via approx reciprocal (EUP)
    # refined with one Newton step so the f32 path stays ~f32-accurate.
    m = jnp.max(s, axis=-1, keepdims=True)
    e = jnp.exp(s - m)
    den = jnp.sum(e, axis=-1, keepdims=True)
    r = pl.reciprocal(den, approx=True)
    r = r * (2.0 - den * r)
    return e * r


# ------------------------------- Pallas kernel --------------------------------

def encoder_layer_kernel(x_ref, ln_g_ref, ln_b_ref, w5_ref, b5_ref, w_ctx_ref,
                         *rest, h, d_k, eps, bt, apply_final_ln, compute_dtype):
    if apply_final_ln:
        fg_ref, fb_ref, o_ref, qkv_s, ctx_s = rest
    else:
        o_ref, qkv_s, ctx_s = rest

    L = x_ref.shape[1]
    D = h * d_k
    M = bt * L

    x = x_ref[...].astype(jnp.float32).reshape(M, D)          # (M, D) f32

    # SublayerConnection pre-norm (f32 statistics).
    y = _unbiased_layernorm(x, ln_g_ref[0], ln_b_ref[0], eps)
    y_c = y.astype(compute_dtype)

    # One fused weight-stationary projection: [q|k|v|z_y] = y @ W5 + b5.
    proj = jnp.dot(y_c, w5_ref[...],
                   preferred_element_type=jnp.float32) + b5_ref[0]        # (M, 5D) f32

    # Cast the attention operands to compute_dtype ONCE; keep the AoA y-path in f32.
    qkv_s[...] = proj[:, :3 * D].astype(compute_dtype).reshape(bt, L, 3 * D)
    z_y = proj[:, 3 * D:]                                                  # (M, 2D) f32

    inv_sqrt_dk = jnp.float32(1.0 / math.sqrt(d_k))
    dims_qkT = (((1,), (1,)), ((), ()))   # contract on d_k: (L,d_k) x (L,d_k) -> (L,L)

    # TODO(synk): src_mask / pe_obj score branches not implemented (both None here).
    def attn_body(bi, carry):
        qkv_b = qkv_s[bi]                                   # (L, 3D) compute_dtype
        ctx_parts = []
        for hi in range(h):                                 # tiny static loop (h == 8)
            c0 = hi * d_k
            q_h = qkv_b[:, c0:c0 + d_k]
            k_h = qkv_b[:, D + c0:D + c0 + d_k]
            v_h = qkv_b[:, 2 * D + c0:2 * D + c0 + d_k]
            s = lax.dot_general(q_h, k_h, dims_qkT,
                                preferred_element_type=jnp.float32) * inv_sqrt_dk
            p = _softmax_rows(s)                            # (L, L) f32 (dropout == id)
            ctx_parts.append(jnp.dot(p.astype(compute_dtype), v_h,
                                     preferred_element_type=jnp.float32))  # (L, d_k)
        # Head-major lane concat -> (L, D); one dense store into the ctx buffer.
        ctx_b = jnp.concatenate(ctx_parts, axis=-1)
        ctx_s[bi] = ctx_b.astype(compute_dtype)
        return carry

    lax.fori_loop(0, bt, attn_body, 0)

    # AoA: z = y@W_y + b_aoa (already in z_y) + ctx@W_ctx -- one full-K matmul.
    ctx_all = ctx_s[...].reshape(M, D)
    z = z_y + jnp.dot(ctx_all, w_ctx_ref[...], preferred_element_type=jnp.float32)
    aoa = z[:, :D] * jax.nn.sigmoid(z[:, D:])               # GLU, f32 elementwise
    out = x + aoa                                           # residual
    if apply_final_ln:
        out = _unbiased_layernorm(out, fg_ref[0], fb_ref[0], eps)
    o_ref[...] = out.reshape(bt, L, D).astype(o_ref.dtype)


# --------------------------------- wrappers ----------------------------------

def _device_kind():
    try:
        return jax.devices()[0].device_kind.lower()
    except Exception:
        return ""


def _pick_batch_block(B, L, target_rows):
    # Divisor of B with bt*L <= target_rows; keep grid = B//bt >= 2 when possible
    # (feeds both v7x TensorCores); prefer bt*L a multiple of 128 (dense MXU rows).
    divs = [d for d in range(1, B + 1) if B % d == 0]
    cands = [d for d in divs if d * L <= target_rows and (B // d >= 2 or B == 1)]
    if not cands:
        cands = [1]
    aligned = [d for d in cands if (d * L) % 128 == 0]
    pool = aligned if aligned else cands
    return max(pool)


def encoder_layer_pallas(x, p, *, h, eps=1e-6, apply_final_ln=False, final_ln=None,
                         compute_dtype=None, batch_block=None,
                         single_buffer_weights=True):
    B, L, D = x.shape
    assert D % h == 0
    d_k = D // h

    kind = _device_kind()
    if compute_dtype is None:
        # bf16 MXU operands by default on v6e / v7x (f32 elementwise stays).
        compute_dtype = jnp.bfloat16 if ("v6" in kind or "v7" in kind) else jnp.float32
    target_rows = 256 if "v7" in kind else 512               # v7x: 64 MiB VMEM budget
    bt = batch_block if batch_block is not None else _pick_batch_block(B, L, target_rows)
    assert B % bt == 0
    M = bt * L
    itemsize_c = jnp.dtype(compute_dtype).itemsize

    # ---- offline weight packing (plain XLA ops, outside the kernel) ----
    # W5 = [Wq | Wk | Wv | W_aoa_y-path]  (D, 5D);  b5 = [bq | bk | bv | b_aoa]  (1, 5D)
    w5 = jnp.concatenate([p["wq"], p["wk"], p["wv"], p["w_aoa"][D:, :]],
                         axis=1).astype(compute_dtype)
    b5 = jnp.concatenate([p["bq"], p["bk"], p["bv"], p["b_aoa"]], axis=1)
    w_ctx = p["w_aoa"][:D, :].astype(compute_dtype)          # ctx path (D, 2D)

    # ---- VMEM budget (weights single-buffered + io blocks + scratch + temporaries) ----
    weight_bytes = 7 * D * D * itemsize_c + (5 * D + 2 * D + 4 * D) * 4
    io_bytes = 2 * 2 * M * D * x.dtype.itemsize              # x + out, double-buffered
    scratch_bytes = M * 4 * D * itemsize_c                    # qkv + ctx scratch
    temp_bytes = M * (5 * D + 2 * D + 2 * D + 2 * D) * 4      # f32 temporaries (rough)
    est = (weight_bytes * (1 if single_buffer_weights else 2)
           + io_bytes + scratch_bytes + temp_bytes)
    cap = (56 << 20) if "v7" in kind else (100 << 20)
    vmem_limit = int(min(max(2 * est, 32 << 20), cap))

    flops = int(2 * B * L * D * (7 * D + 2 * L))
    transcendentals = int(B * h * L * L + B * L * D)
    bytes_accessed = int(2 * B * L * D * x.dtype.itemsize + 7 * D * D * itemsize_c
                         + 11 * D * 4)

    kernel = functools.partial(encoder_layer_kernel, h=h, d_k=d_k, eps=eps, bt=bt,
                               apply_final_ln=apply_final_ln,
                               compute_dtype=compute_dtype)

    def build(single_buf):
        def const_spec(shape):
            # Weights/biases are identical every grid step -> single-buffer them.
            if single_buf:
                return pl.BlockSpec(shape, lambda b: (0,) * len(shape),
                                    pipeline_mode=pl.Buffered(1))
            return pl.BlockSpec(shape, lambda b: (0,) * len(shape))

        in_specs = [
            pl.BlockSpec((bt, L, D), lambda b: (b, 0, 0)),   # x
            const_spec((1, D)), const_spec((1, D)),          # sublayer LN gamma, beta
            const_spec((D, 5 * D)), const_spec((1, 5 * D)),  # fused W5, b5
            const_spec((D, 2 * D)),                          # AoA ctx-path weights
        ]
        args = [x, p["ln_g"], p["ln_b"], w5, b5, w_ctx]
        if apply_final_ln:
            in_specs += [const_spec((1, D)), const_spec((1, D))]
            args += [final_ln["g"], final_ln["b"]]

        call = pl.pallas_call(
            kernel,
            out_shape=jax.ShapeDtypeStruct((B, L, D), x.dtype),
            grid_spec=pltpu.PrefetchScalarGridSpec(
                num_scalar_prefetch=0, grid=(B // bt,),
                in_specs=in_specs,
                out_specs=pl.BlockSpec((bt, L, D), lambda b: (b, 0, 0)),
                scratch_shapes=[pltpu.VMEM((bt, L, 3 * D), compute_dtype),
                                pltpu.VMEM((bt, L, D), compute_dtype)]),
            compiler_params=pltpu.CompilerParams(
                dimension_semantics=("parallel",),
                vmem_limit_bytes=vmem_limit),
            cost_estimate=pl.CostEstimate(flops=flops,
                                          transcendentals=transcendentals,
                                          bytes_accessed=bytes_accessed),
        )
        return call, args

    if single_buffer_weights:
        try:
            call, args = build(True)
            return call(*args)
        except Exception:
            # pipeline_mode=pl.Buffered(1) unsupported on this jax/backend: fall back
            # to default double-buffered weights (correctness identical).
            pass
    call, args = build(False)
    return call(*args)


def encoder_pallas(x, layer_params, final_ln, *, h,
                   compute_dtype=None, batch_block=None):
    out = x
    n = len(layer_params)
    for i, p in enumerate(layer_params):
        out = encoder_layer_pallas(
            out, p, h=h,
            apply_final_ln=(i == n - 1), final_ln=final_ln,
            compute_dtype=compute_dtype, batch_block=batch_block)
    return out


# ----------------------------- parameter creation -----------------------------

def init_params(key, D, N):
    layer_params = []
    for i in range(N):
        ks = jax.random.split(jax.random.fold_in(key, i), 8)
        layer_params.append(dict(
            ln_g=jnp.ones((1, D), jnp.float32),
            ln_b=jnp.zeros((1, D), jnp.float32),
            wq=0.05 * jax.random.normal(ks[0], (D, D), jnp.float32),
            bq=0.01 * jax.random.normal(ks[1], (1, D), jnp.float32),
            wk=0.05 * jax.random.normal(ks[2], (D, D), jnp.float32),
            bk=0.01 * jax.random.normal(ks[3], (1, D), jnp.float32),
            wv=0.05 * jax.random.normal(ks[4], (D, D), jnp.float32),
            bv=0.01 * jax.random.normal(ks[5], (1, D), jnp.float32),
            w_aoa=0.05 * jax.random.normal(ks[6], (2 * D, 2 * D), jnp.float32),
            b_aoa=0.01 * jax.random.normal(ks[7], (1, 2 * D), jnp.float32),
        ))
    final_ln = dict(g=jnp.ones((1, D), jnp.float32), b=jnp.zeros((1, D), jnp.float32))
    return layer_params, final_ln


# ----------------------------- pure-JAX reference -----------------------------

def _ref_ln(x, g, b, eps=1e-6):
    d = x.shape[-1]
    mean = jnp.mean(x, axis=-1, keepdims=True)
    xc = x - mean
    std = jnp.sqrt(jnp.sum(xc * xc, axis=-1, keepdims=True) / (d - 1))
    return g * xc / (std + eps) + b


def ref_encoder(x, layer_params, final_ln, *, h):
    for p in layer_params:
        B, L, D = x.shape
        d_k = D // h
        y = _ref_ln(x, p["ln_g"][0], p["ln_b"][0])
        q = y @ p["wq"] + p["bq"][0]
        k = y @ p["wk"] + p["bk"][0]
        v = y @ p["wv"] + p["bv"][0]
        qh = q.reshape(B, L, h, d_k).transpose(0, 2, 1, 3)
        kh = k.reshape(B, L, h, d_k).transpose(0, 2, 1, 3)
        vh = v.reshape(B, L, h, d_k).transpose(0, 2, 1, 3)
        s = jnp.einsum('bhqd,bhkd->bhqk', qh, kh) / math.sqrt(d_k)
        pattn = jax.nn.softmax(s, axis=-1)
        ctx = jnp.einsum('bhqk,bhkd->bhqd', pattn, vh)
        ctx = ctx.transpose(0, 2, 1, 3).reshape(B, L, D)
        z = jnp.concatenate([ctx, y], -1) @ p["w_aoa"] + p["b_aoa"][0]
        aoa = z[..., :D] * jax.nn.sigmoid(z[..., D:])
        x = x + aoa
    return _ref_ln(x, final_ln["g"][0], final_ln["b"][0])


# ----------------------------------- main -------------------------------------

if __name__ == "__main__":
    B, L, D, H, N = 4, 8, 32, 8, 2   # batch, seq, d_model, heads, num layers
    key = jax.random.PRNGKey(0)
    k_x, k_p = jax.random.split(key)
    vis = jax.random.normal(k_x, (B, L, D), dtype=jnp.float32)

    layer_params, final_ln = init_params(k_p, D, N)
    ref = ref_encoder(vis, layer_params, final_ln, h=H)

    # f32 MXU-operand path (strict check).
    out = encoder_pallas(vis, layer_params, final_ln, h=H, compute_dtype=jnp.float32)
    out = jax.block_until_ready(out)
    assert out.shape == (B, L, D)
    assert jnp.allclose(out, ref, atol=3e-3, rtol=3e-3), \
        float(jnp.max(jnp.abs(out - ref)))

    # bf16 MXU-operand path (f32 accumulation / elementwise), looser tolerance.
    out_bf16 = encoder_pallas(vis, layer_params, final_ln, h=H,
                              compute_dtype=jnp.bfloat16)
    out_bf16 = jax.block_until_ready(out_bf16)
    assert jnp.allclose(out_bf16, ref, atol=5e-2, rtol=5e-2), \
        float(jnp.max(jnp.abs(out_bf16 - ref)))

    print("KERNEL_OK")
</pallas_src>

<mosaic_0001>
module attributes {stable_mosaic.version = 11 : i64} {
  func.func @encoder_layer_kernel(%arg0: i32, %arg1: memref<2x8x32xf32, #tpu.memory_space<vmem>>, %arg2: memref<1x32xf32, #tpu.memory_space<vmem>>, %arg3: memref<1x32xf32, #tpu.memory_space<vmem>>, %arg4: memref<32x160xf32, #tpu.memory_space<vmem>>, %arg5: memref<1x160xf32, #tpu.memory_space<vmem>>, %arg6: memref<32x64xf32, #tpu.memory_space<vmem>>, %arg7: memref<2x8x32xf32, #tpu.memory_space<vmem>>, %arg8: memref<2x8x96xf32, #tpu.memory_space<vmem>>, %arg9: memref<2x8x32xf32, #tpu.memory_space<vmem>>) attributes {dimension_semantics = [#tpu.dimension_semantics<parallel>], iteration_bounds = array<i64: 2>, scalar_prefetch = 0 : i64, scratch_operands = 2 : i64, tpu.core_type = #tpu.core_type<tc>, window_params = [{transform_indices = @transform_0, window_bounds = array<i64: 2, 8, 32>}, {pipeline_mode = #tpu.pipeline_mode<synchronous>, transform_indices = @transform_1, window_bounds = array<i64: 1, 32>}, {pipeline_mode = #tpu.pipeline_mode<synchronous>, transform_indices = @transform_2, window_bounds = array<i64: 1, 32>}, {pipeline_mode = #tpu.pipeline_mode<synchronous>, transform_indices = @transform_3, window_bounds = array<i64: 32, 160>}, {pipeline_mode = #tpu.pipeline_mode<synchronous>, transform_indices = @transform_4, window_bounds = array<i64: 1, 160>}, {pipeline_mode = #tpu.pipeline_mode<synchronous>, transform_indices = @transform_5, window_bounds = array<i64: 32, 64>}, {transform_indices = @transform_6, window_bounds = array<i64: 2, 8, 32>}]} {
    %c0 = arith.constant 0 : index
    %c0_0 = arith.constant 0 : index
    %c0_1 = arith.constant 0 : index
    %0 = vector.load %arg1[%c0, %c0_0, %c0_1] : memref<2x8x32xf32, #tpu.memory_space<vmem>>, vector<2x8x32xf32>
    %1 = vector.shape_cast %0 : vector<2x8x32xf32> to vector<16x32xf32>
    %c0_2 = arith.constant 0 : index
    %c0_3 = arith.constant 0 : index
    %2 = vector.load %arg2[%c0_2, %c0_3] : memref<1x32xf32, #tpu.memory_space<vmem>>, vector<1x32xf32>
    %3 = vector.shape_cast %2 : vector<1x32xf32> to vector<32xf32>
    %c0_4 = arith.constant 0 : index
    %c0_5 = arith.constant 0 : index
    %4 = vector.load %arg3[%c0_4, %c0_5] : memref<1x32xf32, #tpu.memory_space<vmem>>, vector<1x32xf32>
    %5 = vector.shape_cast %4 : vector<1x32xf32> to vector<32xf32>
    %cst = arith.constant dense<0.000000e+00> : vector<16xf32>
    %6 = vector.multi_reduction <add>, %1, %cst [1] : vector<16x32xf32> to vector<16xf32>
    %7 = vector.shape_cast %6 : vector<16xf32> to vector<16x1xf32>
    %cst_6 = arith.constant 3.200000e+01 : f32
    %8 = vector.broadcast %cst_6 : f32 to vector<16x1xf32>
    %9 = arith.divf %7, %8 : vector<16x1xf32>
    %10 = vector.broadcast %9 : vector<16x1xf32> to vector<16x32xf32>
    %11 = arith.subf %1, %10 : vector<16x32xf32>
    %12 = arith.mulf %11, %11 : vector<16x32xf32>
    %cst_7 = arith.constant dense<0.000000e+00> : vector<16xf32>
    %13 = vector.multi_reduction <add>, %12, %cst_7 [1] : vector<16x32xf32> to vector<16xf32>
    %14 = vector.shape_cast %13 : vector<16xf32> to vector<16x1xf32>
    %cst_8 = arith.constant 0.0322580636 : f32
    %15 = vector.broadcast %cst_8 : f32 to vector<16x1xf32>
    %16 = arith.mulf %14, %15 : vector<16x1xf32>
    %17 = math.sqrt %16 : vector<16x1xf32>
    %cst_9 = arith.constant 9.99999997E-7 : f32
    %18 = vector.broadcast %cst_9 : f32 to vector<16x1xf32>
    %19 = arith.addf %17, %18 : vector<16x1xf32>
    %20 = tpu.reciprocal %19 : vector<16x1xf32> -> vector<16x1xf32>
    %21 = vector.broadcast %20 : vector<16x1xf32> to vector<16x32xf32>
    %22 = arith.mulf %11, %21 : vector<16x32xf32>
    %23 = vector.shape_cast %3 : vector<32xf32> to vector<1x32xf32>
    %24 = vector.broadcast %23 : vector<1x32xf32> to vector<16x32xf32>
    %25 = arith.mulf %24, %22 : vector<16x32xf32>
    %26 = vector.shape_cast %5 : vector<32xf32> to vector<1x32xf32>
    %27 = vector.broadcast %26 : vector<1x32xf32> to vector<16x32xf32>
    %28 = arith.addf %25, %27 : vector<16x32xf32>
    %c0_10 = arith.constant 0 : index
    %c0_11 = arith.constant 0 : index
    %29 = vector.load %arg4[%c0_10, %c0_11] : memref<32x160xf32, #tpu.memory_space<vmem>>, vector<32x160xf32>
    %cst_12 = arith.constant dense<0.000000e+00> : vector<16x160xf32>
    %30 = tpu.matmul %28, %29, %cst_12 {dimension_numbers = #tpu.dot_dimension_numbers<[1], [0], [0], [1], [0, 0, 1, 1], [], []>} : vector<16x32xf32>, vector<32x160xf32>, vector<16x160xf32> -> vector<16x160xf32>
    %c0_13 = arith.constant 0 : index
    %c0_14 = arith.constant 0 : index
    %31 = vector.load %arg5[%c0_13, %c0_14] : memref<1x160xf32, #tpu.memory_space<vmem>>, vector<1x160xf32>
    %32 = vector.shape_cast %31 : vector<1x160xf32> to vector<160xf32>
    %33 = vector.shape_cast %32 : vector<160xf32> to vector<1x160xf32>
    %34 = vector.broadcast %33 : vector<1x160xf32> to vector<16x160xf32>
    %35 = arith.addf %30, %34 : vector<16x160xf32>
    %36 = vector.extract_strided_slice %35 {offsets = [0, 0], sizes = [16, 96], strides = [1, 1]} : vector<16x160xf32> to vector<16x96xf32>
    %37 = vector.shape_cast %36 : vector<16x96xf32> to vector<2x8x96xf32>
    %c0_15 = arith.constant 0 : index
    %c0_16 = arith.constant 0 : index
    %c0_17 = arith.constant 0 : index
    %38 = vector.load %arg8[%c0_15, %c0_16, %c0_17] : memref<2x8x96xf32, #tpu.memory_space<vmem>>, vector<2x8x96xf32>
    tpu.vector_store %arg8[%c0_15, %c0_16, %c0_17], %37 {strides = array<i32>} : memref<2x8x96xf32, #tpu.memory_space<vmem>>, vector<2x8x96xf32>,
    %39 = vector.extract_strided_slice %35 {offsets = [0, 96], sizes = [16, 64], strides = [1, 1]} : vector<16x160xf32> to vector<16x64xf32>
    %cst_18 = arith.constant 5.000000e-01 : f32
    %c0_i32 = arith.constant 0 : i32
    %c2_i32 = arith.constant 2 : i32
    %40 = arith.addi %c0_i32, %c2_i32 : i32
    %c1_i32 = arith.constant 1 : i32
    scf.for %arg10 = %c0_i32 to %40 step %c1_i32  : i32 {
      %57 = arith.index_cast %arg10 : i32 to index
      %c0_30 = arith.constant 0 : index
      %c0_31 = arith.constant 0 : index
      %58 = vector.load %arg8[%57, %c0_30, %c0_31] : memref<2x8x96xf32, #tpu.memory_space<vmem>>, vector<1x8x96xf32>
      %59 = vector.shape_cast %58 : vector<1x8x96xf32> to vector<8x96xf32>
      %60 = vector.extract_strided_slice %59 {offsets = [0, 0], sizes = [8, 4], strides = [1, 1]} : vector<8x96xf32> to vector<8x4xf32>
      %61 = vector.extract_strided_slice %59 {offsets = [0, 32], sizes = [8, 4], strides = [1, 1]} : vector<8x96xf32> to vector<8x4xf32>
      %62 = vector.extract_strided_slice %59 {offsets = [0, 64], sizes = [8, 4], strides = [1, 1]} : vector<8x96xf32> to vector<8x4xf32>
      %cst_32 = arith.constant dense<0.000000e+00> : vector<8x8xf32>
      %63 = tpu.matmul %60, %61, %cst_32 {dimension_numbers = #tpu.dot_dimension_numbers<[1], [1], [0], [0], [0, 0, 1, 0], [], []>} : vector<8x4xf32>, vector<8x4xf32>, vector<8x8xf32> -> vector<8x8xf32>
      %64 = vector.broadcast %cst_18 : f32 to vector<8x8xf32>
      %65 = arith.mulf %63, %64 : vector<8x8xf32>
      %cst_33 = arith.constant dense<0xFF800000> : vector<8xf32>
      %66 = vector.multi_reduction <maximumf>, %65, %cst_33 [1] : vector<8x8xf32> to vector<8xf32>
      %67 = vector.shape_cast %66 : vector<8xf32> to vector<8x1xf32>
      %68 = vector.broadcast %67 : vector<8x1xf32> to vector<8x8xf32>
      %69 = arith.subf %65, %68 : vector<8x8xf32>
      %70 = math.exp %69 : vector<8x8xf32>
      %cst_34 = arith.constant dense<0.000000e+00> : vector<8xf32>
      %71 = vector.multi_reduction <add>, %70, %cst_34 [1] : vector<8x8xf32> to vector<8xf32>
      %72 = vector.shape_cast %71 : vector<8xf32> to vector<8x1xf32>
      %73 = tpu.reciprocal %72 {approx = true} : vector<8x1xf32> -> vector<8x1xf32>
      %74 = arith.mulf %72, %73 : vector<8x1xf32>
      %cst_35 = arith.constant 2.000000e+00 : f32
      %75 = vector.broadcast %cst_35 : f32 to vector<8x1xf32>
      %76 = arith.subf %75, %74 : vector<8x1xf32>
      %77 = arith.mulf %73, %76 : vector<8x1xf32>
      %78 = vector.broadcast %77 : vector<8x1xf32> to vector<8x8xf32>
      %79 = arith.mulf %70, %78 : vector<8x8xf32>
      %cst_36 = arith.constant dense<0.000000e+00> : vector<8x4xf32>
      %80 = tpu.matmul %79, %62, %cst_36 {dimension_numbers = #tpu.dot_dimension_numbers<[1], [0], [0], [1], [0, 0, 1, 1], [], []>} : vector<8x8xf32>, vector<8x4xf32>, vector<8x4xf32> -> vector<8x4xf32>
      %81 = vector.extract_strided_slice %59 {offsets = [0, 4], sizes = [8, 4], strides = [1, 1]} : vector<8x96xf32> to vector<8x4xf32>
      %82 = vector.extract_strided_slice %59 {offsets = [0, 36], sizes = [8, 4], strides = [1, 1]} : vector<8x96xf32> to vector<8x4xf32>
      %83 = vector.extract_strided_slice %59 {offsets = [0, 68], sizes = [8, 4], strides = [1, 1]} : vector<8x96xf32> to vector<8x4xf32>
      %cst_37 = arith.constant dense<0.000000e+00> : vector<8x8xf32>
      %84 = tpu.matmul %81, %82, %cst_37 {dimension_numbers = #tpu.dot_dimension_numbers<[1], [1], [0], [0], [0, 0, 1, 0], [], []>} : vector<8x4xf32>, vector<8x4xf32>, vector<8x8xf32> -> vector<8x8xf32>
      %85 = vector.broadcast %cst_18 : f32 to vector<8x8xf32>
      %86 = arith.mulf %84, %85 : vector<8x8xf32>
      %cst_38 = arith.constant dense<0xFF800000> : vector<8xf32>
      %87 = vector.multi_reduction <maximumf>, %86, %cst_38 [1] : vector<8x8xf32> to vector<8xf32>
      %88 = vector.shape_cast %87 : vector<8xf32> to vector<8x1xf32>
      %89 = vector.broadcast %88 : vector<8x1xf32> to vector<8x8xf32>
      %90 = arith.subf %86, %89 : vector<8x8xf32>
      %91 = math.exp %90 : vector<8x8xf32>
      %cst_39 = arith.constant dense<0.000000e+00> : vector<8xf32>
      %92 = vector.multi_reduction <add>, %91, %cst_39 [1] : vector<8x8xf32> to vector<8xf32>
      %93 = vector.shape_cast %92 : vector<8xf32> to vector<8x1xf32>
      %94 = tpu.reciprocal %93 {approx = true} : vector<8x1xf32> -> vector<8x1xf32>
      %95 = arith.mulf %93, %94 : vector<8x1xf32>
      %cst_40 = arith.constant 2.000000e+00 : f32
      %96 = vector.broadcast %cst_40 : f32 to vector<8x1xf32>
      %97 = arith.subf %96, %95 : vector<8x1xf32>
      %98 = arith.mulf %94, %97 : vector<8x1xf32>
      %99 = vector.broadcast %98 : vector<8x1xf32> to vector<8x8xf32>
      %100 = arith.mulf %91, %99 : vector<8x8xf32>
      %cst_41 = arith.constant dense<0.000000e+00> : vector<8x4xf32>
      %101 = tpu.matmul %100, %83, %cst_41 {dimension_numbers = #tpu.dot_dimension_numbers<[1], [0], [0], [1], [0, 0, 1, 1], [], []>} : vector<8x8xf32>, vector<8x4xf32>, vector<8x4xf32> -> vector<8x4xf32>
      %102 = vector.extract_strided_slice %59 {offsets = [0, 8], sizes = [8, 4], strides = [1, 1]} : vector<8x96xf32> to vector<8x4xf32>
      %103 = vector.extract_strided_slice %59 {offsets = [0, 40], sizes = [8, 4], strides = [1, 1]} : vector<8x96xf32> to vector<8x4xf32>
      %104 = vector.extract_strided_slice %59 {offsets = [0, 72], sizes = [8, 4], strides = [1, 1]} : vector<8x96xf32> to vector<8x4xf32>
      %cst_42 = arith.constant dense<0.000000e+00> : vector<8x8xf32>
      %105 = tpu.matmul %102, %103, %cst_42 {dimension_numbers = #tpu.dot_dimension_numbers<[1], [1], [0], [0], [0, 0, 1, 0], [], []>} : vector<8x4xf32>, vector<8x4xf32>, vector<8x8xf32> -> vector<8x8xf32>
      %106 = vector.broadcast %cst_18 : f32 to vector<8x8xf32>
      %107 = arith.mulf %105, %106 : vector<8x8xf32>
      %cst_43 = arith.constant dense<0xFF800000> : vector<8xf32>
      %108 = vector.multi_reduction <maximumf>, %107, %cst_43 [1] : vector<8x8xf32> to vector<8xf32>
      %109 = vector.shape_cast %108 : vector<8xf32> to vector<8x1xf32>
      %110 = vector.broadcast %109 : vector<8x1xf32> to vector<8x8xf32>
      %111 = arith.subf %107, %110 : vector<8x8xf32>
      %112 = math.exp %111 : vector<8x8xf32>
      %cst_44 = arith.constant dense<0.000000e+00> : vector<8xf32>
      %113 = vector.multi_reduction <add>, %112, %cst_44 [1] : vector<8x8xf32> to vector<8xf32>
      %114 = vector.shape_cast %113 : vector<8xf32> to vector<8x1xf32>
      %115 = tpu.reciprocal %114 {approx = true} : vector<8x1xf32> -> vector<8x1xf32>
      %116 = arith.mulf %114, %115 : vector<8x1xf32>
      %cst_45 = arith.constant 2.000000e+00 : f32
      %117 = vector.broadcast %cst_45 : f32 to vector<8x1xf32>
      %118 = arith.subf %117, %116 : vector<8x1xf32>
      %119 = arith.mulf %115, %118 : vector<8x1xf32>
      %120 = vector.broadcast %119 : vector<8x1xf32> to vector<8x8xf32>
      %121 = arith.mulf %112, %120 : vector<8x8xf32>
      %cst_46 = arith.constant dense<0.000000e+00> : vector<8x4xf32>
      %122 = tpu.matmul %121, %104, %cst_46 {dimension_numbers = #tpu.dot_dimension_numbers<[1], [0], [0], [1], [0, 0, 1, 1], [], []>} : vector<8x8xf32>, vector<8x4xf32>, vector<8x4xf32> -> vector<8x4xf32>
      %123 = vector.extract_strided_slice %59 {offsets = [0, 12], sizes = [8, 4], strides = [1, 1]} : vector<8x96xf32> to vector<8x4xf32>
      %124 = vector.extract_strided_slice %59 {offsets = [0, 44], sizes = [8, 4], strides = [1, 1]} : vector<8x96xf32> to vector<8x4xf32>
      %125 = vector.extract_strided_slice %59 {offsets = [0, 76], sizes = [8, 4], strides = [1, 1]} : vector<8x96xf32> to vector<8x4xf32>
      %cst_47 = arith.constant dense<0.000000e+00> : vector<8x8xf32>
      %126 = tpu.matmul %123, %124, %cst_47 {dimension_numbers = #tpu.dot_dimension_numbers<[1], [1], [0], [0], [0, 0, 1, 0], [], []>} : vector<8x4xf32>, vector<8x4xf32>, vector<8x8xf32> -> vector<8x8xf32>
      %127 = vector.broadcast %cst_18 : f32 to vector<8x8xf32>
      %128 = arith.mulf %126, %127 : vector<8x8xf32>
      %cst_48 = arith.constant dense<0xFF800000> : vector<8xf32>
      %129 = vector.multi_reduction <maximumf>, %128, %cst_48 [1] : vector<8x8xf32> to vector<8xf32>
      %130 = vector.shape_cast %129 : vector<8xf32> to vector<8x1xf32>
      %131 = vector.broadcast %130 : vector<8x1xf32> to vector<8x8xf32>
      %132 = arith.subf %128, %131 : vector<8x8xf32>
      %133 = math.exp %132 : vector<8x8xf32>
      %cst_49 = arith.constant dense<0.000000e+00> : vector<8xf32>
      %134 = vector.multi_reduction <add>, %133, %cst_49 [1] : vector<8x8xf32> to vector<8xf32>
      %135 = vector.shape_cast %134 : vector<8xf32> to vector<8x1xf32>
      %136 = tpu.reciprocal %135 {approx = true} : vector<8x1xf32> -> vector<8x1xf32>
      %137 = arith.mulf %135, %136 : vector<8x1xf32>
      %cst_50 = arith.constant 2.000000e+00 : f32
      %138 = vector.broadcast %cst_50 : f32 to vector<8x1xf32>
      %139 = arith.subf %138, %137 : vector<8x1xf32>
      %140 = arith.mulf %136, %139 : vector<8x1xf32>
      %141 = vector.broadcast %140 : vector<8x1xf32> to vector<8x8xf32>
      %142 = arith.mulf %133, %141 : vector<8x8xf32>
      %cst_51 = arith.constant dense<0.000000e+00> : vector<8x4xf32>
      %143 = tpu.matmul %142, %125, %cst_51 {dimension_numbers = #tpu.dot_dimension_numbers<[1], [0], [0], [1], [0, 0, 1, 1], [], []>} : vector<8x8xf32>, vector<8x4xf32>, vector<8x4xf32> -> vector<8x4xf32>
      %144 = vector.extract_strided_slice %59 {offsets = [0, 16], sizes = [8, 4], strides = [1, 1]} : vector<8x96xf32> to vector<8x4xf32>
      %145 = vector.extract_strided_slice %59 {offsets = [0, 48], sizes = [8, 4], strides = [1, 1]} : vector<8x96xf32> to vector<8x4xf32>
      %146 = vector.extract_strided_slice %59 {offsets = [0, 80], sizes = [8, 4], strides = [1, 1]} : vector<8x96xf32> to vector<8x4xf32>
      %cst_52 = arith.constant dense<0.000000e+00> : vector<8x8xf32>
      %147 = tpu.matmul %144, %145, %cst_52 {dimension_numbers = #tpu.dot_dimension_numbers<[1], [1], [0], [0], [0, 0, 1, 0], [], []>} : vector<8x4xf32>, vector<8x4xf32>, vector<8x8xf32> -> vector<8x8xf32>
      %148 = vector.broadcast %cst_18 : f32 to vector<8x8xf32>
      %149 = arith.mulf %147, %148 : vector<8x8xf32>
      %cst_53 = arith.constant dense<0xFF800000> : vector<8xf32>
      %150 = vector.multi_reduction <maximumf>, %149, %cst_53 [1] : vector<8x8xf32> to vector<8xf32>
      %151 = vector.shape_cast %150 : vector<8xf32> to vector<8x1xf32>
      %152 = vector.broadcast %151 : vector<8x1xf32> to vector<8x8xf32>
      %153 = arith.subf %149, %152 : vector<8x8xf32>
      %154 = math.exp %153 : vector<8x8xf32>
      %cst_54 = arith.constant dense<0.000000e+00> : vector<8xf32>
      %155 = vector.multi_reduction <add>, %154, %cst_54 [1] : vector<8x8xf32> to vector<8xf32>
      %156 = vector.shape_cast %155 : vector<8xf32> to vector<8x1xf32>
      %157 = tpu.reciprocal %156 {approx = true} : vector<8x1xf32> -> vector<8x1xf32>
      %158 = arith.mulf %156, %157 : vector<8x1xf32>
      %cst_55 = arith.constant 2.000000e+00 : f32
      %159 = vector.broadcast %cst_55 : f32 to vector<8x1xf32>
      %160 = arith.subf %159, %158 : vector<8x1xf32>
      %161 = arith.mulf %157, %160 : vector<8x1xf32>
      %162 = vector.broadcast %161 : vector<8x1xf32> to vector<8x8xf32>
      %163 = arith.mulf %154, %162 : vector<8x8xf32>
      %cst_56 = arith.constant dense<0.000000e+00> : vector<8x4xf32>
      %164 = tpu.matmul %163, %146, %cst_56 {dimension_numbers = #tpu.dot_dimension_numbers<[1], [0], [0], [1], [0, 0, 1, 1], [], []>} : vector<8x8xf32>, vector<8x4xf32>, vector<8x4xf32> -> vector<8x4xf32>
      %165 = vector.extract_strided_slice %59 {offsets = [0, 20], sizes = [8, 4], strides = [1, 1]} : vector<8x96xf32> to vector<8x4xf32>
      %166 = vector.extract_strided_slice %59 {offsets = [0, 52], sizes = [8, 4], strides = [1, 1]} : vector<8x96xf32> to vector<8x4xf32>
      %167 = vector.extract_strided_slice %59 {offsets = [0, 84], sizes = [8, 4], strides = [1, 1]} : vector<8x96xf32> to vector<8x4xf32>
      %cst_57 = arith.constant dense<0.000000e+00> : vector<8x8xf32>
      %168 = tpu.matmul %165, %166, %cst_57 {dimension_numbers = #tpu.dot_dimension_numbers<[1], [1], [0], [0], [0, 0, 1, 0], [], []>} : vector<8x4xf32>, vector<8x4xf32>, vector<8x8xf32> -> vector<8x8xf32>
      %169 = vector.broadcast %cst_18 : f32 to vector<8x8xf32>
      %170 = arith.mulf %168, %169 : vector<8x8xf32>
      %cst_58 = arith.constant dense<0xFF800000> : vector<8xf32>
      %171 = vector.multi_reduction <maximumf>, %170, %cst_58 [1] : vector<8x8xf32> to vector<8xf32>
      %172 = vector.shape_cast %171 : vector<8xf32> to vector<8x1xf32>
      %173 = vector.broadcast %172 : vector<8x1xf32> to vector<8x8xf32>
      %174 = arith.subf %170, %173 : vector<8x8xf32>
      %175 = math.exp %174 : vector<8x8xf32>
      %cst_59 = arith.constant dense<0.000000e+00> : vector<8xf32>
      %176 = vector.multi_reduction <add>, %175, %cst_59 [1] : vector<8x8xf32> to vector<8xf32>
      %177 = vector.shape_cast %176 : vector<8xf32> to vector<8x1xf32>
      %178 = tpu.reciprocal %177 {approx = true} : vector<8x1xf32> -> vector<8x1xf32>
      %179 = arith.mulf %177, %178 : vector<8x1xf32>
      %cst_60 = arith.constant 2.000000e+00 : f32
      %180 = vector.broadcast %cst_60 : f32 to vector<8x1xf32>
      %181 = arith.subf %180, %179 : vector<8x1xf32>
      %182 = arith.mulf %178, %181 : vector<8x1xf32>
      %183 = vector.broadcast %182 : vector<8x1xf32> to vector<8x8xf32>
      %184 = arith.mulf %175, %183 : vector<8x8xf32>
      %cst_61 = arith.constant dense<0.000000e+00> : vector<8x4xf32>
      %185 = tpu.matmul %184, %167, %cst_61 {dimension_numbers = #tpu.dot_dimension_numbers<[1], [0], [0], [1], [0, 0, 1, 1], [], []>} : vector<8x8xf32>, vector<8x4xf32>, vector<8x4xf32> -> vector<8x4xf32>
      %186 = vector.extract_strided_slice %59 {offsets = [0, 24], sizes = [8, 4], strides = [1, 1]} : vector<8x96xf32> to vector<8x4xf32>
      %187 = vector.extract_strided_slice %59 {offsets = [0, 56], sizes = [8, 4], strides = [1, 1]} : vector<8x96xf32> to vector<8x4xf32>
      %188 = vector.extract_strided_slice %59 {offsets = [0, 88], sizes = [8, 4], strides = [1, 1]} : vector<8x96xf32> to vector<8x4xf32>
      %cst_62 = arith.constant dense<0.000000e+00> : vector<8x8xf32>
      %189 = tpu.matmul %186, %187, %cst_62 {dimension_numbers = #tpu.dot_dimension_numbers<[1], [1], [0], [0], [0, 0, 1, 0], [], []>} : vector<8x4xf32>, vector<8x4xf32>, vector<8x8xf32> -> vector<8x8xf32>
      %190 = vector.broadcast %cst_18 : f32 to vector<8x8xf32>
      %191 = arith.mulf %189, %190 : vector<8x8xf32>
      %cst_63 = arith.constant dense<0xFF800000> : vector<8xf32>
      %192 = vector.multi_reduction <maximumf>, %191, %cst_63 [1] : vector<8x8xf32> to vector<8xf32>
      %193 = vector.shape_cast %192 : vector<8xf32> to vector<8x1xf32>
      %194 = vector.broadcast %193 : vector<8x1xf32> to vector<8x8xf32>
      %195 = arith.subf %191, %194 : vector<8x8xf32>
      %196 = math.exp %195 : vector<8x8xf32>
      %cst_64 = arith.constant dense<0.000000e+00> : vector<8xf32>
      %197 = vector.multi_reduction <add>, %196, %cst_64 [1] : vector<8x8xf32> to vector<8xf32>
      %198 = vector.shape_cast %197 : vector<8xf32> to vector<8x1xf32>
      %199 = tpu.reciprocal %198 {approx = true} : vector<8x1xf32> -> vector<8x1xf32>
      %200 = arith.mulf %198, %199 : vector<8x1xf32>
      %cst_65 = arith.constant 2.000000e+00 : f32
      %201 = vector.broadcast %cst_65 : f32 to vector<8x1xf32>
      %202 = arith.subf %201, %200 : vector<8x1xf32>
      %203 = arith.mulf %199, %202 : vector<8x1xf32>
      %204 = vector.broadcast %203 : vector<8x1xf32> to vector<8x8xf32>
      %205 = arith.mulf %196, %204 : vector<8x8xf32>
      %cst_66 = arith.constant dense<0.000000e+00> : vector<8x4xf32>
      %206 = tpu.matmul %205, %188, %cst_66 {dimension_numbers = #tpu.dot_dimension_numbers<[1], [0], [0], [1], [0, 0, 1, 1], [], []>} : vector<8x8xf32>, vector<8x4xf32>, vector<8x4xf32> -> vector<8x4xf32>
      %207 = vector.extract_strided_slice %59 {offsets = [0, 28], sizes = [8, 4], strides = [1, 1]} : vector<8x96xf32> to vector<8x4xf32>
      %208 = vector.extract_strided_slice %59 {offsets = [0, 60], sizes = [8, 4], strides = [1, 1]} : vector<8x96xf32> to vector<8x4xf32>
      %209 = vector.extract_strided_slice %59 {offsets = [0, 92], sizes = [8, 4], strides = [1, 1]} : vector<8x96xf32> to vector<8x4xf32>
      %cst_67 = arith.constant dense<0.000000e+00> : vector<8x8xf32>
      %210 = tpu.matmul %207, %208, %cst_67 {dimension_numbers = #tpu.dot_dimension_numbers<[1], [1], [0], [0], [0, 0, 1, 0], [], []>} : vector<8x4xf32>, vector<8x4xf32>, vector<8x8xf32> -> vector<8x8xf32>
      %211 = vector.broadcast %cst_18 : f32 to vector<8x8xf32>
      %212 = arith.mulf %210, %211 : vector<8x8xf32>
      %cst_68 = arith.constant dense<0xFF800000> : vector<8xf32>
      %213 = vector.multi_reduction <maximumf>, %212, %cst_68 [1] : vector<8x8xf32> to vector<8xf32>
      %214 = vector.shape_cast %213 : vector<8xf32> to vector<8x1xf32>
      %215 = vector.broadcast %214 : vector<8x1xf32> to vector<8x8xf32>
      %216 = arith.subf %212, %215 : vector<8x8xf32>
      %217 = math.exp %216 : vector<8x8xf32>
      %cst_69 = arith.constant dense<0.000000e+00> : vector<8xf32>
      %218 = vector.multi_reduction <add>, %217, %cst_69 [1] : vector<8x8xf32> to vector<8xf32>
      %219 = vector.shape_cast %218 : vector<8xf32> to vector<8x1xf32>
      %220 = tpu.reciprocal %219 {approx = true} : vector<8x1xf32> -> vector<8x1xf32>
      %221 = arith.mulf %219, %220 : vector<8x1xf32>
      %cst_70 = arith.constant 2.000000e+00 : f32
      %222 = vector.broadcast %cst_70 : f32 to vector<8x1xf32>
      %223 = arith.subf %222, %221 : vector<8x1xf32>
      %224 = arith.mulf %220, %223 : vector<8x1xf32>
      %225 = vector.broadcast %224 : vector<8x1xf32> to vector<8x8xf32>
      %226 = arith.mulf %217, %225 : vector<8x8xf32>
      %cst_71 = arith.constant dense<0.000000e+00> : vector<8x4xf32>
      %227 = tpu.matmul %226, %209, %cst_71 {dimension_numbers = #tpu.dot_dimension_numbers<[1], [0], [0], [1], [0, 0, 1, 1], [], []>} : vector<8x8xf32>, vector<8x4xf32>, vector<8x4xf32> -> vector<8x4xf32>
      %228 = tpu.concatenate %80, %101, %122, %143, %164, %185, %206, %227 in 1 : vector<8x4xf32>, vector<8x4xf32>, vector<8x4xf32>, vector<8x4xf32>, vector<8x4xf32>, vector<8x4xf32>, vector<8x4xf32>, vector<8x4xf32> -> vector<8x32xf32>
      %229 = arith.index_cast %arg10 : i32 to index
      %c0_72 = arith.constant 0 : index
      %c0_73 = arith.constant 0 : index
      %230 = vector.load %arg9[%229, %c0_72, %c0_73] : memref<2x8x32xf32, #tpu.memory_space<vmem>>, vector<1x8x32xf32>
      %231 = vector.shape_cast %230 : vector<1x8x32xf32> to vector<8x32xf32>
      %232 = vector.shape_cast %228 : vector<8x32xf32> to vector<1x8x32xf32>
      tpu.vector_store %arg9[%229, %c0_72, %c0_73], %232 {strides = array<i32>} : memref<2x8x32xf32, #tpu.memory_space<vmem>>, vector<1x8x32xf32>,
    }
    %c2_i32_19 = arith.constant 2 : i32
    %c0_20 = arith.constant 0 : index
    %c0_21 = arith.constant 0 : index
    %c0_22 = arith.constant 0 : index
    %41 = vector.load %arg9[%c0_20, %c0_21, %c0_22] : memref<2x8x32xf32, #tpu.memory_space<vmem>>, vector<2x8x32xf32>
    %42 = vector.shape_cast %41 : vector<2x8x32xf32> to vector<16x32xf32>
    %c0_23 = arith.constant 0 : index
    %c0_24 = arith.constant 0 : index
    %43 = vector.load %arg6[%c0_23, %c0_24] : memref<32x64xf32, #tpu.memory_space<vmem>>, vector<32x64xf32>
    %cst_25 = arith.constant dense<0.000000e+00> : vector<16x64xf32>
    %44 = tpu.matmul %42, %43, %cst_25 {dimension_numbers = #tpu.dot_dimension_numbers<[1], [0], [0], [1], [0, 0, 1, 1], [], []>} : vector<16x32xf32>, vector<32x64xf32>, vector<16x64xf32> -> vector<16x64xf32>
    %45 = arith.addf %39, %44 : vector<16x64xf32>
    %46 = vector.extract_strided_slice %45 {offsets = [0, 0], sizes = [16, 32], strides = [1, 1]} : vector<16x64xf32> to vector<16x32xf32>
    %47 = vector.extract_strided_slice %45 {offsets = [0, 32], sizes = [16, 32], strides = [1, 1]} : vector<16x64xf32> to vector<16x32xf32>
    %48 = arith.negf %47 : vector<16x32xf32>
    %49 = math.exp %48 : vector<16x32xf32>
    %cst_26 = arith.constant 1.000000e+00 : f32
    %50 = vector.broadcast %cst_26 : f32 to vector<16x32xf32>
    %51 = arith.addf %50, %49 : vector<16x32xf32>
    %52 = arith.divf %50, %51 : vector<16x32xf32>
    %53 = arith.mulf %46, %52 : vector<16x32xf32>
    %54 = arith.addf %1, %53 : vector<16x32xf32>
    %55 = vector.shape_cast %54 : vector<16x32xf32> to vector<2x8x32xf32>
    %c0_27 = arith.constant 0 : index
    %c0_28 = arith.constant 0 : index
    %c0_29 = arith.constant 0 : index
    %56 = vector.load %arg7[%c0_27, %c0_28, %c0_29] : memref<2x8x32xf32, #tpu.memory_space<vmem>>, vector<2x8x32xf32>
    tpu.vector_store %arg7[%c0_27, %c0_28, %c0_29], %55 {strides = array<i32>} : memref<2x8x32xf32, #tpu.memory_space<vmem>>, vector<2x8x32xf32>,
    return
  }
  func.func @transform_0(%arg0: i32) -> (i32, i32, i32) {
    %c0_i32 = arith.constant 0 : i32
    %c0_i32_0 = arith.constant 0 : i32
    %c0_i32_1 = arith.constant 0 : i32
    return %arg0, %c0_i32, %c0_i32_0 : i32, i32, i32
  }
  func.func @transform_1(%arg0: i32) -> (i32, i32) {
    %c0_i32 = arith.constant 0 : i32
    %c0_i32_0 = arith.constant 0 : i32
    %c0_i32_1 = arith.constant 0 : i32
    return %c0_i32, %c0_i32_0 : i32, i32
  }
  func.func @transform_2(%arg0: i32) -> (i32, i32) {
    %c0_i32 = arith.constant 0 : i32
    %c0_i32_0 = arith.constant 0 : i32
    %c0_i32_1 = arith.constant 0 : i32
    return %c0_i32, %c0_i32_0 : i32, i32
  }
  func.func @transform_3(%arg0: i32) -> (i32, i32) {
    %c0_i32 = arith.constant 0 : i32
    %c0_i32_0 = arith.constant 0 : i32
    %c0_i32_1 = arith.constant 0 : i32
    return %c0_i32, %c0_i32_0 : i32, i32
  }
  func.func @transform_4(%arg0: i32) -> (i32, i32) {
    %c0_i32 = arith.constant 0 : i32
    %c0_i32_0 = arith.constant 0 : i32
    %c0_i32_1 = arith.constant 0 : i32
    return %c0_i32, %c0_i32_0 : i32, i32
  }
  func.func @transform_5(%arg0: i32) -> (i32, i32) {
    %c0_i32 = arith.constant 0 : i32
    %c0_i32_0 = arith.constant 0 : i32
    %c0_i32_1 = arith.constant 0 : i32
    return %c0_i32, %c0_i32_0 : i32, i32
  }
  func.func @transform_6(%arg0: i32) -> (i32, i32, i32) {
    %c0_i32 = arith.constant 0 : i32
    %c0_i32_0 = arith.constant 0 : i32
    %c0_i32_1 = arith.constant 0 : i32
    return %arg0, %c0_i32, %c0_i32_0 : i32, i32, i32
  }
}

module attributes {stable_mosaic.version = 11 : i64} {
  func.func @encoder_layer_kernel(%arg0: i32, %arg1: memref<2x8x32xf32, #tpu.memory_space<vmem>>, %arg2: memref<1x32xf32, #tpu.memory_space<vmem>>, %arg3: memref<1x32xf32, #tpu.memory_space<vmem>>, %arg4: memref<32x160xf32, #tpu.memory_space<vmem>>, %arg5: memref<1x160xf32, #tpu.memory_space<vmem>>, %arg6: memref<32x64xf32, #tpu.memory_space<vmem>>, %arg7: memref<2x8x32xf32, #tpu.memory_space<vmem>>, %arg8: memref<2x8x96xf32, #tpu.memory_space<vmem>>, %arg9: memref<2x8x32xf32, #tpu.memory_space<vmem>>) attributes {dimension_semantics = [#tpu.dimension_semantics<parallel>], iteration_bounds = array<i64: 2>, scalar_prefetch = 0 : i64, scratch_operands = 2 : i64, tpu.core_type = #tpu.core_type<tc>, window_params = [{transform_indices = @transform_0, window_bounds = array<i64: 2, 8, 32>}, {pipeline_mode = #tpu.pipeline_mode<synchronous>, transform_indices = @transform_1, window_bounds = array<i64: 1, 32>}, {pipeline_mode = #tpu.pipeline_mode<synchronous>, transform_indices = @transform_2, window_bounds = array<i64: 1, 32>}, {pipeline_mode = #tpu.pipeline_mode<synchronous>, transform_indices = @transform_3, window_bounds = array<i64: 32, 160>}, {pipeline_mode = #tpu.pipeline_mode<synchronous>, transform_indices = @transform_4, window_bounds = array<i64: 1, 160>}, {pipeline_mode = #tpu.pipeline_mode<synchronous>, transform_indices = @transform_5, window_bounds = array<i64: 32, 64>}, {transform_indices = @transform_6, window_bounds = array<i64: 2, 8, 32>}]} {
    %c0 = arith.constant 0 : index
    %c0_0 = arith.constant 0 : index
    %c0_1 = arith.constant 0 : index
    %0 = vector.load %arg1[%c0, %c0_0, %c0_1] : memref<2x8x32xf32, #tpu.memory_space<vmem>>, vector<2x8x32xf32>
    %1 = vector.shape_cast %0 : vector<2x8x32xf32> to vector<16x32xf32>
    %c0_2 = arith.constant 0 : index
    %c0_3 = arith.constant 0 : index
    %2 = vector.load %arg2[%c0_2, %c0_3] : memref<1x32xf32, #tpu.memory_space<vmem>>, vector<1x32xf32>
    %3 = vector.shape_cast %2 : vector<1x32xf32> to vector<32xf32>
    %c0_4 = arith.constant 0 : index
    %c0_5 = arith.constant 0 : index
    %4 = vector.load %arg3[%c0_4, %c0_5] : memref<1x32xf32, #tpu.memory_space<vmem>>, vector<1x32xf32>
    %5 = vector.shape_cast %4 : vector<1x32xf32> to vector<32xf32>
    %cst = arith.constant dense<0.000000e+00> : vector<16xf32>
    %6 = vector.multi_reduction <add>, %1, %cst [1] : vector<16x32xf32> to vector<16xf32>
    %7 = vector.shape_cast %6 : vector<16xf32> to vector<16x1xf32>
    %cst_6 = arith.constant 3.200000e+01 : f32
    %8 = vector.broadcast %cst_6 : f32 to vector<16x1xf32>
    %9 = arith.divf %7, %8 : vector<16x1xf32>
    %10 = vector.broadcast %9 : vector<16x1xf32> to vector<16x32xf32>
    %11 = arith.subf %1, %10 : vector<16x32xf32>
    %12 = arith.mulf %11, %11 : vector<16x32xf32>
    %cst_7 = arith.constant dense<0.000000e+00> : vector<16xf32>
    %13 = vector.multi_reduction <add>, %12, %cst_7 [1] : vector<16x32xf32> to vector<16xf32>
    %14 = vector.shape_cast %13 : vector<16xf32> to vector<16x1xf32>
    %cst_8 = arith.constant 0.0322580636 : f32
    %15 = vector.broadcast %cst_8 : f32 to vector<16x1xf32>
    %16 = arith.mulf %14, %15 : vector<16x1xf32>
    %17 = math.sqrt %16 : vector<16x1xf32>
    %cst_9 = arith.constant 9.99999997E-7 : f32
    %18 = vector.broadcast %cst_9 : f32 to vector<16x1xf32>
    %19 = arith.addf %17, %18 : vector<16x1xf32>
    %20 = tpu.reciprocal %19 : vector<16x1xf32> -> vector<16x1xf32>
    %21 = vector.broadcast %20 : vector<16x1xf32> to vector<16x32xf32>
    %22 = arith.mulf %11, %21 : vector<16x32xf32>
    %23 = vector.shape_cast %3 : vector<32xf32> to vector<1x32xf32>
    %24 = vector.broadcast %23 : vector<1x32xf32> to vector<16x32xf32>
    %25 = arith.mulf %24, %22 : vector<16x32xf32>
    %26 = vector.shape_cast %5 : vector<32xf32> to vector<1x32xf32>
    %27 = vector.broadcast %26 : vector<1x32xf32> to vector<16x32xf32>
    %28 = arith.addf %25, %27 : vector<16x32xf32>
    %c0_10 = arith.constant 0 : index
    %c0_11 = arith.constant 0 : index
    %29 = vector.load %arg4[%c0_10, %c0_11] : memref<32x160xf32, #tpu.memory_space<vmem>>, vector<32x160xf32>
    %cst_12 = arith.constant dense<0.000000e+00> : vector<16x160xf32>
    %30 = tpu.matmul %28, %29, %cst_12 {dimension_numbers = #tpu.dot_dimension_numbers<[1], [0], [0], [1], [0, 0, 1, 1], [], []>} : vector<16x32xf32>, vector<32x160xf32>, vector<16x160xf32> -> vector<16x160xf32>
    %c0_13 = arith.constant 0 : index
    %c0_14 = arith.constant 0 : index
    %31 = vector.load %arg5[%c0_13, %c0_14] : memref<1x160xf32, #tpu.memory_space<vmem>>, vector<1x160xf32>
    %32 = vector.shape_cast %31 : vector<1x160xf32> to vector<160xf32>
    %33 = vector.shape_cast %32 : vector<160xf32> to vector<1x160xf32>
    %34 = vector.broadcast %33 : vector<1x160xf32> to vector<16x160xf32>
    %35 = arith.addf %30, %34 : vector<16x160xf32>
    %36 = vector.extract_strided_slice %35 {offsets = [0, 0], sizes = [16, 96], strides = [1, 1]} : vector<16x160xf32> to vector<16x96xf32>
    %37 = vector.shape_cast %36 : vector<16x96xf32> to vector<2x8x96xf32>
    %c0_15 = arith.constant 0 : index
    %c0_16 = arith.constant 0 : index
    %c0_17 = arith.constant 0 : index
    %38 = vector.load %arg8[%c0_15, %c0_16, %c0_17] : memref<2x8x96xf32, #tpu.memory_space<vmem>>, vector<2x8x96xf32>
    tpu.vector_store %arg8[%c0_15, %c0_16, %c0_17], %37 {strides = array<i32>} : memref<2x8x96xf32, #tpu.memory_space<vmem>>, vector<2x8x96xf32>,
    %39 = vector.extract_strided_slice %35 {offsets = [0, 96], sizes = [16, 64], strides = [1, 1]} : vector<16x160xf32> to vector<16x64xf32>
    %cst_18 = arith.constant 5.000000e-01 : f32
    %c0_i32 = arith.constant 0 : i32
    %c2_i32 = arith.constant 2 : i32
    %40 = arith.addi %c0_i32, %c2_i32 : i32
    %c1_i32 = arith.constant 1 : i32
    scf.for %arg10 = %c0_i32 to %40 step %c1_i32  : i32 {
      %57 = arith.index_cast %arg10 : i32 to index
      %c0_30 = arith.constant 0 : index
      %c0_31 = arith.constant 0 : index
      %58 = vector.load %arg8[%57, %c0_30, %c0_31] : memref<2x8x96xf32, #tpu.memory_space<vmem>>, vector<1x8x96xf32>
      %59 = vector.shape_cast %58 : vector<1x8x96xf32> to vector<8x96xf32>
      %60 = vector.extract_strided_slice %59 {offsets = [0, 0], sizes = [8, 4], strides = [1, 1]} : vector<8x96xf32> to vector<8x4xf32>
      %61 = vector.extract_strided_slice %59 {offsets = [0, 32], sizes = [8, 4], strides = [1, 1]} : vector<8x96xf32> to vector<8x4xf32>
      %62 = vector.extract_strided_slice %59 {offsets = [0, 64], sizes = [8, 4], strides = [1, 1]} : vector<8x96xf32> to vector<8x4xf32>
      %cst_32 = arith.constant dense<0.000000e+00> : vector<8x8xf32>
      %63 = tpu.matmul %60, %61, %cst_32 {dimension_numbers = #tpu.dot_dimension_numbers<[1], [1], [0], [0], [0, 0, 1, 0], [], []>} : vector<8x4xf32>, vector<8x4xf32>, vector<8x8xf32> -> vector<8x8xf32>
      %64 = vector.broadcast %cst_18 : f32 to vector<8x8xf32>
      %65 = arith.mulf %63, %64 : vector<8x8xf32>
      %cst_33 = arith.constant dense<0xFF800000> : vector<8xf32>
      %66 = vector.multi_reduction <maximumf>, %65, %cst_33 [1] : vector<8x8xf32> to vector<8xf32>
      %67 = vector.shape_cast %66 : vector<8xf32> to vector<8x1xf32>
      %68 = vector.broadcast %67 : vector<8x1xf32> to vector<8x8xf32>
      %69 = arith.subf %65, %68 : vector<8x8xf32>
      %70 = math.exp %69 : vector<8x8xf32>
      %cst_34 = arith.constant dense<0.000000e+00> : vector<8xf32>
      %71 = vector.multi_reduction <add>, %70, %cst_34 [1] : vector<8x8xf32> to vector<8xf32>
      %72 = vector.shape_cast %71 : vector<8xf32> to vector<8x1xf32>
      %73 = tpu.reciprocal %72 {approx = true} : vector<8x1xf32> -> vector<8x1xf32>
      %74 = arith.mulf %72, %73 : vector<8x1xf32>
      %cst_35 = arith.constant 2.000000e+00 : f32
      %75 = vector.broadcast %cst_35 : f32 to vector<8x1xf32>
      %76 = arith.subf %75, %74 : vector<8x1xf32>
      %77 = arith.mulf %73, %76 : vector<8x1xf32>
      %78 = vector.broadcast %77 : vector<8x1xf32> to vector<8x8xf32>
      %79 = arith.mulf %70, %78 : vector<8x8xf32>
      %cst_36 = arith.constant dense<0.000000e+00> : vector<8x4xf32>
      %80 = tpu.matmul %79, %62, %cst_36 {dimension_numbers = #tpu.dot_dimension_numbers<[1], [0], [0], [1], [0, 0, 1, 1], [], []>} : vector<8x8xf32>, vector<8x4xf32>, vector<8x4xf32> -> vector<8x4xf32>
      %81 = vector.extract_strided_slice %59 {offsets = [0, 4], sizes = [8, 4], strides = [1, 1]} : vector<8x96xf32> to vector<8x4xf32>
      %82 = vector.extract_strided_slice %59 {offsets = [0, 36], sizes = [8, 4], strides = [1, 1]} : vector<8x96xf32> to vector<8x4xf32>
      %83 = vector.extract_strided_slice %59 {offsets = [0, 68], sizes = [8, 4], strides = [1, 1]} : vector<8x96xf32> to vector<8x4xf32>
      %cst_37 = arith.constant dense<0.000000e+00> : vector<8x8xf32>
      %84 = tpu.matmul %81, %82, %cst_37 {dimension_numbers = #tpu.dot_dimension_numbers<[1], [1], [0], [0], [0, 0, 1, 0], [], []>} : vector<8x4xf32>, vector<8x4xf32>, vector<8x8xf32> -> vector<8x8xf32>
      %85 = vector.broadcast %cst_18 : f32 to vector<8x8xf32>
      %86 = arith.mulf %84, %85 : vector<8x8xf32>
      %cst_38 = arith.constant dense<0xFF800000> : vector<8xf32>
      %87 = vector.multi_reduction <maximumf>, %86, %cst_38 [1] : vector<8x8xf32> to vector<8xf32>
      %88 = vector.shape_cast %87 : vector<8xf32> to vector<8x1xf32>
      %89 = vector.broadcast %88 : vector<8x1xf32> to vector<8x8xf32>
      %90 = arith.subf %86, %89 : vector<8x8xf32>
      %91 = math.exp %90 : vector<8x8xf32>
      %cst_39 = arith.constant dense<0.000000e+00> : vector<8xf32>
      %92 = vector.multi_reduction <add>, %91, %cst_39 [1] : vector<8x8xf32> to vector<8xf32>
      %93 = vector.shape_cast %92 : vector<8xf32> to vector<8x1xf32>
      %94 = tpu.reciprocal %93 {approx = true} : vector<8x1xf32> -> vector<8x1xf32>
      %95 = arith.mulf %93, %94 : vector<8x1xf32>
      %cst_40 = arith.constant 2.000000e+00 : f32
      %96 = vector.broadcast %cst_40 : f32 to vector<8x1xf32>
      %97 = arith.subf %96, %95 : vector<8x1xf32>
      %98 = arith.mulf %94, %97 : vector<8x1xf32>
      %99 = vector.broadcast %98 : vector<8x1xf32> to vector<8x8xf32>
      %100 = arith.mulf %91, %99 : vector<8x8xf32>
      %cst_41 = arith.constant dense<0.000000e+00> : vector<8x4xf32>
      %101 = tpu.matmul %100, %83, %cst_41 {dimension_numbers = #tpu.dot_dimension_numbers<[1], [0], [0], [1], [0, 0, 1, 1], [], []>} : vector<8x8xf32>, vector<8x4xf32>, vector<8x4xf32> -> vector<8x4xf32>
      %102 = vector.extract_strided_slice %59 {offsets = [0, 8], sizes = [8, 4], strides = [1, 1]} : vector<8x96xf32> to vector<8x4xf32>
      %103 = vector.extract_strided_slice %59 {offsets = [0, 40], sizes = [8, 4], strides = [1, 1]} : vector<8x96xf32> to vector<8x4xf32>
      %104 = vector.extract_strided_slice %59 {offsets = [0, 72], sizes = [8, 4], strides = [1, 1]} : vector<8x96xf32> to vector<8x4xf32>
      %cst_42 = arith.constant dense<0.000000e+00> : vector<8x8xf32>
      %105 = tpu.matmul %102, %103, %cst_42 {dimension_numbers = #tpu.dot_dimension_numbers<[1], [1], [0], [0], [0, 0, 1, 0], [], []>} : vector<8x4xf32>, vector<8x4xf32>, vector<8x8xf32> -> vector<8x8xf32>
      %106 = vector.broadcast %cst_18 : f32 to vector<8x8xf32>
      %107 = arith.mulf %105, %106 : vector<8x8xf32>
      %cst_43 = arith.constant dense<0xFF800000> : vector<8xf32>
      %108 = vector.multi_reduction <maximumf>, %107, %cst_43 [1] : vector<8x8xf32> to vector<8xf32>
      %109 = vector.shape_cast %108 : vector<8xf32> to vector<8x1xf32>
      %110 = vector.broadcast %109 : vector<8x1xf32> to vector<8x8xf32>
      %111 = arith.subf %107, %110 : vector<8x8xf32>
      %112 = math.exp %111 : vector<8x8xf32>
      %cst_44 = arith.constant dense<0.000000e+00> : vector<8xf32>
      %113 = vector.multi_reduction <add>, %112, %cst_44 [1] : vector<8x8xf32> to vector<8xf32>
      %114 = vector.shape_cast %113 : vector<8xf32> to vector<8x1xf32>
      %115 = tpu.reciprocal %114 {approx = true} : vector<8x1xf32> -> vector<8x1xf32>
      %116 = arith.mulf %114, %115 : vector<8x1xf32>
      %cst_45 = arith.constant 2.000000e+00 : f32
      %117 = vector.broadcast %cst_45 : f32 to vector<8x1xf32>
      %118 = arith.subf %117, %116 : vector<8x1xf32>
      %119 = arith.mulf %115, %118 : vector<8x1xf32>
      %120 = vector.broadcast %119 : vector<8x1xf32> to vector<8x8xf32>
      %121 = arith.mulf %112, %120 : vector<8x8xf32>
      %cst_46 = arith.constant dense<0.000000e+00> : vector<8x4xf32>
      %122 = tpu.matmul %121, %104, %cst_46 {dimension_numbers = #tpu.dot_dimension_numbers<[1], [0], [0], [1], [0, 0, 1, 1], [], []>} : vector<8x8xf32>, vector<8x4xf32>, vector<8x4xf32> -> vector<8x4xf32>
      %123 = vector.extract_strided_slice %59 {offsets = [0, 12], sizes = [8, 4], strides = [1, 1]} : vector<8x96xf32> to vector<8x4xf32>
      %124 = vector.extract_strided_slice %59 {offsets = [0, 44], sizes = [8, 4], strides = [1, 1]} : vector<8x96xf32> to vector<8x4xf32>
      %125 = vector.extract_strided_slice %59 {offsets = [0, 76], sizes = [8, 4], strides = [1, 1]} : vector<8x96xf32> to vector<8x4xf32>
      %cst_47 = arith.constant dense<0.000000e+00> : vector<8x8xf32>
      %126 = tpu.matmul %123, %124, %cst_47 {dimension_numbers = #tpu.dot_dimension_numbers<[1], [1], [0], [0], [0, 0, 1, 0], [], []>} : vector<8x4xf32>, vector<8x4xf32>, vector<8x8xf32> -> vector<8x8xf32>
      %127 = vector.broadcast %cst_18 : f32 to vector<8x8xf32>
      %128 = arith.mulf %126, %127 : vector<8x8xf32>
      %cst_48 = arith.constant dense<0xFF800000> : vector<8xf32>
      %129 = vector.multi_reduction <maximumf>, %128, %cst_48 [1] : vector<8x8xf32> to vector<8xf32>
      %130 = vector.shape_cast %129 : vector<8xf32> to vector<8x1xf32>
      %131 = vector.broadcast %130 : vector<8x1xf32> to vector<8x8xf32>
      %132 = arith.subf %128, %131 : vector<8x8xf32>
      %133 = math.exp %132 : vector<8x8xf32>
      %cst_49 = arith.constant dense<0.000000e+00> : vector<8xf32>
      %134 = vector.multi_reduction <add>, %133, %cst_49 [1] : vector<8x8xf32> to vector<8xf32>
      %135 = vector.shape_cast %134 : vector<8xf32> to vector<8x1xf32>
      %136 = tpu.reciprocal %135 {approx = true} : vector<8x1xf32> -> vector<8x1xf32>
      %137 = arith.mulf %135, %136 : vector<8x1xf32>
      %cst_50 = arith.constant 2.000000e+00 : f32
      %138 = vector.broadcast %cst_50 : f32 to vector<8x1xf32>
      %139 = arith.subf %138, %137 : vector<8x1xf32>
      %140 = arith.mulf %136, %139 : vector<8x1xf32>
      %141 = vector.broadcast %140 : vector<8x1xf32> to vector<8x8xf32>
      %142 = arith.mulf %133, %141 : vector<8x8xf32>
      %cst_51 = arith.constant dense<0.000000e+00> : vector<8x4xf32>
      %143 = tpu.matmul %142, %125, %cst_51 {dimension_numbers = #tpu.dot_dimension_numbers<[1], [0], [0], [1], [0, 0, 1, 1], [], []>} : vector<8x8xf32>, vector<8x4xf32>, vector<8x4xf32> -> vector<8x4xf32>
      %144 = vector.extract_strided_slice %59 {offsets = [0, 16], sizes = [8, 4], strides = [1, 1]} : vector<8x96xf32> to vector<8x4xf32>
      %145 = vector.extract_strided_slice %59 {offsets = [0, 48], sizes = [8, 4], strides = [1, 1]} : vector<8x96xf32> to vector<8x4xf32>
      %146 = vector.extract_strided_slice %59 {offsets = [0, 80], sizes = [8, 4], strides = [1, 1]} : vector<8x96xf32> to vector<8x4xf32>
      %cst_52 = arith.constant dense<0.000000e+00> : vector<8x8xf32>
      %147 = tpu.matmul %144, %145, %cst_52 {dimension_numbers = #tpu.dot_dimension_numbers<[1], [1], [0], [0], [0, 0, 1, 0], [], []>} : vector<8x4xf32>, vector<8x4xf32>, vector<8x8xf32> -> vector<8x8xf32>
      %148 = vector.broadcast %cst_18 : f32 to vector<8x8xf32>
      %149 = arith.mulf %147, %148 : vector<8x8xf32>
      %cst_53 = arith.constant dense<0xFF800000> : vector<8xf32>
      %150 = vector.multi_reduction <maximumf>, %149, %cst_53 [1] : vector<8x8xf32> to vector<8xf32>
      %151 = vector.shape_cast %150 : vector<8xf32> to vector<8x1xf32>
      %152 = vector.broadcast %151 : vector<8x1xf32> to vector<8x8xf32>
      %153 = arith.subf %149, %152 : vector<8x8xf32>
      %154 = math.exp %153 : vector<8x8xf32>
      %cst_54 = arith.constant dense<0.000000e+00> : vector<8xf32>
      %155 = vector.multi_reduction <add>, %154, %cst_54 [1] : vector<8x8xf32> to vector<8xf32>
      %156 = vector.shape_cast %155 : vector<8xf32> to vector<8x1xf32>
      %157 = tpu.reciprocal %156 {approx = true} : vector<8x1xf32> -> vector<8x1xf32>
      %158 = arith.mulf %156, %157 : vector<8x1xf32>
      %cst_55 = arith.constant 2.000000e+00 : f32
      %159 = vector.broadcast %cst_55 : f32 to vector<8x1xf32>
      %160 = arith.subf %159, %158 : vector<8x1xf32>
      %161 = arith.mulf %157, %160 : vector<8x1xf32>
      %162 = vector.broadcast %161 : vector<8x1xf32> to vector<8x8xf32>
      %163 = arith.mulf %154, %162 : vector<8x8xf32>
      %cst_56 = arith.constant dense<0.000000e+00> : vector<8x4xf32>
      %164 = tpu.matmul %163, %146, %cst_56 {dimension_numbers = #tpu.dot_dimension_numbers<[1], [0], [0], [1], [0, 0, 1, 1], [], []>} : vector<8x8xf32>, vector<8x4xf32>, vector<8x4xf32> -> vector<8x4xf32>
      %165 = vector.extract_strided_slice %59 {offsets = [0, 20], sizes = [8, 4], strides = [1, 1]} : vector<8x96xf32> to vector<8x4xf32>
      %166 = vector.extract_strided_slice %59 {offsets = [0, 52], sizes = [8, 4], strides = [1, 1]} : vector<8x96xf32> to vector<8x4xf32>
      %167 = vector.extract_strided_slice %59 {offsets = [0, 84], sizes = [8, 4], strides = [1, 1]} : vector<8x96xf32> to vector<8x4xf32>
      %cst_57 = arith.constant dense<0.000000e+00> : vector<8x8xf32>
      %168 = tpu.matmul %165, %166, %cst_57 {dimension_numbers = #tpu.dot_dimension_numbers<[1], [1], [0], [0], [0, 0, 1, 0], [], []>} : vector<8x4xf32>, vector<8x4xf32>, vector<8x8xf32> -> vector<8x8xf32>
      %169 = vector.broadcast %cst_18 : f32 to vector<8x8xf32>
      %170 = arith.mulf %168, %169 : vector<8x8xf32>
      %cst_58 = arith.constant dense<0xFF800000> : vector<8xf32>
      %171 = vector.multi_reduction <maximumf>, %170, %cst_58 [1] : vector<8x8xf32> to vector<8xf32>
      %172 = vector.shape_cast %171 : vector<8xf32> to vector<8x1xf32>
      %173 = vector.broadcast %172 : vector<8x1xf32> to vector<8x8xf32>
      %174 = arith.subf %170, %173 : vector<8x8xf32>
      %175 = math.exp %174 : vector<8x8xf32>
      %cst_59 = arith.constant dense<0.000000e+00> : vector<8xf32>
      %176 = vector.multi_reduction <add>, %175, %cst_59 [1] : vector<8x8xf32> to vector<8xf32>
      %177 = vector.shape_cast %176 : vector<8xf32> to vector<8x1xf32>
      %178 = tpu.reciprocal %177 {approx = true} : vector<8x1xf32> -> vector<8x1xf32>
      %179 = arith.mulf %177, %178 : vector<8x1xf32>
      %cst_60 = arith.constant 2.000000e+00 : f32
      %180 = vector.broadcast %cst_60 : f32 to vector<8x1xf32>
      %181 = arith.subf %180, %179 : vector<8x1xf32>
      %182 = arith.mulf %178, %181 : vector<8x1xf32>
      %183 = vector.broadcast %182 : vector<8x1xf32> to vector<8x8xf32>
      %184 = arith.mulf %175, %183 : vector<8x8xf32>
      %cst_61 = arith.constant dense<0.000000e+00> : vector<8x4xf32>
      %185 = tpu.matmul %184, %167, %cst_61 {dimension_numbers = #tpu.dot_dimension_numbers<[1], [0], [0], [1], [0, 0, 1, 1], [], []>} : vector<8x8xf32>, vector<8x4xf32>, vector<8x4xf32> -> vector<8x4xf32>
      %186 = vector.extract_strided_slice %59 {offsets = [0, 24], sizes = [8, 4], strides = [1, 1]} : vector<8x96xf32> to vector<8x4xf32>
      %187 = vector.extract_strided_slice %59 {offsets = [0, 56], sizes = [8, 4], strides = [1, 1]} : vector<8x96xf32> to vector<8x4xf32>
      %188 = vector.extract_strided_slice %59 {offsets = [0, 88], sizes = [8, 4], strides = [1, 1]} : vector<8x96xf32> to vector<8x4xf32>
      %cst_62 = arith.constant dense<0.000000e+00> : vector<8x8xf32>
      %189 = tpu.matmul %186, %187, %cst_62 {dimension_numbers = #tpu.dot_dimension_numbers<[1], [1], [0], [0], [0, 0, 1, 0], [], []>} : vector<8x4xf32>, vector<8x4xf32>, vector<8x8xf32> -> vector<8x8xf32>
      %190 = vector.broadcast %cst_18 : f32 to vector<8x8xf32>
      %191 = arith.mulf %189, %190 : vector<8x8xf32>
      %cst_63 = arith.constant dense<0xFF800000> : vector<8xf32>
      %192 = vector.multi_reduction <maximumf>, %191, %cst_63 [1] : vector<8x8xf32> to vector<8xf32>
      %193 = vector.shape_cast %192 : vector<8xf32> to vector<8x1xf32>
      %194 = vector.broadcast %193 : vector<8x1xf32> to vector<8x8xf32>
      %195 = arith.subf %191, %194 : vector<8x8xf32>
      %196 = math.exp %195 : vector<8x8xf32>
      %cst_64 = arith.constant dense<0.000000e+00> : vector<8xf32>
      %197 = vector.multi_reduction <add>, %196, %cst_64 [1] : vector<8x8xf32> to vector<8xf32>
      %198 = vector.shape_cast %197 : vector<8xf32> to vector<8x1xf32>
      %199 = tpu.reciprocal %198 {approx = true} : vector<8x1xf32> -> vector<8x1xf32>
      %200 = arith.mulf %198, %199 : vector<8x1xf32>
      %cst_65 = arith.constant 2.000000e+00 : f32
      %201 = vector.broadcast %cst_65 : f32 to vector<8x1xf32>
      %202 = arith.subf %201, %200 : vector<8x1xf32>
      %203 = arith.mulf %199, %202 : vector<8x1xf32>
      %204 = vector.broadcast %203 : vector<8x1xf32> to vector<8x8xf32>
      %205 = arith.mulf %196, %204 : vector<8x8xf32>
      %cst_66 = arith.constant dense<0.000000e+00> : vector<8x4xf32>
      %206 = tpu.matmul %205, %188, %cst_66 {dimension_numbers = #tpu.dot_dimension_numbers<[1], [0], [0], [1], [0, 0, 1, 1], [], []>} : vector<8x8xf32>, vector<8x4xf32>, vector<8x4xf32> -> vector<8x4xf32>
      %207 = vector.extract_strided_slice %59 {offsets = [0, 28], sizes = [8, 4], strides = [1, 1]} : vector<8x96xf32> to vector<8x4xf32>
      %208 = vector.extract_strided_slice %59 {offsets = [0, 60], sizes = [8, 4], strides = [1, 1]} : vector<8x96xf32> to vector<8x4xf32>
      %209 = vector.extract_strided_slice %59 {offsets = [0, 92], sizes = [8, 4], strides = [1, 1]} : vector<8x96xf32> to vector<8x4xf32>
      %cst_67 = arith.constant dense<0.000000e+00> : vector<8x8xf32>
      %210 = tpu.matmul %207, %208, %cst_67 {dimension_numbers = #tpu.dot_dimension_numbers<[1], [1], [0], [0], [0, 0, 1, 0], [], []>} : vector<8x4xf32>, vector<8x4xf32>, vector<8x8xf32> -> vector<8x8xf32>
      %211 = vector.broadcast %cst_18 : f32 to vector<8x8xf32>
      %212 = arith.mulf %210, %211 : vector<8x8xf32>
      %cst_68 = arith.constant dense<0xFF800000> : vector<8xf32>
      %213 = vector.multi_reduction <maximumf>, %212, %cst_68 [1] : vector<8x8xf32> to vector<8xf32>
      %214 = vector.shape_cast %213 : vector<8xf32> to vector<8x1xf32>
      %215 = vector.broadcast %214 : vector<8x1xf32> to vector<8x8xf32>
      %216 = arith.subf %212, %215 : vector<8x8xf32>
      %217 = math.exp %216 : vector<8x8xf32>
      %cst_69 = arith.constant dense<0.000000e+00> : vector<8xf32>
      %218 = vector.multi_reduction <add>, %217, %cst_69 [1] : vector<8x8xf32> to vector<8xf32>
      %219 = vector.shape_cast %218 : vector<8xf32> to vector<8x1xf32>
      %220 = tpu.reciprocal %219 {approx = true} : vector<8x1xf32> -> vector<8x1xf32>
      %221 = arith.mulf %219, %220 : vector<8x1xf32>
      %cst_70 = arith.constant 2.000000e+00 : f32
      %222 = vector.broadcast %cst_70 : f32 to vector<8x1xf32>
      %223 = arith.subf %222, %221 : vector<8x1xf32>
      %224 = arith.mulf %220, %223 : vector<8x1xf32>
      %225 = vector.broadcast %224 : vector<8x1xf32> to vector<8x8xf32>
      %226 = arith.mulf %217, %225 : vector<8x8xf32>
      %cst_71 = arith.constant dense<0.000000e+00> : vector<8x4xf32>
      %227 = tpu.matmul %226, %209, %cst_71 {dimension_numbers = #tpu.dot_dimension_numbers<[1], [0], [0], [1], [0, 0, 1, 1], [], []>} : vector<8x8xf32>, vector<8x4xf32>, vector<8x4xf32> -> vector<8x4xf32>
      %228 = tpu.concatenate %80, %101, %122, %143, %164, %185, %206, %227 in 1 : vector<8x4xf32>, vector<8x4xf32>, vector<8x4xf32>, vector<8x4xf32>, vector<8x4xf32>, vector<8x4xf32>, vector<8x4xf32>, vector<8x4xf32> -> vector<8x32xf32>
      %229 = arith.index_cast %arg10 : i32 to index
      %c0_72 = arith.constant 0 : index
      %c0_73 = arith.constant 0 : index
      %230 = vector.load %arg9[%229, %c0_72, %c0_73] : memref<2x8x32xf32, #tpu.memory_space<vmem>>, vector<1x8x32xf32>
      %231 = vector.shape_cast %230 : vector<1x8x32xf32> to vector<8x32xf32>
      %232 = vector.shape_cast %228 : vector<8x32xf32> to vector<1x8x32xf32>
      tpu.vector_store %arg9[%229, %c0_72, %c0_73], %232 {strides = array<i32>} : memref<2x8x32xf32, #tpu.memory_space<vmem>>, vector<1x8x32xf32>,
    }
    %c2_i32_19 = arith.constant 2 : i32
    %c0_20 = arith.constant 0 : index
    %c0_21 = arith.constant 0 : index
    %c0_22 = arith.constant 0 : index
    %41 = vector.load %arg9[%c0_20, %c0_21, %c0_22] : memref<2x8x32xf32, #tpu.memory_space<vmem>>, vector<2x8x32xf32>
    %42 = vector.shape_cast %41 : vector<2x8x32xf32> to vector<16x32xf32>
    %c0_23 = arith.constant 0 : index
    %c0_24 = arith.constant 0 : index
    %43 = vector.load %arg6[%c0_23, %c0_24] : memref<32x64xf32, #tpu.memory_space<vmem>>, vector<32x64xf32>
    %cst_25 = arith.constant dense<0.000000e+00> : vector<16x64xf32>
    %44 = tpu.matmul %42, %43, %cst_25 {dimension_numbers = #tpu.dot_dimension_numbers<[1], [0], [0], [1], [0, 0, 1, 1], [], []>} : vector<16x32xf32>, vector<32x64xf32>, vector<16x64xf32> -> vector<16x64xf32>
    %45 = arith.addf %39, %44 : vector<16x64xf32>
    %46 = vector.extract_strided_slice %45 {offsets = [0, 0], sizes = [16, 32], strides = [1, 1]} : vector<16x64xf32> to vector<16x32xf32>
    %47 = vector.extract_strided_slice %45 {offsets = [0, 32], sizes = [16, 32], strides = [1, 1]} : vector<16x64xf32> to vector<16x32xf32>
    %48 = arith.negf %47 : vector<16x32xf32>
    %49 = math.exp %48 : vector<16x32xf32>
    %cst_26 = arith.constant 1.000000e+00 : f32
    %50 = vector.broadcast %cst_26 : f32 to vector<16x32xf32>
    %51 = arith.addf %50, %49 : vector<16x32xf32>
    %52 = arith.divf %50, %51 : vector<16x32xf32>
    %53 = arith.mulf %46, %52 : vector<16x32xf32>
    %54 = arith.addf %1, %53 : vector<16x32xf32>
    %55 = vector.shape_cast %54 : vector<16x32xf32> to vector<2x8x32xf32>
    %c0_27 = arith.constant 0 : index
    %c0_28 = arith.constant 0 : index
    %c0_29 = arith.constant 0 : index
    %56 = vector.load %arg7[%c0_27, %c0_28, %c0_29] : memref<2x8x32xf32, #tpu.memory_space<vmem>>, vector<2x8x32xf32>
    tpu.vector_store %arg7[%c0_27, %c0_28, %c0_29], %55 {strides = array<i32>} : memref<2x8x32xf32, #tpu.memory_space<vmem>>, vector<2x8x32xf32>,
    return
  }
  func.func @transform_0(%arg0: i32) -> (i32, i32, i32) {
    %c0_i32 = arith.constant 0 : i32
    %c0_i32_0 = arith.constant 0 : i32
    %c0_i32_1 = arith.constant 0 : i32
    return %arg0, %c0_i32, %c0_i32_0 : i32, i32, i32
  }
  func.func @transform_1(%arg0: i32) -> (i32, i32) {
    %c0_i32 = arith.constant 0 : i32
    %c0_i32_0 = arith.constant 0 : i32
    %c0_i32_1 = arith.constant 0 : i32
    return %c0_i32, %c0_i32_0 : i32, i32
  }
  func.func @transform_2(%arg0: i32) -> (i32, i32) {
    %c0_i32 = arith.constant 0 : i32
    %c0_i32_0 = arith.constant 0 : i32
    %c0_i32_1 = arith.constant 0 : i32
    return %c0_i32, %c0_i32_0 : i32, i32
  }
  func.func @transform_3(%arg0: i32) -> (i32, i32) {
    %c0_i32 = arith.constant 0 : i32
    %c0_i32_0 = arith.constant 0 : i32
    %c0_i32_1 = arith.constant 0 : i32
    return %c0_i32, %c0_i32_0 : i32, i32
  }
  func.func @transform_4(%arg0: i32) -> (i32, i32) {
    %c0_i32 = arith.constant 0 : i32
    %c0_i32_0 = arith.constant 0 : i32
    %c0_i32_1 = arith.constant 0 : i32
    return %c0_i32, %c0_i32_0 : i32, i32
  }
  func.func @transform_5(%arg0: i32) -> (i32, i32) {
    %c0_i32 = arith.constant 0 : i32
    %c0_i32_0 = arith.constant 0 : i32
    %c0_i32_1 = arith.constant 0 : i32
    return %c0_i32, %c0_i32_0 : i32, i32
  }
  func.func @transform_6(%arg0: i32) -> (i32, i32, i32) {
    %c0_i32 = arith.constant 0 : i32
    %c0_i32_0 = arith.constant 0 : i32
    %c0_i32_1 = arith.constant 0 : i32
    return %arg0, %c0_i32, %c0_i32_0 : i32, i32, i32
  }
}

</mosaic_0001>

<bundles_post_ra>
// kernel: tpu_custom_call.1
= control target key start
LH: loop header
LB: loop body
LE: loop exit
PB: predicated region body
PF: predicated region fallthrough
CT: control target
= control target key end

     0   :  { %11 = vsyncpa [#allocation5], 0  ;;  %s3216_s0 = inlined_call_operand.hbm [shape: f32[4,8,32], index: 0, kind: input, shape index: {}]   ;;  %s3217_s1 = inlined_call_operand.vmem [shape: f32[1,32], index: 1, kind: input, shape index: {}]   ;;  %s3218_s2 = inlined_call_operand.hbm [shape: f32[1,32], index: 2, kind: input, shape index: {}]   ;;  %s3219_s3 = inlined_call_operand.hbm [shape: f32[32,160], index: 3, kind: input, shape index: {}]   ;;  %s3220_s4 = inlined_call_operand.vmem [shape: f32[1,160], index: 4, kind: input, shape index: {}]   ;;  %s3221_s5 = inlined_call_operand.hbm [shape: f32[32,64], index: 5, kind: input, shape index: {}]   ;;  %s3222_s6 = inlined_call_operand.hbm [shape: f32[4,8,32], index: 6, kind: output, shape index: {}]  }
   0x1   :  { %13 = vsyncpa [#allocation5 + $0x1], 0 }
   0x2   :  { %14 = vsyncpa [#allocation8], 0 }
   0x3   :  { %15 = vsyncpa [#allocation11], 0 }
   0x4   :  { %16 = vsyncpa [#allocation6], 0 }
   0x5   :  { %18 = vsyncpa [#allocation6 + $0x1], 0  ;;  %s2779_s21 = smov 0   ;;  %s2781_s22 = smov 0  }
   0x6   :  { %s2783_s23 = smov 0   ;;  %s2785_s24 = smov 0  }
   0x7 LB: > { %s2800_s25 = sadd.s32 4294967295, %s2692_s24   ;;  %s2144_s26 = sadd.s32 4294967294, %s2692_s24   ;;  %s2692_s24 = sphi %s2785_s24, %s3249_s24   ;;  %s2688_s23 = sphi %s2783_s23, %s3248_s23   ;;  %s2684_s22 = sphi %s2781_s22, %s3247_s22   ;;  %s2680_s21 = sphi %s2779_s21, %s3246_s21  }
   0x8   : > { %p44_p0 = scmp.ne.s32.totalorder %s2684_s22, %s2680_s21  ;;  %p3223_p1 = scmp.eq.s32.totalorder %s2800_s25, 0 }
   0x9   : > { %p173_p2 = scmp.eq.s32.totalorder %s2800_s25, 1  ;;  %p179_p3 = scmp.eq.s32.totalorder %s2144_s26, 1 }
   0xa   : > { %p2809_p4 = por %p3223_p1, %p44_p0  ;;  %p2145_p5 = scmp.ge.s32.totalorder %s2692_s24, 1 }
   0xb   : > { %p2814_p6 = por %p179_p3, %p44_p0  ;;  %p186_p7 = scmp.lt.s32.totalorder %s2692_s24, 3 }
   0xc   : > { %s3229_s27 = scalar_select %p2809_p4, 1, 0 }
   0xd   : > { %s3230_s28 = scalar_select %p2814_p6, 1, 0 }
   0xe   : > { %p2819_p8 = pnand %p2145_p5, %p186_p7  ;;  %s2698_s30 = smov [#allocation7]  }
   0xf   : > { %s202_s7 = sshll.u32 %s2698_s30, 4  ;;  %s2699_s8 = smov [#allocation9]   ;;  %s203_s7 = int_to_ptr.vmem [resolvable:$true] %s202_s7 }
  0x10   : > { %s3231_s29 = scalar_select %p2819_p8, 1, 0 }
  0x11   : > { %p2352_p10 = pneg %p2819_p8  ;;  %s212_s9 = sshll.u32 %s2699_s8, 4  ;;  %s2832_s9 = int_to_ptr.vmem [resolvable:$true] %s212_s9 }
  0x12   : > { %s2700_s11 = smov [#allocation10]   ;;  %s2521_s13 = scalar_lea.vmem %s203_s7, 16 }
  0x13   : > { %p2828_p11 = pnand %p2352_p10, %p3223_p1  ;;  %s228_s12 = sshll.u32 %s2700_s11, 4  ;;  %s229_s12 = int_to_ptr.vmem [resolvable:$true] %s228_s12 }
  0x14   : > { %p2522_p13 = scmp.ne.s32.totalorder %s203_s7, %s2521_s13  ;;  %s2528_s14 = scalar_lea.vmem %s203_s7, 32 }
  0x15   : > { %p2512_p12 = pneg %p2828_p11  ;;  %p2529_p5 = scmp.lt.s32.totalorder %s203_s7, %s203_s7 }
  0x16   : > { %p2530_p7 = scmp.lt.s32.totalorder %s2528_s14, %s2521_s13 }
  0x17   : > { %p2524_p0 = pnand %p2522_p13, %p2512_p12 }
  0x18   : > { %p2531_p10 = por %p2530_p7, %p2529_p5 }
  0x19   : > { %p2525_p3 = pneg %p2524_p0 }
  0x1b   : > { %p2532_p9 = pnand %p2531_p10, %p2525_p3 }
  0x1d   : > { %2535 = shalt.err (!%p2532_p9)
}
  0x1e   : > { %2355 = dma.hbm_to_vmem [thread:$0]  (!%p2828_p11), %s3218_s2, 16, %s203_s7, [#allocation8]  }
  0x1f   : > { %s2547_s17 = scalar_lea.vmem %s2832_s9, 1024  ;;  %p2555_p5 = scmp.lt.s32.totalorder %s2832_s9, %s2832_s9 }
  0x20   : > { %p2548_p1 = scmp.ne.s32.totalorder %s2832_s9, %s2547_s17  ;;  %p2556_p3 = scmp.lt.s32.totalorder %s2547_s17, %s2547_s17 }
  0x22   : > { %p2550_p13 = pnand %p2548_p1, %p2512_p12  ;;  %p2557_p9 = por %p2556_p3, %p2555_p5 }
  0x24   : > { %p2551_p0 = pneg %p2550_p13 }
  0x26   : > { %p2558_p7 = pnand %p2557_p9, %p2551_p0 }
  0x28   : > { %2561 = shalt.err (!%p2558_p7)
}
  0x29   : > { %s2701_s18 = smov 256   ;;  %s2702_s19 = smov 16  }
  0x2a   : > { %2358 = dma.hbm_to_vmem [thread:$0]  (!%p2828_p11), %s3219_s3, 1024, %s2832_s9, [#allocation8], %s2701_s18, %s2701_s18, %s2702_s19  }
  0x2b   : > { %s2573_s30 = scalar_lea.vmem %s229_s12, 512  ;;  %p2581_p5 = scmp.lt.s32.totalorder %s229_s12, %s229_s12 }
  0x2c   : > { %p2574_p1 = scmp.ne.s32.totalorder %s229_s12, %s2573_s30  ;;  %p2582_p0 = scmp.lt.s32.totalorder %s2573_s30, %s2573_s30 }
  0x2e   : > { %p2576_p10 = pnand %p2574_p1, %p2512_p12  ;;  %p2583_p3 = por %p2582_p0, %p2581_p5 }
  0x30   : > { %p2577_p13 = pneg %p2576_p10 }
  0x32   : > { %p2584_p9 = pnand %p2583_p3, %p2577_p13 }
  0x34   : > { %2587 = shalt.err (!%p2584_p9)
}
  0x35   : > { %s3224_s7 = smov 128   ;;  %s3225_s8 = smov 8  }
  0x36   : > { %2361 = dma.hbm_to_vmem [thread:$0]  (!%p2828_p11), %s3221_s5, 512, %s229_s12, [#allocation11], %s3224_s7, %s3224_s7, %s3225_s8  }
  0x37   : > { %s2869_s13 = sadd.s32 1, %s2692_s24   ;;  %s31_s15 = sadd.s32 1, %s2688_s23 }
  0x38   : > { %s28_s14 = ssub.s32 %s2692_s24, %s2869_s13  ;;  %p38_p7 = scmp.ne.s32.totalorder %s2688_s23, %s2684_s22 }
  0x39   : > { %p29_p12 = scmp.eq.s32.totalorder %s28_s14, 0  ;;  %p39_p1 = scmp.eq.s32.totalorder %s2692_s24, 0 }
  0x3a   : > { %p2373_p10 = scmp.lt.s32.totalorder %s2692_s24, 2  ;;  %p2883_p5 = por %p173_p2, %p38_p7 }
  0x3b   : > { %s2879_s16 = scalar_select %p29_p12, %s2688_s23, %s31_s15  }
  0x3c   : > { %p40_p13 = por %p39_p1, %p38_p7  ;;  %s242_s17 = sand.u32 1, %s2688_s23  }
  0x3d   : > { %s3233_s10 = scalar_select %p2883_p5, 1, 0 }
  0x3e   : > { %s2197_s18 = sshll.u32 %s2692_s24, 8  ;;  %s2150_s12 = sshll.u32 %s242_s17, 4 }
  0x3f   : > { %s2892_s26 = scalar_lea.hbm %s3216_s0, %s2197_s18  ;;  %s246_s30 = scalar_lea.vmem [#allocation4], %s2150_s12 }
  0x40   : > { %s253_s9 = sshll.u32 %s246_s30, 4  ;;  %p2894_p11 = pnand %p2373_p10, %p40_p13  ;;  %s2898_s9 = int_to_ptr.vmem [resolvable:$true] %s253_s9 }
  0x41   : > { %s2900_s14 = scalar_lea.sflag [#allocation5], %s242_s17  ;;  %s2588_s15 = scalar_lea.hbm %s2892_s26, 256 }
  0x42   : > { %p2589_p2 = scmp.ne.s32.totalorder %s2892_s26, %s2588_s15  ;;  %p2590_p0 = pneg %p2894_p11 }
  0x43   : > { %s2593_s12 = scalar_lea.hbm %s3216_s0, 512  ;;  %p2594_p12 = scmp.lt.s32.totalorder %s2892_s26, %s3216_s0 }
  0x44   : > { %p2591_p3 = pnand %p2590_p0, %p2589_p2  ;;  %p2595_p7 = scmp.lt.s32.totalorder %s2593_s12, %s2588_s15 }
  0x46   : > { %p2592_p9 = pneg %p2591_p3  ;;  %p2596_p1 = por %p2595_p7, %p2594_p12 }
  0x48   : > { %p2597_p10 = pnand %p2596_p1, %p2592_p9 }
  0x4a   : > { %2600 = shalt.err (!%p2597_p10)
}
  0x4b   : > { %s2601_s17 = scalar_lea.vmem %s2898_s9, 256  ;;  %s2705_s7 = smov [#allocation4]  }
  0x4c   : > { %p2602_p13 = scmp.ne.s32.totalorder %s2898_s9, %s2601_s17  ;;  %s2606_s8 = sshll.u32 %s2705_s7, 4  ;;  %s2607_s8 = int_to_ptr.vmem [resolvable:$false] %s2606_s8 }
  0x4d   : > { %s2608_s18 = scalar_lea.vmem %s2607_s8, 512  ;;  %p2609_p3 = scmp.lt.s32.totalorder %s2898_s9, %s2607_s8 }
  0x4e   : > { %p2604_p6 = pnand %p2602_p13, %p2590_p0  ;;  %p2610_p5 = scmp.lt.s32.totalorder %s2608_s18, %s2601_s17 }
  0x50   : > { %p2605_p2 = pneg %p2604_p6  ;;  %p2611_p4 = por %p2610_p5, %p2609_p3 }
  0x52   : > { %p2612_p8 = pnand %p2611_p4, %p2605_p2 }
  0x54   : > { %2615 = shalt.err (!%p2612_p8)
}
  0x55   : > { %s3235_s15 = smov 8   ;;  %s3236_s19 = smov 128  }
  0x56   : > { %2365 = dma.hbm_to_vmem [thread:$0]  (!%p2894_p11), %s2892_s26, 256, %s2898_s9, %s2900_s14, %s3236_s19, %s3236_s19, %s3235_s15  }
  0x57   : > { %p3237_p6 = scmp.ne.s32.totalorder %s3231_s29, 0 }
  0x58   : > { %s2927_s7 = sand.u32 (!%p3237_p6), 1, %s2684_s22   ;;  %p3238_p4 = scmp.ne.s32.totalorder (!%p3237_p6), %s3229_s27, 0 }
  0x59   : > { %265 = sbr.rel (%p3237_p6) target bundleno = 2812 (0xafc), region = 44  ;;  %s2154_s8 = sshll.u32 (!%p3237_p6), %s2927_s7, 4 }
  0x5a   : > { %s268_s12 = scalar_lea.sflag (!%p3237_p6), [#allocation5], %s2927_s7  ;;  %s271_s11 = scalar_lea.vmem (!%p3237_p6), [#allocation4], %s2154_s8 }
  0x5e   : > { %2663 = dma.done.wait (%p3238_p4), %s268_s12, 256  }
  0x5f   : > { %2665 = vsyncadd (%p3238_p4), %s268_s12, 4294967040  ;;  %p3239_p8 = scmp.eq.s32.totalorder %s2800_s25, 0 }
  0x61   : > { %2667 = dma.done.wait (%p3239_p8), [#allocation8], 1040   ;;  %p3240_p5 = pmov %p3239_p8 }
  0x63   : > { %2669 = vsyncadd (%p3240_p5), [#allocation8], 4294966256  ;;  %p3241_p11 = pmov %p3240_p5 }
  0x64   : > { %p3242_p0 = pmov %p3240_p5 }
  0x65   : > { %2671 = dma.done.wait (%p3241_p11), [#allocation11], 512  }
  0x66   : > { %2673 = vsyncadd (%p3242_p0), [#allocation11], 4294966784  ;;  %vm318_vm0 = vcmask 261120   ;;  %v2945_v0 = vld [vmem:[%s271_s11] sm:$0xff]  ;;  %v2947_v1 = vld [vmem:[%s271_s11 + $0x8] sm:$0xff]  ;;  %v2706_v22 = vmov 0.0   ;;  %v386_v49 = vlaneseq }
  0x67   : > { %v319_v2 = vsel %vm318_vm0, %v2945_v0, 0.0  ;;  %v322_v3 = vsel %vm318_vm0, %v2947_v1, 0.0  ;;  %v383_v14 = vld [vmem:[#allocation9 + $0x38] sm:$0xff]  ;;  %v382_v15 = vld [vmem:[#allocation9 + $0x30] sm:$0xff]  ;;  %v381_v16 = vld [vmem:[#allocation9 + $0x28] sm:$0xff]  ;;  %466 = vmatprep.mubr.f32.mxu0 %v2706_v22  ;;  %472 = vmatprep.mubr.f32.mxu1 %v2706_v22  ;;  %vm479_vm5 = vcmask 785408  }
  0x68   : > { %320 = vadd.xlane.f32.xlu0 %v319_v2  ;;  %426 = vmatprep.subr.mxu0 %v383_v14  ;;  %v380_v17 = vld [vmem:[#allocation9 + $0x20] sm:$0xff]  ;;  %v379_v18 = vld [vmem:[#allocation9 + $0x18] sm:$0xff]  ;;  %v378_v19 = vld [vmem:[#allocation9 + $0x10] sm:$0xff]  ;;  %v387_v50 = vshrl.u32 %v386_v49, 7  ;;  %s2987_s14 = scalar_lea.vmem [#allocation12], %s2154_s8  ;;  %s2989_s20 = smov 0  }
  0x69   : > { %2328 = vmatprep.subr.mxu1 %v383_v14  ;;  %427 = vmatpush1.msra.mxu0 %v382_v15  ;;  %v377_v20 = vld [vmem:[#allocation9 + $0x8] sm:$0xff]  ;;  %v376_v21 = vld [vmem:[#allocation9] sm:$0xff]  ;;  %v2159_v40 = vld [vmem:[%s3217_s1] ss:$0 sm:$0xff] }
  0x6a   : > { %2332 = vmatpush1.msra.mxu1 %v382_v15  ;;  %428 = vmatprep.subr.mxu0 %v381_v16  ;;  %v2160_v42 = vld [vmem:[#allocation7] ss:$0 sm:$0xff]  ;;  %v388_v51 = vsub.s32 0, %v387_v50  ;;  %v392_v53 = vsub.s32 1, %v387_v50 }
  0x6b   : > { %2329 = vmatprep.subr.mxu1 %v381_v16  ;;  %429 = vmatpush1.msra.mxu0 %v380_v17  ;;  %v384_v52 = vld [vmem:[%s3220_s4] sm:$0x3] }
  0x6c   : > { %323 = vadd.xlane.f32.xlu0 %v322_v3  ;;  %2333 = vmatpush1.msra.mxu1 %v380_v17  ;;  %v389_v54 = vrot.slane %v384_v52, %v388_v51  ;;  %v393_v55 = vrot.slane %v384_v52, %v392_v53 }
  0x6d   : > { %430 = vmatprep.subr.mxu0 %v379_v18  ;;  %2330 = vmatprep.subr.mxu1 %v379_v18 }
  0x6e   : > { %431 = vmatpush1.msra.mxu0 %v378_v19  ;;  %2334 = vmatpush1.msra.mxu1 %v378_v19 }
  0x6f   : > { %432 = vmatprep.subr.mxu0 %v377_v20  ;;  %2331 = vmatprep.subr.mxu1 %v377_v20 }
  0x70   : > { %433 = vmatpush1.msra.mxu0 %v376_v21  ;;  %2335 = vmatpush1.msra.mxu1 %v376_v21 }
  0xf1   : > { %v321_v4 = vpop.xlane.xlu0 %320 }
  0xf2   : > { %v326_v5 = vmul.f32 0.03125, %v321_v4 }
  0xf4   : > { %v2954_v6 = vsub.f32 %v2945_v0, %v326_v5 }
  0xf5   : > { %v324_v7 = vpop.xlane.xlu0 %323 }
  0xf6   : > { %v327_v8 = vmul.f32 0.03125, %v324_v7  ;;  %v330_v9 = vmul.f32 %v2954_v6, %v2954_v6 }
  0xf8   : > { %v2959_v10 = vsub.f32 %v2947_v1, %v327_v8  ;;  %v332_v11 = vsel %vm318_vm0, %v330_v9, 0.0 }
  0xf9   : > { %333 = vadd.xlane.f32.xlu1 %v332_v11 }
  0xfa   : > { %v331_v12 = vmul.f32 %v2959_v10, %v2959_v10 }
  0xfc   : > { %v335_v13 = vsel %vm318_vm0, %v331_v12, 0.0 }
  0xfd   : > { %336 = vadd.xlane.f32.xlu1 %v335_v13 }
 0x182   : > { %v334_v23 = vpop.xlane.xlu1 %333 }
 0x183   : > { %v338_v24 = vmul.f32 0.032258064, %v334_v23 }
 0x185   : > { %2462 = vrsqrt.f32 %v338_v24  ;;  %vm342_vm1 = vcmp.eq.f32.partialorder %v338_v24, inf  ;;  %v345_v29 = vand.u32 2147483648, %v338_v24  ;;  %vm344_vm2 = vcmp.eq.f32.partialorder %v338_v24, 0.0 }
 0x186   : > { %v337_v25 = vpop.xlane.xlu1 %336 }
 0x187   : > { %v339_v26 = vmul.f32 0.032258064, %v337_v25 }
 0x189   : > { %2464 = vrsqrt.f32 %v339_v26  ;;  %vm349_vm3 = vcmp.eq.f32.partialorder %v339_v26, inf  ;;  %v352_v35 = vand.u32 2147483648, %v339_v26  ;;  %vm351_vm4 = vcmp.eq.f32.partialorder %v339_v26, 0.0 }
 0x192   : > { %v2463_v27 = vpop.eup %2462 }
 0x193   : > { %v341_v28 = vmul.f32 %v2463_v27, %v338_v24 }
 0x195   : > { %v343_v30 = vsel %vm342_vm1, %v338_v24, %v341_v28 }
 0x196   : > { %v2465_v31 = vpop.eup %2464  ;;  %v346_v32 = vsel %vm344_vm2, %v345_v29, %v343_v30 }
 0x197   : > { %v354_v33 = vadd.f32 1e-06, %v346_v32  ;;  %v348_v34 = vmul.f32 %v2465_v31, %v339_v26 }
 0x199   : > { %2466 = vrcp.f32 %v354_v33  ;;  %v350_v36 = vsel %vm349_vm3, %v339_v26, %v348_v34 }
 0x19a   : > { %v353_v37 = vsel %vm351_vm4, %v352_v35, %v350_v36 }
 0x19b   : > { %v355_v38 = vadd.f32 1e-06, %v353_v37 }
 0x19d   : > { %2468 = vrcp.f32 %v355_v38 }
 0x1a6   : > { %v2467_v39 = vpop.eup %2466 }
 0x1a7   : > { %v358_v41 = vmul.f32 %v2467_v39, %v2954_v6 }
 0x1a9   : > { %v366_v43 = vmul.f32 %v2159_v40, %v358_v41 }
 0x1aa   : > { %v2469_v44 = vpop.eup %2468 }
 0x1ab   : > { %v374_v45 = vadd.f32 %v2160_v42, %v366_v43  ;;  %v359_v46 = vmul.f32 %v2469_v44, %v2959_v10 }
 0x1ad   : > { %2161 = vmatmul.mubr.msk.f32.vlgmr.msra.gmra.mxu0 %vm318_vm0, %v374_v45  ;;  %v367_v47 = vmul.f32 %v2159_v40, %v359_v46 }
 0x1af   : > { %v375_v48 = vadd.f32 %v2160_v42, %v367_v47 }
 0x1b1   : > { %2162 = vmatmul.mubr.msk.f32.vlgmr.msra.gmra.mxu1 %vm318_vm0, %v375_v48 }
 0x26d   : > { %v468_v56 = vpop.f32.mrf.mxu0 }
 0x26e   : > { %v2975_v57 = vadd.f32 %v468_v56, %v389_v54 }
 0x26f   : > { %v470_v58 = vpop.f32.mrf.mxu0 }
 0x270   : > { %480 = vst.msk [vmem:[#allocation2] sm:$0xff] %vm479_vm5, %v2975_v57  ;;  %v2978_v59 = vadd.f32 %v470_v58, %v393_v55 }
 0x271   : > { %v474_v60 = vpop.f32.mrf.mxu1 }
 0x272   : > { %v2980_v61 = vadd.f32 %v474_v60, %v389_v54 }
 0x273   : > { %v476_v62 = vpop.f32.mrf.mxu1 }
 0x274   : > { %481 = vst.msk [vmem:[#allocation2 + $0x8] sm:$0xff] %vm479_vm5, %v2980_v61  ;;  %v2983_v63 = vadd.f32 %v476_v62, %v393_v55 }
 0x275 LB: >> { %v2707_v2 = vmov 0.0   ;;  %vm2708_vm6 = vmmov 0   ;;  %s2163_s30 = sshll.u32 %s2696_s20, 3  ;;  %s2709_s18 = smov 96   ;;  %vm494_vm7 = vcmask 31744   ;;  %vm570_vm8 = vcmask 64512   ;;  %s2696_s20 = sphi %s2989_s20, %s487_s20  }
 0x276   : >> { %2237 = vmatprep.subr.mxu0 %v2707_v2  ;;  %2239 = vmatprep.mubr.msk.f32.mxu0 %vm2708_vm6, %v2707_v2  ;;  %s489_s17 = scalar_lea.vmem [#allocation2], %s2163_s30  ;;  %s2710_s15 = smov 64   ;;  %vm1874_vm9 = vcmask 97280   ;;  %vm1876_vm10 = vcmask 130048   ;;  %vm1878_vm11 = vcmask 162816   ;;  %vm1880_vm12 = vcmask 195584  }
 0x277   : >> { %2242 = vmatprep.subr.mxu1 %v2707_v2  ;;  %2244 = vmatprep.mubr.msk.f32.mxu1 %vm2708_vm6, %v2707_v2  ;;  %s2711_s19 = smov 92   ;;  %s2712_s8 = smov 124   ;;  %vm1882_vm13 = vcmask 228352  }
 0x278   : >> { %s2713_s12 = smov 88   ;;  %s2714_s11 = smov 84  }
 0x279   : >> { %s2715_s27 = smov 72   ;;  %s2716_s29 = smov 68  }
 0x27a   : >> { %s2717_s26 = smov 120   ;;  %s2718_s9 = smov 116  }
 0x27b   : >> { %v3003_v3 = vld [vmem:[%s489_s17] sm:$0xff]  ;;  %s2719_s17 = smov 80   ;;  %s487_s20 = sadd.s32 1, %s2696_s20  }
 0x27c   : >> { %492 = vrot.lane.b32.xlu0 %v3003_v3, %s2709_s18  ;;  %585 = vrot.lane.b32.xlu1 %v3003_v3, %s2710_s15  ;;  %s2720_s18 = smov 112   ;;  %s2721_s15 = smov 76  }
 0x27d   : >> { %p484_p9 = scmp.ge.s32.totalorder %s487_s20, 2  }
 0x27e   : > { %s2739_s20 = smov (%p484_p9), 96   ;;  %p3243_p7 = scmp.ne.s32.totalorder (%p484_p9), %s3233_s10, 0 }
 0x280   : >> { %663 = vrot.lane.b32.xlu1 %v3003_v3, %s2711_s19  ;;  %s2722_s19 = smov 108  }
 0x284   : >> { %661 = vrot.lane.b32.xlu1 %v3003_v3, %s2712_s8  ;;  %s2723_s8 = smov 104  }
 0x288   : >> { %832 = vrot.lane.b32.xlu1 %v3003_v3, %s2713_s12  ;;  %s2724_s12 = smov 100  }
 0x2ee   : >> { %v493_v4 = vpop.permute.xlu0 %492  ;;  %v586_v9 = vpop.permute.xlu1 %585 }
 0x2ef   : >> { %2238 = vmatpush3.xpose.msk.msra.mxu0 %vm494_vm7, %v493_v4  ;;  %2243 = vmatpush3.msra.mxu1 %v586_v9 }
 0x2f0   : >> { %2252 = vmatprep.subr.mxu0 %v2707_v2  ;;  %2247 = vmatprep.subr.mxu1 %v2707_v2 }
 0x2f2   : >> { %2240 = vmatmul.mubr.msk.f32.vlgmr.msra.gmra.mxu0 %vm494_vm7, %v3003_v3  ;;  %v664_v15 = vpop.permute.xlu1 %663 }
 0x2f3   : >> { %2254 = vmatprep.mubr.msk.f32.mxu0 %vm2708_vm6, %v2707_v2 }
 0x2f6   : >> { %v662_v16 = vpop.permute.xlu1 %661 }
 0x2fa   : >> { %v833_v17 = vpop.permute.xlu1 %832 }
 0x3b2   : >> { %v565_v5 = vpop.f32.mrf.mxu0 }
 0x3b3   : >> { %v569_v6 = vmul.f32 0.5, %v565_v5 }
 0x3b4   : >> { %v2241_v7 = vpop.f32.mrf.mxu0 }
 0x3b5   : >> { %v571_v8 = vsel %vm570_vm8, %v569_v6, -inf }
 0x3b6   : >> { %572 = vmax.xlane.f32.xlu0 %v571_v8 }
 0x3cc   : >> { %1001 = vrot.lane.b32.xlu0 %v3003_v3, %s2714_s11  ;;  %s2725_s11 = smov 60  }
 0x3d0   : >> { %1508 = vrot.lane.b32.xlu0 %v3003_v3, %s2715_s27  ;;  %s2726_s27 = smov 52  }
 0x3d4   : >> { %1677 = vrot.lane.b32.xlu0 %v3003_v3, %s2716_s29  ;;  %s2727_s29 = smov 56  }
 0x43f   : >> { %v573_v10 = vpop.xlane.xlu0 %572 }
 0x440   : >> { %v574_v11 = vsub.f32 %v569_v6, %v573_v10 }
 0x442   : >> { %v575_v12 = vmul.f32 1.442695, %v574_v11 }
 0x443   : >> { %v1002_v28 = vpop.permute.xlu0 %1001 }
 0x444   : >> { %2470 = vpow2.f32 %v575_v12 }
 0x447   : >> { %v1509_v31 = vpop.permute.xlu0 %1508 }
 0x44b   : >> { %v1678_v33 = vpop.permute.xlu0 %1677 }
 0x451   : >> { %v2471_v13 = vpop.eup %2470 }
 0x452   : >> { %v577_v14 = vsel %vm570_vm8, %v2471_v13, 0.0 }
 0x453   : >> { %578 = vadd.xlane.f32.xlu1 %v577_v14 }
 0x464   : >> { %830 = vrot.lane.b32.xlu1 %v3003_v3, %s2717_s26  ;;  %s2728_s26 = smov 48  }
 0x468   : >> { %999 = vrot.lane.b32.xlu1 %v3003_v3, %s2718_s9  ;;  %s2729_s9 = smov 44  }
 0x46c   : >> { %1170 = vrot.lane.b32.xlu1 %v3003_v3, %s2719_s17  ;;  %s2730_s17 = smov 36  }
 0x470   : >> { %1168 = vrot.lane.b32.xlu1 %v3003_v3, %s2720_s18  ;;  %s2731_s18 = smov 40  }
 0x474   : >> { %1339 = vrot.lane.b32.xlu1 %v3003_v3, %s2721_s15  ;;  %s2732_s15 = smov 4  }
 0x478   : >> { %1337 = vrot.lane.b32.xlu1 %v3003_v3, %s2722_s19  ;;  %s2733_s19 = smov 8  }
 0x47c   : >> { %1506 = vrot.lane.b32.xlu1 %v3003_v3, %s2723_s8  ;;  %s2734_s8 = smov 12  }
 0x480   : >> { %1675 = vrot.lane.b32.xlu1 %v3003_v3, %s2724_s12  ;;  %s2735_s12 = smov 16  }
 0x4dc   : >> { %v579_v18 = vpop.xlane.xlu1 %578 }
 0x4dd   : >> { %2472 = vrcp.f32 %v579_v18 }
 0x4e0   : >> { %v831_v19 = vpop.permute.xlu1 %830 }
 0x4e4   : >> { %v1000_v21 = vpop.permute.xlu1 %999 }
 0x4e8   : >> { %v1171_v25 = vpop.permute.xlu1 %1170 }
 0x4ea   : >> { %v2473_v20 = vpop.eup %2472 }
 0x4eb   : >> { %v581_v22 = vmul.f32 %v2473_v20, %v579_v18 }
 0x4ec   : >> { %v1169_v27 = vpop.permute.xlu1 %1168 }
 0x4ed   : >> { %v582_v23 = vsub.f32 2.0, %v581_v22 }
 0x4ef   : >> { %v583_v24 = vmul.f32 %v2473_v20, %v582_v23 }
 0x4f0   : >> { %v1340_v29 = vpop.permute.xlu1 %1339 }
 0x4f1   : >> { %v584_v26 = vmul.f32 %v2471_v13, %v583_v24 }
 0x4f3   : >> { %2245 = vmatmul.mubr.msk.f32.vlgmr.msra.gmra.mxu1 %vm570_vm8, %v584_v26 }
 0x4f4   : >> { %2248 = vmatpush3.xpose.msk.msra.mxu1 %vm494_vm7, %v664_v15  ;;  %2249 = vmatprep.mubr.msk.f32.mxu1 %vm2708_vm6, %v2707_v2  ;;  %v1338_v30 = vpop.permute.xlu1 %1337 }
 0x4f5   : >> { %2257 = vmatprep.subr.mxu1 %v2707_v2 }
 0x4f7   : >> { %2250 = vmatmul.mubr.msk.f32.vlgmr.msra.gmra.mxu1 %vm494_vm7, %v662_v16 }
 0x4f8   : >> { %2258 = vmatpush3.xpose.msk.msra.mxu1 %vm494_vm7, %v833_v17  ;;  %2259 = vmatprep.mubr.msk.f32.mxu1 %vm2708_vm6, %v2707_v2  ;;  %v1507_v32 = vpop.permute.xlu1 %1506 }
 0x4f9   : >> { %2267 = vmatprep.subr.mxu1 %v2707_v2 }
 0x4fb   : >> { %2260 = vmatmul.mubr.msk.f32.vlgmr.msra.gmra.mxu1 %vm494_vm7, %v831_v19 }
 0x4fc   : >> { %2268 = vmatpush3.xpose.msk.msra.mxu1 %vm494_vm7, %v1002_v28  ;;  %2269 = vmatprep.mubr.msk.f32.mxu1 %vm2708_vm6, %v2707_v2  ;;  %v1676_v34 = vpop.permute.xlu1 %1675 }
 0x4fd   : >> { %2277 = vmatprep.subr.mxu1 %v2707_v2 }
 0x4ff   : >> { %2270 = vmatmul.mubr.msk.f32.vlgmr.msra.gmra.mxu1 %vm494_vm7, %v1000_v21 }
 0x500   : >> { %2278 = vmatpush3.xpose.msk.msra.mxu1 %vm494_vm7, %v1171_v25  ;;  %2279 = vmatprep.mubr.msk.f32.mxu1 %vm2708_vm6, %v2707_v2 }
 0x501   : >> { %2287 = vmatprep.subr.mxu1 %v2707_v2 }
 0x503   : >> { %2280 = vmatmul.mubr.msk.f32.vlgmr.msra.gmra.mxu1 %vm494_vm7, %v1169_v27 }
 0x504   : >> { %2288 = vmatpush3.xpose.msk.msra.mxu1 %vm494_vm7, %v1340_v29  ;;  %2289 = vmatprep.mubr.msk.f32.mxu1 %vm2708_vm6, %v2707_v2 }
 0x505   : >> { %2297 = vmatprep.subr.mxu1 %v2707_v2 }
 0x507   : >> { %2290 = vmatmul.mubr.msk.f32.vlgmr.msra.gmra.mxu1 %vm494_vm7, %v1338_v30 }
 0x508   : >> { %2298 = vmatpush3.xpose.msk.msra.mxu1 %vm494_vm7, %v1509_v31  ;;  %2299 = vmatprep.mubr.msk.f32.mxu1 %vm2708_vm6, %v2707_v2 }
 0x509   : >> { %2307 = vmatprep.subr.mxu1 %v2707_v2 }
 0x50b   : >> { %2300 = vmatmul.mubr.msk.f32.vlgmr.msra.gmra.mxu1 %vm494_vm7, %v1507_v32 }
 0x50c   : >> { %2308 = vmatpush3.xpose.msk.msra.mxu1 %vm494_vm7, %v1678_v33  ;;  %2309 = vmatprep.mubr.msk.f32.mxu1 %vm2708_vm6, %v2707_v2 }
 0x50f   : >> { %2310 = vmatmul.mubr.msk.f32.vlgmr.msra.gmra.mxu1 %vm494_vm7, %v1676_v34 }
 0x5b3   : >> { %v3065_v35 = vpop.f32.mrf.mxu1 }
 0x5b5   : >> { %v2246_v36 = vpop.f32.mrf.mxu1 }
 0x5b7   : >> { %v735_v37 = vpop.f32.mrf.mxu1 }
 0x5b8   : >> { %v739_v38 = vmul.f32 0.5, %v735_v37 }
 0x5b9   : >> { %v2251_v39 = vpop.f32.mrf.mxu1 }
 0x5ba   : >> { %v740_v40 = vsel %vm570_vm8, %v739_v38, -inf }
 0x5bb   : >> { %741 = vmax.xlane.f32.xlu0 %v740_v40  ;;  %v904_v41 = vpop.f32.mrf.mxu1 }
 0x5bc   : >> { %v908_v42 = vmul.f32 0.5, %v904_v41 }
 0x5bd   : >> { %v2261_v43 = vpop.f32.mrf.mxu1 }
 0x5be   : >> { %v909_v44 = vsel %vm570_vm8, %v908_v42, -inf }
 0x5bf   : >> { %910 = vmax.xlane.f32.xlu1 %v909_v44  ;;  %v1073_v45 = vpop.f32.mrf.mxu1 }
 0x5c0   : >> { %v1077_v46 = vmul.f32 0.5, %v1073_v45 }
 0x5c1   : >> { %v2271_v47 = vpop.f32.mrf.mxu1 }
 0x5c2   : >> { %v1078_v48 = vsel %vm570_vm8, %v1077_v46, -inf }
 0x5c3   : >> { %1079 = vmax.xlane.f32.xlu0 %v1078_v48  ;;  %v1242_v49 = vpop.f32.mrf.mxu1 }
 0x5c4   : >> { %v1246_v50 = vmul.f32 0.5, %v1242_v49 }
 0x5c5   : >> { %v2281_v51 = vpop.f32.mrf.mxu1 }
 0x5c6   : >> { %v1247_v52 = vsel %vm570_vm8, %v1246_v50, -inf }
 0x5c7   : >> { %1248 = vmax.xlane.f32.xlu0 %v1247_v52  ;;  %v1411_v53 = vpop.f32.mrf.mxu1 }
 0x5c8   : >> { %v1415_v54 = vmul.f32 0.5, %v1411_v53 }
 0x5c9   : >> { %v2291_v55 = vpop.f32.mrf.mxu1 }
 0x5ca   : >> { %v1416_v56 = vsel %vm570_vm8, %v1415_v54, -inf }
 0x5cb   : >> { %1417 = vmax.xlane.f32.xlu1 %v1416_v56  ;;  %v1580_v58 = vpop.f32.mrf.mxu1 }
 0x5cc   : >> { %v3072_v60 = vmul.f32 0.5, %v1580_v58 }
 0x5cd   : >> { %v2301_v62 = vpop.f32.mrf.mxu1 }
 0x5ce   : >> { %v1585_v4 = vsel %vm570_vm8, %v3072_v60, -inf }
 0x5cf   : >> { %1586 = vmax.xlane.f32.xlu0 %v1585_v4  ;;  %v1749_v5 = vpop.f32.mrf.mxu1 }
 0x5d0   : >> { %v1753_v7 = vmul.f32 0.5, %v1749_v5 }
 0x5d1   : >> { %v2311_v6 = vpop.f32.mrf.mxu1 }
 0x5d2   : >> { %v1754_v8 = vsel %vm570_vm8, %v1753_v7, -inf }
 0x5dc   : >> { %754 = vrot.lane.b32.xlu1 %v3003_v3, %s2725_s11  ;;  %s2736_s11 = smov 20  }
 0x600   : >> { %1755 = vmax.xlane.f32.xlu1 %v1754_v8 }
 0x644   : >> { %v742_v9 = vpop.xlane.xlu0 %741 }
 0x645   : >> { %v743_v10 = vsub.f32 %v739_v38, %v742_v9 }
 0x647   : >> { %v744_v11 = vmul.f32 1.442695, %v743_v10 }
 0x648   : >> { %v911_v12 = vpop.xlane.xlu1 %910 }
 0x649   : >> { %2474 = vpow2.f32 %v744_v11  ;;  %v912_v13 = vsub.f32 %v908_v42, %v911_v12 }
 0x64b   : >> { %v913_v14 = vmul.f32 1.442695, %v912_v13 }
 0x64c   : >> { %v1080_v15 = vpop.xlane.xlu0 %1079 }
 0x64d   : >> { %2476 = vpow2.f32 %v913_v14  ;;  %v1081_v16 = vsub.f32 %v1077_v46, %v1080_v15 }
 0x64f   : >> { %v1082_v17 = vmul.f32 1.442695, %v1081_v16 }
 0x650   : >> { %v1249_v26 = vpop.xlane.xlu0 %1248 }
 0x651   : >> { %2478 = vpow2.f32 %v1082_v17  ;;  %v1250_v27 = vsub.f32 %v1246_v50, %v1249_v26 }
 0x653   : >> { %v1251_v28 = vmul.f32 1.442695, %v1250_v27 }
 0x654   : >> { %v1418_v18 = vpop.xlane.xlu1 %1417 }
 0x655   : >> { %v1419_v29 = vsub.f32 %v1415_v54, %v1418_v18  ;;  %2480 = vpow2.f32 %v1251_v28 }
 0x656   : >> { %v3078_v19 = vpop.eup %2474 }
 0x657   : >> { %v746_v20 = vsel %vm570_vm8, %v3078_v19, 0.0  ;;  %v1420_v30 = vmul.f32 1.442695, %v1419_v29 }
 0x658   : >> { %747 = vadd.xlane.f32.xlu0 %v746_v20  ;;  %v755_v21 = vpop.permute.xlu1 %754  ;;  %v1587_v41 = vpop.xlane.xlu0 %1586 }
 0x659   : >> { %2253 = vmatpush3.msra.mxu0 %v755_v21  ;;  %2482 = vpow2.f32 %v1420_v30  ;;  %v1588_v42 = vsub.f32 %v3072_v60, %v1587_v41 }
 0x65a   : >> { %v3082_v22 = vpop.eup %2476  ;;  %2262 = vmatprep.subr.mxu0 %v2707_v2 }
 0x65b   : >> { %v915_v23 = vsel %vm570_vm8, %v3082_v22, 0.0  ;;  %v1589_v43 = vmul.f32 1.442695, %v1588_v42 }
 0x65c   : >> { %916 = vadd.xlane.f32.xlu1 %v915_v23 }
 0x65e   : >> { %v3087_v24 = vpop.eup %2478 }
 0x65f   : >> { %v1084_v25 = vsel %vm570_vm8, %v3087_v24, 0.0 }
 0x660   : >> { %1085 = vadd.xlane.f32.xlu0 %v1084_v25 }
 0x662   : >> { %v3093_v34 = vpop.eup %2480 }
 0x663   : >> { %v1253_v36 = vsel %vm570_vm8, %v3093_v34, 0.0 }
 0x666   : >> { %v3097_v37 = vpop.eup %2482 }
 0x667   : >> { %v1422_v38 = vsel %vm570_vm8, %v3097_v37, 0.0 }
 0x66d   : >> { %1092 = vrot.lane.b32.xlu1 %v3003_v3, %s2726_s27  ;;  %s2737_s27 = smov 24  }
 0x676   : >> { %923 = vrot.lane.b32.xlu0 %v3003_v3, %s2727_s29  ;;  %s2738_s29 = smov 28  }
 0x689   : >> { %v1756_v31 = vpop.xlane.xlu1 %1755 }
 0x68a   : >> { %v1757_v32 = vsub.f32 %v1753_v7, %v1756_v31 }
 0x68c   : >> { %v1758_v33 = vmul.f32 1.442695, %v1757_v32 }
 0x68e   : >> { %2484 = vpow2.f32 %v1758_v33 }
 0x68f   : >> { %2486 = vpow2.f32 %v1589_v43 }
 0x691   : >> { %1254 = vadd.xlane.f32.xlu1 %v1253_v36 }
 0x695   : >> { %1423 = vadd.xlane.f32.xlu0 %v1422_v38 }
 0x69b   : >> { %v3101_v39 = vpop.eup %2484 }
 0x69c   : >> { %v1760_v40 = vsel %vm570_vm8, %v3101_v39, 0.0  ;;  %v3109_v44 = vpop.eup %2486 }
 0x69d   : >> { %1761 = vadd.xlane.f32.xlu0 %v1760_v40  ;;  %v1591_v45 = vsel %vm570_vm8, %v3109_v44, 0.0 }
 0x6a2   : >> { %1261 = vrot.lane.b32.xlu1 %v3003_v3, %s2728_s26  ;;  %s1884_s26 = scalar_lea.vmem [#allocation3], %s2163_s30  ;;  %s2740_s30 = smov (%p484_p9), 32  }
 0x6b3   : >> { %1430 = vrot.lane.b32.xlu0 %v3003_v3, %s2729_s9  ;;  %s2198_s9 = sshll.u32 (%p484_p9), %s2800_s25, 8 }
 0x6b7   : >> { %1768 = vrot.lane.b32.xlu0 %v3003_v3, %s2730_s17  ;;  %s2033_s17 = sshll.u32 (%p484_p9), %s2987_s14, 4  ;;  %s3170_s17 = int_to_ptr.vmem [resolvable:$true] %s2033_s17 }
 0x6b8   : > { %s2616_s25 = scalar_lea.vmem (%p484_p9), %s3170_s17, 256 }
 0x6b9   : > { %p2617_p12 = scmp.ne.s32.totalorder (%p484_p9), %s3170_s17, %s2616_s25 }
 0x6bb   : > { %p2618_p1 = pnand (%p484_p9), %p2617_p12, %p3243_p7 }
 0x6bd   : > { %p2619_p10 = pneg (%p484_p9), %p2618_p1 }
 0x6c6   : >> { %1592 = vadd.xlane.f32.xlu1 %v1591_v45 }
 0x6d7   : >> { %1599 = vrot.lane.b32.xlu1 %v3003_v3, %s2731_s18 }
 0x6e1   : >> { %v748_v46 = vpop.xlane.xlu0 %747 }
 0x6e2   : >> { %2488 = vrcp.f32 %v748_v46 }
 0x6e5   : >> { %v917_v47 = vpop.xlane.xlu1 %916 }
 0x6e6   : >> { %2490 = vrcp.f32 %v917_v47 }
 0x6e9   : >> { %v1086_v48 = vpop.xlane.xlu0 %1085  ;;  %v1093_v6 = vpop.permute.xlu1 %1092 }
 0x6ea   : >> { %2492 = vrcp.f32 %v1086_v48 }
 0x6ed   : >> { %v924_v58 = vpop.permute.xlu0 %923 }
 0x6ef   : >> { %v2489_v49 = vpop.eup %2488 }
 0x6f0   : >> { %v750_v50 = vmul.f32 %v2489_v49, %v748_v46 }
 0x6f2   : >> { %v751_v51 = vsub.f32 2.0, %v750_v50 }
 0x6f3   : >> { %v2491_v52 = vpop.eup %2490 }
 0x6f4   : >> { %v752_v53 = vmul.f32 %v2489_v49, %v751_v51  ;;  %v919_v54 = vmul.f32 %v2491_v52, %v917_v47 }
 0x6f6   : >> { %v753_v55 = vmul.f32 %v3078_v19, %v752_v53  ;;  %v920_v56 = vsub.f32 2.0, %v919_v54 }
 0x6f7   : >> { %v2493_v60 = vpop.eup %2492 }
 0x6f8   : >> { %v921_v62 = vmul.f32 %v2491_v52, %v920_v56  ;;  %v1088_v4 = vmul.f32 %v2493_v60, %v1086_v48  ;;  %2255 = vmatmul.mubr.msk.f32.vlgmr.msra.gmra.mxu0 %vm570_vm8, %v753_v55 }
 0x6f9   : >> { %2263 = vmatpush3.msra.mxu0 %v924_v58  ;;  %2264 = vmatprep.mubr.msk.f32.mxu0 %vm2708_vm6, %v2707_v2 }
 0x6fa   : >> { %v922_v3 = vmul.f32 %v3082_v22, %v921_v62  ;;  %v1089_v5 = vsub.f32 2.0, %v1088_v4  ;;  %2272 = vmatprep.subr.mxu0 %v2707_v2 }
 0x6fc   : >> { %v1090_v7 = vmul.f32 %v2493_v60, %v1089_v5  ;;  %2265 = vmatmul.mubr.msk.f32.vlgmr.msra.gmra.mxu0 %vm570_vm8, %v922_v3 }
 0x6fd   : >> { %2273 = vmatpush3.msra.mxu0 %v1093_v6  ;;  %2274 = vmatprep.mubr.msk.f32.mxu0 %vm2708_vm6, %v2707_v2 }
 0x6fe   : >> { %v1091_v8 = vmul.f32 %v3087_v24, %v1090_v7  ;;  %2282 = vmatprep.subr.mxu0 %v2707_v2 }
 0x700   : >> { %2275 = vmatmul.mubr.msk.f32.vlgmr.msra.gmra.mxu0 %vm570_vm8, %v1091_v8  ;;  %v1890_v8 = vld [vmem:[#allocation10 + $0x10] sm:$0xff] (%p484_p9) }
 0x701   : >> { %2284 = vmatprep.mubr.msk.f32.mxu0 %vm2708_vm6, %v2707_v2 }
 0x71a   : >> { %v1255_v9 = vpop.xlane.xlu1 %1254 }
 0x71b   : >> { %2494 = vrcp.f32 %v1255_v9 }
 0x71e   : >> { %v1262_v10 = vpop.permute.xlu1 %1261  ;;  %v1424_v11 = vpop.xlane.xlu0 %1423 }
 0x71f   : >> { %2496 = vrcp.f32 %v1424_v11  ;;  %2283 = vmatpush3.msra.mxu0 %v1262_v10  ;;  %v1889_v10 = vld [vmem:[#allocation10 + $0x8] sm:$0xff] (%p484_p9) }
 0x720   : >> { %2292 = vmatprep.subr.mxu0 %v2707_v2 }
 0x726   : >> { %v1762_v15 = vpop.xlane.xlu0 %1761 }
 0x727   : >> { %2498 = vrcp.f32 %v1762_v15 }
 0x728   : >> { %v2495_v12 = vpop.eup %2494 }
 0x729   : >> { %v1257_v13 = vmul.f32 %v2495_v12, %v1255_v9 }
 0x72a   : >> { %v1431_v21 = vpop.permute.xlu0 %1430 }
 0x72b   : >> { %v1258_v14 = vsub.f32 2.0, %v1257_v13 }
 0x72c   : >> { %v2497_v16 = vpop.eup %2496 }
 0x72d   : >> { %v1259_v17 = vmul.f32 %v2495_v12, %v1258_v14  ;;  %v1426_v18 = vmul.f32 %v2497_v16, %v1424_v11  ;;  %v1888_v11 = vld [vmem:[#allocation10] sm:$0xff] (%p484_p9) }
 0x72e   : >> { %v1769_v36 = vpop.permute.xlu0 %1768 }
 0x72f   : >> { %v1260_v19 = vmul.f32 %v3093_v34, %v1259_v17  ;;  %v1427_v20 = vsub.f32 2.0, %v1426_v18 }
 0x731   : >> { %v1428_v22 = vmul.f32 %v2497_v16, %v1427_v20  ;;  %2285 = vmatmul.mubr.msk.f32.vlgmr.msra.gmra.mxu0 %vm570_vm8, %v1260_v19 }
 0x732   : >> { %2293 = vmatpush3.msra.mxu0 %v1431_v21  ;;  %2294 = vmatprep.mubr.msk.f32.mxu0 %vm2708_vm6, %v2707_v2 }
 0x733   : >> { %v1429_v23 = vmul.f32 %v3097_v37, %v1428_v22  ;;  %2302 = vmatprep.subr.mxu0 %v2707_v2 }
 0x734   : >> { %v2499_v26 = vpop.eup %2498 }
 0x735   : >> { %2295 = vmatmul.mubr.msk.f32.vlgmr.msra.gmra.mxu0 %vm570_vm8, %v1429_v23  ;;  %v1764_v27 = vmul.f32 %v2499_v26, %v1762_v15 }
 0x736   : >> { %2304 = vmatprep.mubr.msk.f32.mxu0 %vm2708_vm6, %v2707_v2 }
 0x737   : >> { %v1765_v30 = vsub.f32 2.0, %v1764_v27 }
 0x739   : >> { %v1766_v33 = vmul.f32 %v2499_v26, %v1765_v30 }
 0x73b   : >> { %v1767_v37 = vmul.f32 %v3101_v39, %v1766_v33 }
 0x74f   : >> { %v1593_v24 = vpop.xlane.xlu1 %1592 }
 0x750   : >> { %2500 = vrcp.f32 %v1593_v24 }
 0x753   : >> { %v1600_v25 = vpop.permute.xlu1 %1599 }
 0x754   : >> { %2303 = vmatpush3.msra.mxu0 %v1600_v25 }
 0x755   : >> { %2312 = vmatprep.subr.mxu0 %v2707_v2 }
 0x75d   : >> { %v2501_v28 = vpop.eup %2500 }
 0x75e   : >> { %v1595_v29 = vmul.f32 %v2501_v28, %v1593_v24 }
 0x760   : >> { %v1596_v31 = vsub.f32 2.0, %v1595_v29 }
 0x762   : >> { %v1597_v32 = vmul.f32 %v2501_v28, %v1596_v31 }
 0x764   : >> { %v1598_v34 = vmul.f32 %v3109_v44, %v1597_v32 }
 0x766   : >> { %2305 = vmatmul.mubr.msk.f32.vlgmr.msra.gmra.mxu0 %vm570_vm8, %v1598_v34 }
 0x767   : >> { %2313 = vmatpush3.msra.mxu0 %v1769_v36  ;;  %2314 = vmatprep.mubr.msk.f32.mxu0 %vm2708_vm6, %v2707_v2 }
 0x76a   : >> { %2315 = vmatmul.mubr.msk.f32.vlgmr.msra.gmra.mxu0 %vm570_vm8, %v1767_v37 }
 0x7b8   : >> { %v826_v38 = vpop.f32.mrf.mxu0 }
 0x7b9   : >> { %1845 = vrot.lane.b32.xlu1 %v826_v38, %s2732_s15 }
 0x7ba   : >> { %v2256_v40 = vpop.f32.mrf.mxu0 }
 0x7bc   : >> { %v995_v41 = vpop.f32.mrf.mxu0 }
 0x7bd   : >> { %1849 = vrot.lane.b32.xlu0 %v995_v41, %s2733_s19  ;;  %s3168_s19 = scalar_lea.hbm (%p484_p9), %s3222_s6, %s2198_s9 }
 0x7be   : >> { %v2266_v42 = vpop.f32.mrf.mxu0 }
 0x7c0   : >> { %v1164_v43 = vpop.f32.mrf.mxu0 }
 0x7c1   : >> { %1853 = vrot.lane.b32.xlu1 %v1164_v43, %s2734_s8  ;;  %s2020_s8 = scalar_lea.sflag (%p484_p9), [#allocation6], %s2927_s7 }
 0x7c2   : >> { %v2276_v44 = vpop.f32.mrf.mxu0 }
 0x7f1   : >> { %v1333_v45 = vpop.f32.mrf.mxu0 }
 0x7f2   : >> { %1857 = vrot.lane.b32.xlu0 %v1333_v45, %s2735_s12  ;;  %s2741_s12 = smov (%p484_p9), [#allocation12]  }
 0x7f3   : >> { %v2286_v2 = vpop.f32.mrf.mxu0 }
 0x7f5   : >> { %v1502_v46 = vpop.f32.mrf.mxu0 }
 0x7f6   : >> { %1861 = vrot.lane.b32.xlu1 %v1502_v46, %s2736_s11  ;;  %s2620_s11 = sshll.u32 (%p484_p9), %s2741_s12, 4  ;;  %s2621_s11 = int_to_ptr.vmem [resolvable:$false] %s2620_s11 }
 0x7f7   : >> { %v2296_v39 = vpop.f32.mrf.mxu0  ;;  %p2623_p13 = scmp.lt.s32.totalorder (%p484_p9), %s3170_s17, %s2621_s11 }
 0x826   : >> { %v1671_v47 = vpop.f32.mrf.mxu0 }
 0x827   : >> { %1865 = vrot.lane.b32.xlu0 %v1671_v47, %s2737_s27  ;;  %s2622_s27 = scalar_lea.vmem (%p484_p9), %s2621_s11, 512 }
 0x828   : >> { %v2306_v48 = vpop.f32.mrf.mxu0  ;;  %p2624_p2 = scmp.lt.s32.totalorder (%p484_p9), %s2622_s27, %s2616_s25 }
 0x82a   : >> { %v1840_v49 = vpop.f32.mrf.mxu0  ;;  %p2625_p3 = por (%p484_p9), %p2624_p2, %p2623_p13 }
 0x82b   : >> { %1869 = vrot.lane.b32.xlu1 %v1840_v49, %s2738_s29  ;;  %v1846_v51 = vpop.permute.xlu1 %1845 }
 0x82c   : >> { %v2316_v50 = vpop.f32.mrf.mxu0  ;;  %v1872_v55 = vsel %vm494_vm7, %v3065_v35, %v1846_v51  ;;  %v1891_v35 = vld [vmem:[#allocation10 + $0x18] sm:$0xff] (%p484_p9)  ;;  %p2626_p6 = pnand (%p484_p9), %p2625_p3, %p2619_p10 }
 0x82d   : > { %2317 = vmatprep.subr.mxu0 (%p484_p9), %v1891_v35 }
 0x82e   : > { %2318 = vmatpush3.msra.mxu0 (%p484_p9), %v1891_v35 }
 0x82f   : >> { %v1850_v52 = vpop.permute.xlu0 %1849  ;;  %2319 = vmatprep.subr.mxu0 (%p484_p9), %v1890_v8 }
 0x830   : >> { %v1873_v56 = vsel %vm570_vm8, %v1872_v55, %v1850_v52  ;;  %2320 = vmatpush3.msra.mxu0 (%p484_p9), %v1890_v8 }
 0x831   : > { %2321 = vmatprep.subr.mxu0 (%p484_p9), %v1889_v10 }
 0x832   : > { %2322 = vmatpush3.msra.mxu0 (%p484_p9), %v1889_v10 }
 0x833   : >> { %v1854_v53 = vpop.permute.xlu1 %1853  ;;  %2323 = vmatprep.subr.mxu0 (%p484_p9), %v1888_v11 }
 0x834   : >> { %v1875_v60 = vsel %vm1874_vm9, %v1873_v56, %v1854_v53  ;;  %2324 = vmatpush3.msra.mxu0 (%p484_p9), %v1888_v11 }
 0x864   : >> { %v1858_v54 = vpop.permute.xlu0 %1857 }
 0x865   : >> { %v1877_v4 = vsel %vm1876_vm10, %v1875_v60, %v1858_v54 }
 0x868   : >> { %v1862_v58 = vpop.permute.xlu1 %1861 }
 0x869   : >> { %v1879_v3 = vsel %vm1878_vm11, %v1877_v4, %v1862_v58 }
 0x899   : >> { %v1866_v62 = vpop.permute.xlu0 %1865 }
 0x89a   : >> { %v1881_v5 = vsel %vm1880_vm12, %v1879_v3, %v1866_v62 }
 0x89b   : > { %486 = sbr.rel (!%p484_p9) target bundleno = 629 (0x275), region = 110 }
 0x89d   : >> { %v1870_v6 = vpop.permute.xlu1 %1869 }
 0x89e   : >> { %v1883_v7 = vsel %vm1882_vm13, %v1881_v5, %v1870_v6 }
 0x89f   : >> { %1885 = vst.msk [vmem:[%s1884_s26] sm:$0xff] %vm318_vm0, %v1883_v7 }
 0x8a6   : > { %v1886_v9 = vld [vmem:[#allocation3] sm:$0xff]  ;;  %v1887_v12 = vld [vmem:[#allocation3 + $0x8] sm:$0xff] }
 0x8a7   : > { %2325 = vmatprep.mubr.msk.f32.mxu0 %vm318_vm0, %v1886_v9 }
 0x8a8   : > { %2326 = vmatmul.mubr.msk.f32.vlgmr.msra.gmra.mxu0 %vm318_vm0, %v1887_v12 }
 0x968   : > { %v2327_v13 = vpop.f32.mrf.mxu0 }
 0x96a   : > { %v1964_v14 = vpop.f32.mrf.mxu0 }
 0x96b   : > { %1975 = vrot.lane.b32.xlu0 %v1964_v14, %s2739_s20 }
 0x96f   : > { %1977 = vrot.lane.b32.xlu0 %v2327_v13, %s2739_s20 }
 0x9dd   : > { %v1976_v15 = vpop.permute.xlu0 %1975 }
 0x9de   : > { %v1982_v16 = vadd.f32 %v1976_v15, %v2978_v59  ;;  %v1981_v59 = vadd.f32 %v1976_v15, %v2975_v57 }
 0x9e0   : > { %v2190_v17 = vmul.f32 -1.442695, %v1982_v16 }
 0x9e1   : > { %v1978_v18 = vpop.permute.xlu0 %1977 }
 0x9e2   : > { %2502 = vpow2.f32 %v2190_v17  ;;  %v1984_v19 = vadd.f32 %v1978_v18, %v2983_v63  ;;  %v1983_v63 = vadd.f32 %v1978_v18, %v2980_v61 }
 0x9e4   : > { %v2191_v20 = vmul.f32 -1.442695, %v1984_v19 }
 0x9e6   : > { %2504 = vpow2.f32 %v2191_v20 }
 0x9ef   : > { %v2503_v21 = vpop.eup %2502 }
 0x9f0   : > { %v1991_v22 = vadd.f32 1.0, %v2503_v21 }
 0x9f2   : > { %2506 = vrcp.f32 %v1991_v22 }
 0x9f3   : > { %v2505_v23 = vpop.eup %2504 }
 0x9f4   : > { %v1992_v24 = vadd.f32 1.0, %v2505_v23 }
 0x9f6   : > { %2508 = vrcp.f32 %v1992_v24 }
 0x9ff   : > { %v2507_v25 = vpop.eup %2506 }
 0xa00   : > { %1999 = vrot.lane.b32.xlu1 %v2507_v25, %s2739_s20 }
 0xa03   : > { %v2509_v26 = vpop.eup %2508 }
 0xa04   : > { %2001 = vrot.lane.b32.xlu1 %v2509_v26, %s2739_s20 }
 0xa72   : > { %v2000_v27 = vpop.permute.xlu1 %1999 }
 0xa73   : > { %v2005_v28 = vmul.f32 %v2000_v27, %v1981_v59 }
 0xa75   : > { %2009 = vrot.lane.b32.xlu0 %v2005_v28, %s2740_s30 }
 0xa76   : > { %v2002_v29 = vpop.permute.xlu1 %2001 }
 0xa77   : > { %v2006_v30 = vmul.f32 %v2002_v29, %v1983_v63 }
 0xa79   : > { %2011 = vrot.lane.b32.xlu1 %v2006_v30, %s2740_s30 }
 0xae7   : > { %v2010_v31 = vpop.permute.xlu0 %2009 }
 0xae8   : > { %v2015_v32 = vadd.f32 %v2010_v31, %v2945_v0 }
 0xaea   : > { %2017 = vst.msk [vmem:[%s2987_s14] sm:$0xff] %vm318_vm0, %v2015_v32 }
 0xaeb   : > { %v2012_v57 = vpop.permute.xlu1 %2011 }
 0xaec   : > { %v2016_v61 = vadd.f32 %v2012_v57, %v2947_v1 }
 0xaee   : > { %2018 = vst.msk [vmem:[%s2987_s14 + $0x8] sm:$0xff] %vm318_vm0, %v2016_v61 }
 0xaef   : > { %2629 = shalt.err (!%p2626_p6)
}
 0xaf0   : > { %s2630_s14 = scalar_lea.hbm %s3168_s19, 256  ;;  %s2634_s20 = scalar_lea.hbm %s3222_s6, 512 }
 0xaf1   : > { %p2631_p4 = scmp.ne.s32.totalorder %s3168_s19, %s2630_s14  ;;  %p2635_p11 = scmp.lt.s32.totalorder %s3168_s19, %s3222_s6 }
 0xaf2   : > { %p2636_p0 = scmp.lt.s32.totalorder %s2634_s20, %s2630_s14 }
 0xaf3   : > { %p2632_p8 = pnand %p2631_p4, %p3243_p7 }
 0xaf4   : > { %p2637_p9 = por %p2636_p0, %p2635_p11 }
 0xaf5   : > { %p2633_p5 = pneg %p2632_p8 }
 0xaf7   : > { %p2638_p12 = pnand %p2637_p9, %p2633_p5 }
 0xaf9   : > { %2641 = shalt.err (!%p2638_p12)
}
 0xafa   : > { %s2742_s18 = smov 128   ;;  %s2743_s15 = smov 8  }
 0xafb   : > { %2350 = dma.vmem_to_hbm [thread:$0]  (%p3243_p7), %s3170_s17, 256, %s3168_s19, %s2020_s8, %s2742_s18, %s2742_s18, %s2743_s15  }
 0xafc PF: > { %s2048_s25 = sand.u32 1, %s2680_s21   ;;  %p3244_p1 = scmp.ne.s32.totalorder %s3230_s28, 0 }
 0xafd   : > { %p3245_p10 = scmp.ge.s32.totalorder %s2692_s24, 2  ;;  %s2049_s12 = scalar_lea.sflag [#allocation6], %s2048_s25 }
 0xaff   : > { %p2367_p13 = pnand %p3245_p10, %p3244_p1 }
 0xb01   : > { %p2368_p2 = pneg %p2367_p13 }
 0xb03   : > { %2675 = dma.done.wait (%p2368_p2), %s2049_s12, 256  }
 0xb04   : > { %2677 = vsyncadd (%p2368_p2), %s2049_s12, 4294967040  ;;  %p21_p3 = scmp.ge.s32.totalorder %s2869_s13, 4   ;;  %s3246_s21 = smov %s2684_s22 }
 0xb05   : > { %s3247_s22 = smov %s2688_s23  ;;  %s3248_s23 = smov %s2879_s16 }
 0xb06   : > { %s3249_s24 = smov %s2869_s13  ;;  %23 = sbr.rel (!%p21_p3) target bundleno = 7 (0x7), region = 121 }
 0xb0b   :  { %2054 = vsyncpa [#allocation5], 1 }
 0xb0c   :  { %2056 = vsyncpa [#allocation5 + $0x1], 1 }
 0xb0d   :  { %2057 = vsyncpa [#allocation8], 1 }
 0xb0e   :  { %2058 = vsyncpa [#allocation11], 1 }
 0xb0f   :  { %2059 = vsyncpa [#allocation6], 1 }
 0xb10   :  { %2061 = vsyncpa [#allocation6 + $0x1], 1 }

// kernel: tpu_custom_call.1
= control target key start
LH: loop header
LB: loop body
LE: loop exit
PB: predicated region body
PF: predicated region fallthrough
CT: control target
= control target key end

     0   :  { %11 = vsyncpa [#allocation5], 0  ;;  %s3216_s0 = inlined_call_operand.hbm [shape: f32[4,8,32], index: 0, kind: input, shape index: {}]   ;;  %s3217_s1 = inlined_call_operand.vmem [shape: f32[1,32], index: 1, kind: input, shape index: {}]   ;;  %s3218_s2 = inlined_call_operand.hbm [shape: f32[1,32], index: 2, kind: input, shape index: {}]   ;;  %s3219_s3 = inlined_call_operand.hbm [shape: f32[32,160], index: 3, kind: input, shape index: {}]   ;;  %s3220_s4 = inlined_call_operand.vmem [shape: f32[1,160], index: 4, kind: input, shape index: {}]   ;;  %s3221_s5 = inlined_call_operand.hbm [shape: f32[32,64], index: 5, kind: input, shape index: {}]   ;;  %s3222_s6 = inlined_call_operand.hbm [shape: f32[4,8,32], index: 6, kind: output, shape index: {}]  }
   0x1   :  { %13 = vsyncpa [#allocation5 + $0x1], 0 }
   0x2   :  { %14 = vsyncpa [#allocation8], 0 }
   0x3   :  { %15 = vsyncpa [#allocation11], 0 }
   0x4   :  { %16 = vsyncpa [#allocation6], 0 }
   0x5   :  { %18 = vsyncpa [#allocation6 + $0x1], 0  ;;  %s2779_s21 = smov 0   ;;  %s2781_s22 = smov 0  }
   0x6   :  { %s2783_s23 = smov 0   ;;  %s2785_s24 = smov 0  }
   0x7 LB: > { %s2800_s25 = sadd.s32 4294967295, %s2692_s24   ;;  %s2144_s26 = sadd.s32 4294967294, %s2692_s24   ;;  %s2692_s24 = sphi %s2785_s24, %s3249_s24   ;;  %s2688_s23 = sphi %s2783_s23, %s3248_s23   ;;  %s2684_s22 = sphi %s2781_s22, %s3247_s22   ;;  %s2680_s21 = sphi %s2779_s21, %s3246_s21  }
   0x8   : > { %p44_p0 = scmp.ne.s32.totalorder %s2684_s22, %s2680_s21  ;;  %p3223_p1 = scmp.eq.s32.totalorder %s2800_s25, 0 }
   0x9   : > { %p173_p2 = scmp.eq.s32.totalorder %s2800_s25, 1  ;;  %p179_p3 = scmp.eq.s32.totalorder %s2144_s26, 1 }
   0xa   : > { %p2809_p4 = por %p3223_p1, %p44_p0  ;;  %p2145_p5 = scmp.ge.s32.totalorder %s2692_s24, 1 }
   0xb   : > { %p2814_p6 = por %p179_p3, %p44_p0  ;;  %p186_p7 = scmp.lt.s32.totalorder %s2692_s24, 3 }
   0xc   : > { %s3229_s27 = scalar_select %p2809_p4, 1, 0 }
   0xd   : > { %s3230_s28 = scalar_select %p2814_p6, 1, 0 }
   0xe   : > { %p2819_p8 = pnand %p2145_p5, %p186_p7  ;;  %s2698_s30 = smov [#allocation7]  }
   0xf   : > { %s202_s7 = sshll.u32 %s2698_s30, 4  ;;  %s2699_s8 = smov [#allocation9]   ;;  %s203_s7 = int_to_ptr.vmem [resolvable:$true] %s202_s7 }
  0x10   : > { %s3231_s29 = scalar_select %p2819_p8, 1, 0 }
  0x11   : > { %p2352_p10 = pneg %p2819_p8  ;;  %s212_s9 = sshll.u32 %s2699_s8, 4  ;;  %s2832_s9 = int_to_ptr.vmem [resolvable:$true] %s212_s9 }
  0x12   : > { %s2700_s11 = smov [#allocation10]   ;;  %s2521_s13 = scalar_lea.vmem %s203_s7, 16 }
  0x13   : > { %p2828_p11 = pnand %p2352_p10, %p3223_p1  ;;  %s228_s12 = sshll.u32 %s2700_s11, 4  ;;  %s229_s12 = int_to_ptr.vmem [resolvable:$true] %s228_s12 }
  0x14   : > { %p2522_p13 = scmp.ne.s32.totalorder %s203_s7, %s2521_s13  ;;  %s2528_s14 = scalar_lea.vmem %s203_s7, 32 }
  0x15   : > { %p2512_p12 = pneg %p2828_p11  ;;  %p2529_p5 = scmp.lt.s32.totalorder %s203_s7, %s203_s7 }
  0x16   : > { %p2530_p7 = scmp.lt.s32.totalorder %s2528_s14, %s2521_s13 }
  0x17   : > { %p2524_p0 = pnand %p2522_p13, %p2512_p12 }
  0x18   : > { %p2531_p10 = por %p2530_p7, %p2529_p5 }
  0x19   : > { %p2525_p3 = pneg %p2524_p0 }
  0x1b   : > { %p2532_p9 = pnand %p2531_p10, %p2525_p3 }
  0x1d   : > { %2535 = shalt.err (!%p2532_p9)
}
  0x1e   : > { %2355 = dma.hbm_to_vmem [thread:$0]  (!%p2828_p11), %s3218_s2, 16, %s203_s7, [#allocation8]  }
  0x1f   : > { %s2547_s17 = scalar_lea.vmem %s2832_s9, 1024  ;;  %p2555_p5 = scmp.lt.s32.totalorder %s2832_s9, %s2832_s9 }
  0x20   : > { %p2548_p1 = scmp.ne.s32.totalorder %s2832_s9, %s2547_s17  ;;  %p2556_p3 = scmp.lt.s32.totalorder %s2547_s17, %s2547_s17 }
  0x22   : > { %p2550_p13 = pnand %p2548_p1, %p2512_p12  ;;  %p2557_p9 = por %p2556_p3, %p2555_p5 }
  0x24   : > { %p2551_p0 = pneg %p2550_p13 }
  0x26   : > { %p2558_p7 = pnand %p2557_p9, %p2551_p0 }
  0x28   : > { %2561 = shalt.err (!%p2558_p7)
}
  0x29   : > { %s2701_s18 = smov 256   ;;  %s2702_s19 = smov 16  }
  0x2a   : > { %2358 = dma.hbm_to_vmem [thread:$0]  (!%p2828_p11), %s3219_s3, 1024, %s2832_s9, [#allocation8], %s2701_s18, %s2701_s18, %s2702_s19  }
  0x2b   : > { %s2573_s30 = scalar_lea.vmem %s229_s12, 512  ;;  %p2581_p5 = scmp.lt.s32.totalorder %s229_s12, %s229_s12 }
  0x2c   : > { %p2574_p1 = scmp.ne.s32.totalorder %s229_s12, %s2573_s30  ;;  %p2582_p0 = scmp.lt.s32.totalorder %s2573_s30, %s2573_s30 }
  0x2e   : > { %p2576_p10 = pnand %p2574_p1, %p2512_p12  ;;  %p2583_p3 = por %p2582_p0, %p2581_p5 }
  0x30   : > { %p2577_p13 = pneg %p2576_p10 }
  0x32   : > { %p2584_p9 = pnand %p2583_p3, %p2577_p13 }
  0x34   : > { %2587 = shalt.err (!%p2584_p9)
}
  0x35   : > { %s3224_s7 = smov 128   ;;  %s3225_s8 = smov 8  }
  0x36   : > { %2361 = dma.hbm_to_vmem [thread:$0]  (!%p2828_p11), %s3221_s5, 512, %s229_s12, [#allocation11], %s3224_s7, %s3224_s7, %s3225_s8  }
  0x37   : > { %s2869_s13 = sadd.s32 1, %s2692_s24   ;;  %s31_s15 = sadd.s32 1, %s2688_s23 }
  0x38   : > { %s28_s14 = ssub.s32 %s2692_s24, %s2869_s13  ;;  %p38_p7 = scmp.ne.s32.totalorder %s2688_s23, %s2684_s22 }
  0x39   : > { %p29_p12 = scmp.eq.s32.totalorder %s28_s14, 0  ;;  %p39_p1 = scmp.eq.s32.totalorder %s2692_s24, 0 }
  0x3a   : > { %p2373_p10 = scmp.lt.s32.totalorder %s2692_s24, 2  ;;  %p2883_p5 = por %p173_p2, %p38_p7 }
  0x3b   : > { %s2879_s16 = scalar_select %p29_p12, %s2688_s23, %s31_s15  }
  0x3c   : > { %p40_p13 = por %p39_p1, %p38_p7  ;;  %s242_s17 = sand.u32 1, %s2688_s23  }
  0x3d   : > { %s3233_s10 = scalar_select %p2883_p5, 1, 0 }
  0x3e   : > { %s2197_s18 = sshll.u32 %s2692_s24, 8  ;;  %s2150_s12 = sshll.u32 %s242_s17, 4 }
  0x3f   : > { %s2892_s26 = scalar_lea.hbm %s3216_s0, %s2197_s18  ;;  %s246_s30 = scalar_lea.vmem [#allocation4], %s2150_s12 }
  0x40   : > { %s253_s9 = sshll.u32 %s246_s30, 4  ;;  %p2894_p11 = pnand %p2373_p10, %p40_p13  ;;  %s2898_s9 = int_to_ptr.vmem [resolvable:$true] %s253_s9 }
  0x41   : > { %s2900_s14 = scalar_lea.sflag [#allocation5], %s242_s17  ;;  %s2588_s15 = scalar_lea.hbm %s2892_s26, 256 }
  0x42   : > { %p2589_p2 = scmp.ne.s32.totalorder %s2892_s26, %s2588_s15  ;;  %p2590_p0 = pneg %p2894_p11 }
  0x43   : > { %s2593_s12 = scalar_lea.hbm %s3216_s0, 512  ;;  %p2594_p12 = scmp.lt.s32.totalorder %s2892_s26, %s3216_s0 }
  0x44   : > { %p2591_p3 = pnand %p2590_p0, %p2589_p2  ;;  %p2595_p7 = scmp.lt.s32.totalorder %s2593_s12, %s2588_s15 }
  0x46   : > { %p2592_p9 = pneg %p2591_p3  ;;  %p2596_p1 = por %p2595_p7, %p2594_p12 }
  0x48   : > { %p2597_p10 = pnand %p2596_p1, %p2592_p9 }
  0x4a   : > { %2600 = shalt.err (!%p2597_p10)
}
  0x4b   : > { %s2601_s17 = scalar_lea.vmem %s2898_s9, 256  ;;  %s2705_s7 = smov [#allocation4]  }
  0x4c   : > { %p2602_p13 = scmp.ne.s32.totalorder %s2898_s9, %s2601_s17  ;;  %s2606_s8 = sshll.u32 %s2705_s7, 4  ;;  %s2607_s8 = int_to_ptr.vmem [resolvable:$false] %s2606_s8 }
  0x4d   : > { %s2608_s18 = scalar_lea.vmem %s2607_s8, 512  ;;  %p2609_p3 = scmp.lt.s32.totalorder %s2898_s9, %s2607_s8 }
  0x4e   : > { %p2604_p6 = pnand %p2602_p13, %p2590_p0  ;;  %p2610_p5 = scmp.lt.s32.totalorder %s2608_s18, %s2601_s17 }
  0x50   : > { %p2605_p2 = pneg %p2604_p6  ;;  %p2611_p4 = por %p2610_p5, %p2609_p3 }
  0x52   : > { %p2612_p8 = pnand %p2611_p4, %p2605_p2 }
  0x54   : > { %2615 = shalt.err (!%p2612_p8)
}
  0x55   : > { %s3235_s15 = smov 8   ;;  %s3236_s19 = smov 128  }
  0x56   : > { %2365 = dma.hbm_to_vmem [thread:$0]  (!%p2894_p11), %s2892_s26, 256, %s2898_s9, %s2900_s14, %s3236_s19, %s3236_s19, %s3235_s15  }
  0x57   : > { %p3237_p6 = scmp.ne.s32.totalorder %s3231_s29, 0 }
  0x58   : > { %s2927_s7 = sand.u32 (!%p3237_p6), 1, %s2684_s22   ;;  %p3238_p4 = scmp.ne.s32.totalorder (!%p3237_p6), %s3229_s27, 0 }
  0x59   : > { %265 = sbr.rel (%p3237_p6) target bundleno = 2812 (0xafc), region = 44  ;;  %s2154_s8 = sshll.u32 (!%p3237_p6), %s2927_s7, 4 }
  0x5a   : > { %s268_s12 = scalar_lea.sflag (!%p3237_p6), [#allocation5], %s2927_s7  ;;  %s271_s11 = scalar_lea.vmem (!%p3237_p6), [#allocation4], %s2154_s8 }
  0x5e   : > { %2663 = dma.done.wait (%p3238_p4), %s268_s12, 256  }
  0x5f   : > { %2665 = vsyncadd (%p3238_p4), %s268_s12, 4294967040  ;;  %p3239_p8 = scmp.eq.s32.totalorder %s2800_s25, 0 }
  0x61   : > { %2667 = dma.done.wait (%p3239_p8), [#allocation8], 1040   ;;  %p3240_p5 = pmov %p3239_p8 }
  0x63   : > { %2669 = vsyncadd (%p3240_p5), [#allocation8], 4294966256  ;;  %p3241_p11 = pmov %p3240_p5 }
  0x64   : > { %p3242_p0 = pmov %p3240_p5 }
  0x65   : > { %2671 = dma.done.wait (%p3241_p11), [#allocation11], 512  }
  0x66   : > { %2673 = vsyncadd (%p3242_p0), [#allocation11], 4294966784  ;;  %vm318_vm0 = vcmask 261120   ;;  %v2945_v0 = vld [vmem:[%s271_s11] sm:$0xff]  ;;  %v2947_v1 = vld [vmem:[%s271_s11 + $0x8] sm:$0xff]  ;;  %v2706_v22 = vmov 0.0   ;;  %v386_v49 = vlaneseq }
  0x67   : > { %v319_v2 = vsel %vm318_vm0, %v2945_v0, 0.0  ;;  %v322_v3 = vsel %vm318_vm0, %v2947_v1, 0.0  ;;  %v383_v14 = vld [vmem:[#allocation9 + $0x38] sm:$0xff]  ;;  %v382_v15 = vld [vmem:[#allocation9 + $0x30] sm:$0xff]  ;;  %v381_v16 = vld [vmem:[#allocation9 + $0x28] sm:$0xff]  ;;  %466 = vmatprep.mubr.f32.mxu0 %v2706_v22  ;;  %472 = vmatprep.mubr.f32.mxu1 %v2706_v22  ;;  %vm479_vm5 = vcmask 785408  }
  0x68   : > { %320 = vadd.xlane.f32.xlu0 %v319_v2  ;;  %426 = vmatprep.subr.mxu0 %v383_v14  ;;  %v380_v17 = vld [vmem:[#allocation9 + $0x20] sm:$0xff]  ;;  %v379_v18 = vld [vmem:[#allocation9 + $0x18] sm:$0xff]  ;;  %v378_v19 = vld [vmem:[#allocation9 + $0x10] sm:$0xff]  ;;  %v387_v50 = vshrl.u32 %v386_v49, 7  ;;  %s2987_s14 = scalar_lea.vmem [#allocation12], %s2154_s8  ;;  %s2989_s20 = smov 0  }
  0x69   : > { %2328 = vmatprep.subr.mxu1 %v383_v14  ;;  %427 = vmatpush1.msra.mxu0 %v382_v15  ;;  %v377_v20 = vld [vmem:[#allocation9 + $0x8] sm:$0xff]  ;;  %v376_v21 = vld [vmem:[#allocation9] sm:$0xff]  ;;  %v2159_v40 = vld [vmem:[%s3217_s1] ss:$0 sm:$0xff] }
  0x6a   : > { %2332 = vmatpush1.msra.mxu1 %v382_v15  ;;  %428 = vmatprep.subr.mxu0 %v381_v16  ;;  %v2160_v42 = vld [vmem:[#allocation7] ss:$0 sm:$0xff]  ;;  %v388_v51 = vsub.s32 0, %v387_v50  ;;  %v392_v53 = vsub.s32 1, %v387_v50 }
  0x6b   : > { %2329 = vmatprep.subr.mxu1 %v381_v16  ;;  %429 = vmatpush1.msra.mxu0 %v380_v17  ;;  %v384_v52 = vld [vmem:[%s3220_s4] sm:$0x3] }
  0x6c   : > { %323 = vadd.xlane.f32.xlu0 %v322_v3  ;;  %2333 = vmatpush1.msra.mxu1 %v380_v17  ;;  %v389_v54 = vrot.slane %v384_v52, %v388_v51  ;;  %v393_v55 = vrot.slane %v384_v52, %v392_v53 }
  0x6d   : > { %430 = vmatprep.subr.mxu0 %v379_v18  ;;  %2330 = vmatprep.subr.mxu1 %v379_v18 }
  0x6e   : > { %431 = vmatpush1.msra.mxu0 %v378_v19  ;;  %2334 = vmatpush1.msra.mxu1 %v378_v19 }
  0x6f   : > { %432 = vmatprep.subr.mxu0 %v377_v20  ;;  %2331 = vmatprep.subr.mxu1 %v377_v20 }
  0x70   : > { %433 = vmatpush1.msra.mxu0 %v376_v21  ;;  %2335 = vmatpush1.msra.mxu1 %v376_v21 }
  0xf1   : > { %v321_v4 = vpop.xlane.xlu0 %320 }
  0xf2   : > { %v326_v5 = vmul.f32 0.03125, %v321_v4 }
  0xf4   : > { %v2954_v6 = vsub.f32 %v2945_v0, %v326_v5 }
  0xf5   : > { %v324_v7 = vpop.xlane.xlu0 %323 }
  0xf6   : > { %v327_v8 = vmul.f32 0.03125, %v324_v7  ;;  %v330_v9 = vmul.f32 %v2954_v6, %v2954_v6 }
  0xf8   : > { %v2959_v10 = vsub.f32 %v2947_v1, %v327_v8  ;;  %v332_v11 = vsel %vm318_vm0, %v330_v9, 0.0 }
  0xf9   : > { %333 = vadd.xlane.f32.xlu1 %v332_v11 }
  0xfa   : > { %v331_v12 = vmul.f32 %v2959_v10, %v2959_v10 }
  0xfc   : > { %v335_v13 = vsel %vm318_vm0, %v331_v12, 0.0 }
  0xfd   : > { %336 = vadd.xlane.f32.xlu1 %v335_v13 }
 0x182   : > { %v334_v23 = vpop.xlane.xlu1 %333 }
 0x183   : > { %v338_v24 = vmul.f32 0.032258064, %v334_v23 }
 0x185   : > { %2462 = vrsqrt.f32 %v338_v24  ;;  %vm342_vm1 = vcmp.eq.f32.partialorder %v338_v24, inf  ;;  %v345_v29 = vand.u32 2147483648, %v338_v24  ;;  %vm344_vm2 = vcmp.eq.f32.partialorder %v338_v24, 0.0 }
 0x186   : > { %v337_v25 = vpop.xlane.xlu1 %336 }
 0x187   : > { %v339_v26 = vmul.f32 0.032258064, %v337_v25 }
 0x189   : > { %2464 = vrsqrt.f32 %v339_v26  ;;  %vm349_vm3 = vcmp.eq.f32.partialorder %v339_v26, inf  ;;  %v352_v35 = vand.u32 2147483648, %v339_v26  ;;  %vm351_vm4 = vcmp.eq.f32.partialorder %v339_v26, 0.0 }
 0x192   : > { %v2463_v27 = vpop.eup %2462 }
 0x193   : > { %v341_v28 = vmul.f32 %v2463_v27, %v338_v24 }
 0x195   : > { %v343_v30 = vsel %vm342_vm1, %v338_v24, %v341_v28 }
 0x196   : > { %v2465_v31 = vpop.eup %2464  ;;  %v346_v32 = vsel %vm344_vm2, %v345_v29, %v343_v30 }
 0x197   : > { %v354_v33 = vadd.f32 1e-06, %v346_v32  ;;  %v348_v34 = vmul.f32 %v2465_v31, %v339_v26 }
 0x199   : > { %2466 = vrcp.f32 %v354_v33  ;;  %v350_v36 = vsel %vm349_vm3, %v339_v26, %v348_v34 }
 0x19a   : > { %v353_v37 = vsel %vm351_vm4, %v352_v35, %v350_v36 }
 0x19b   : > { %v355_v38 = vadd.f32 1e-06, %v353_v37 }
 0x19d   : > { %2468 = vrcp.f32 %v355_v38 }
 0x1a6   : > { %v2467_v39 = vpop.eup %2466 }
 0x1a7   : > { %v358_v41 = vmul.f32 %v2467_v39, %v2954_v6 }
 0x1a9   : > { %v366_v43 = vmul.f32 %v2159_v40, %v358_v41 }
 0x1aa   : > { %v2469_v44 = vpop.eup %2468 }
 0x1ab   : > { %v374_v45 = vadd.f32 %v2160_v42, %v366_v43  ;;  %v359_v46 = vmul.f32 %v2469_v44, %v2959_v10 }
 0x1ad   : > { %2161 = vmatmul.mubr.msk.f32.vlgmr.msra.gmra.mxu0 %vm318_vm0, %v374_v45  ;;  %v367_v47 = vmul.f32 %v2159_v40, %v359_v46 }
 0x1af   : > { %v375_v48 = vadd.f32 %v2160_v42, %v367_v47 }
 0x1b1   : > { %2162 = vmatmul.mubr.msk.f32.vlgmr.msra.gmra.mxu1 %vm318_vm0, %v375_v48 }
 0x26d   : > { %v468_v56 = vpop.f32.mrf.mxu0 }
 0x26e   : > { %v2975_v57 = vadd.f32 %v468_v56, %v389_v54 }
 0x26f   : > { %v470_v58 = vpop.f32.mrf.mxu0 }
 0x270   : > { %480 = vst.msk [vmem:[#allocation2] sm:$0xff] %vm479_vm5, %v2975_v57  ;;  %v2978_v59 = vadd.f32 %v470_v58, %v393_v55 }
 0x271   : > { %v474_v60 = vpop.f32.mrf.mxu1 }
 0x272   : > { %v2980_v61 = vadd.f32 %v474_v60, %v389_v54 }
 0x273   : > { %v476_v62 = vpop.f32.mrf.mxu1 }
 0x274   : > { %481 = vst.msk [vmem:[#allocation2 + $0x8] sm:$0xff] %vm479_vm5, %v2980_v61  ;;  %v2983_v63 = vadd.f32 %v476_v62, %v393_v55 }
 0x275 LB: >> { %v2707_v2 = vmov 0.0   ;;  %vm2708_vm6 = vmmov 0   ;;  %s2163_s30 = sshll.u32 %s2696_s20, 3  ;;  %s2709_s18 = smov 96   ;;  %vm494_vm7 = vcmask 31744   ;;  %vm570_vm8 = vcmask 64512   ;;  %s2696_s20 = sphi %s2989_s20, %s487_s20  }
 0x276   : >> { %2237 = vmatprep.subr.mxu0 %v2707_v2  ;;  %2239 = vmatprep.mubr.msk.f32.mxu0 %vm2708_vm6, %v2707_v2  ;;  %s489_s17 = scalar_lea.vmem [#allocation2], %s2163_s30  ;;  %s2710_s15 = smov 64   ;;  %vm1874_vm9 = vcmask 97280   ;;  %vm1876_vm10 = vcmask 130048   ;;  %vm1878_vm11 = vcmask 162816   ;;  %vm1880_vm12 = vcmask 195584  }
 0x277   : >> { %2242 = vmatprep.subr.mxu1 %v2707_v2  ;;  %2244 = vmatprep.mubr.msk.f32.mxu1 %vm2708_vm6, %v2707_v2  ;;  %s2711_s19 = smov 92   ;;  %s2712_s8 = smov 124   ;;  %vm1882_vm13 = vcmask 228352  }
 0x278   : >> { %s2713_s12 = smov 88   ;;  %s2714_s11 = smov 84  }
 0x279   : >> { %s2715_s27 = smov 72   ;;  %s2716_s29 = smov 68  }
 0x27a   : >> { %s2717_s26 = smov 120   ;;  %s2718_s9 = smov 116  }
 0x27b   : >> { %v3003_v3 = vld [vmem:[%s489_s17] sm:$0xff]  ;;  %s2719_s17 = smov 80   ;;  %s487_s20 = sadd.s32 1, %s2696_s20  }
 0x27c   : >> { %492 = vrot.lane.b32.xlu0 %v3003_v3, %s2709_s18  ;;  %585 = vrot.lane.b32.xlu1 %v3003_v3, %s2710_s15  ;;  %s2720_s18 = smov 112   ;;  %s2721_s15 = smov 76  }
 0x27d   : >> { %p484_p9 = scmp.ge.s32.totalorder %s487_s20, 2  }
 0x27e   : > { %s2739_s20 = smov (%p484_p9), 96   ;;  %p3243_p7 = scmp.ne.s32.totalorder (%p484_p9), %s3233_s10, 0 }
 0x280   : >> { %663 = vrot.lane.b32.xlu1 %v3003_v3, %s2711_s19  ;;  %s2722_s19 = smov 108  }
 0x284   : >> { %661 = vrot.lane.b32.xlu1 %v3003_v3, %s2712_s8  ;;  %s2723_s8 = smov 104  }
 0x288   : >> { %832 = vrot.lane.b32.xlu1 %v3003_v3, %s2713_s12  ;;  %s2724_s12 = smov 100  }
 0x2ee   : >> { %v493_v4 = vpop.permute.xlu0 %492  ;;  %v586_v9 = vpop.permute.xlu1 %585 }
 0x2ef   : >> { %2238 = vmatpush3.xpose.msk.msra.mxu0 %vm494_vm7, %v493_v4  ;;  %2243 = vmatpush3.msra.mxu1 %v586_v9 }
 0x2f0   : >> { %2252 = vmatprep.subr.mxu0 %v2707_v2  ;;  %2247 = vmatprep.subr.mxu1 %v2707_v2 }
 0x2f2   : >> { %2240 = vmatmul.mubr.msk.f32.vlgmr.msra.gmra.mxu0 %vm494_vm7, %v3003_v3  ;;  %v664_v15 = vpop.permute.xlu1 %663 }
 0x2f3   : >> { %2254 = vmatprep.mubr.msk.f32.mxu0 %vm2708_vm6, %v2707_v2 }
 0x2f6   : >> { %v662_v16 = vpop.permute.xlu1 %661 }
 0x2fa   : >> { %v833_v17 = vpop.permute.xlu1 %832 }
 0x3b2   : >> { %v565_v5 = vpop.f32.mrf.mxu0 }
 0x3b3   : >> { %v569_v6 = vmul.f32 0.5, %v565_v5 }
 0x3b4   : >> { %v2241_v7 = vpop.f32.mrf.mxu0 }
 0x3b5   : >> { %v571_v8 = vsel %vm570_vm8, %v569_v6, -inf }
 0x3b6   : >> { %572 = vmax.xlane.f32.xlu0 %v571_v8 }
 0x3cc   : >> { %1001 = vrot.lane.b32.xlu0 %v3003_v3, %s2714_s11  ;;  %s2725_s11 = smov 60  }
 0x3d0   : >> { %1508 = vrot.lane.b32.xlu0 %v3003_v3, %s2715_s27  ;;  %s2726_s27 = smov 52  }
 0x3d4   : >> { %1677 = vrot.lane.b32.xlu0 %v3003_v3, %s2716_s29  ;;  %s2727_s29 = smov 56  }
 0x43f   : >> { %v573_v10 = vpop.xlane.xlu0 %572 }
 0x440   : >> { %v574_v11 = vsub.f32 %v569_v6, %v573_v10 }
 0x442   : >> { %v575_v12 = vmul.f32 1.442695, %v574_v11 }
 0x443   : >> { %v1002_v28 = vpop.permute.xlu0 %1001 }
 0x444   : >> { %2470 = vpow2.f32 %v575_v12 }
 0x447   : >> { %v1509_v31 = vpop.permute.xlu0 %1508 }
 0x44b   : >> { %v1678_v33 = vpop.permute.xlu0 %1677 }
 0x451   : >> { %v2471_v13 = vpop.eup %2470 }
 0x452   : >> { %v577_v14 = vsel %vm570_vm8, %v2471_v13, 0.0 }
 0x453   : >> { %578 = vadd.xlane.f32.xlu1 %v577_v14 }
 0x464   : >> { %830 = vrot.lane.b32.xlu1 %v3003_v3, %s2717_s26  ;;  %s2728_s26 = smov 48  }
 0x468   : >> { %999 = vrot.lane.b32.xlu1 %v3003_v3, %s2718_s9  ;;  %s2729_s9 = smov 44  }
 0x46c   : >> { %1170 = vrot.lane.b32.xlu1 %v3003_v3, %s2719_s17  ;;  %s2730_s17 = smov 36  }
 0x470   : >> { %1168 = vrot.lane.b32.xlu1 %v3003_v3, %s2720_s18  ;;  %s2731_s18 = smov 40  }
 0x474   : >> { %1339 = vrot.lane.b32.xlu1 %v3003_v3, %s2721_s15  ;;  %s2732_s15 = smov 4  }
 0x478   : >> { %1337 = vrot.lane.b32.xlu1 %v3003_v3, %s2722_s19  ;;  %s2733_s19 = smov 8  }
 0x47c   : >> { %1506 = vrot.lane.b32.xlu1 %v3003_v3, %s2723_s8  ;;  %s2734_s8 = smov 12  }
 0x480   : >> { %1675 = vrot.lane.b32.xlu1 %v3003_v3, %s2724_s12  ;;  %s2735_s12 = smov 16  }
 0x4dc   : >> { %v579_v18 = vpop.xlane.xlu1 %578 }
 0x4dd   : >> { %2472 = vrcp.f32 %v579_v18 }
 0x4e0   : >> { %v831_v19 = vpop.permute.xlu1 %830 }
 0x4e4   : >> { %v1000_v21 = vpop.permute.xlu1 %999 }
 0x4e8   : >> { %v1171_v25 = vpop.permute.xlu1 %1170 }
 0x4ea   : >> { %v2473_v20 = vpop.eup %2472 }
 0x4eb   : >> { %v581_v22 = vmul.f32 %v2473_v20, %v579_v18 }
 0x4ec   : >> { %v1169_v27 = vpop.permute.xlu1 %1168 }
 0x4ed   : >> { %v582_v23 = vsub.f32 2.0, %v581_v22 }
 0x4ef   : >> { %v583_v24 = vmul.f32 %v2473_v20, %v582_v23 }
 0x4f0   : >> { %v1340_v29 = vpop.permute.xlu1 %1339 }
 0x4f1   : >> { %v584_v26 = vmul.f32 %v2471_v13, %v583_v24 }
 0x4f3   : >> { %2245 = vmatmul.mubr.msk.f32.vlgmr.msra.gmra.mxu1 %vm570_vm8, %v584_v26 }
 0x4f4   : >> { %2248 = vmatpush3.xpose.msk.msra.mxu1 %vm494_vm7, %v664_v15  ;;  %2249 = vmatprep.mubr.msk.f32.mxu1 %vm2708_vm6, %v2707_v2  ;;  %v1338_v30 = vpop.permute.xlu1 %1337 }
 0x4f5   : >> { %2257 = vmatprep.subr.mxu1 %v2707_v2 }
 0x4f7   : >> { %2250 = vmatmul.mubr.msk.f32.vlgmr.msra.gmra.mxu1 %vm494_vm7, %v662_v16 }
 0x4f8   : >> { %2258 = vmatpush3.xpose.msk.msra.mxu1 %vm494_vm7, %v833_v17  ;;  %2259 = vmatprep.mubr.msk.f32.mxu1 %vm2708_vm6, %v2707_v2  ;;  %v1507_v32 = vpop.permute.xlu1 %1506 }
 0x4f9   : >> { %2267 = vmatprep.subr.mxu1 %v2707_v2 }
 0x4fb   : >> { %2260 = vmatmul.mubr.msk.f32.vlgmr.msra.gmra.mxu1 %vm494_vm7, %v831_v19 }
 0x4fc   : >> { %2268 = vmatpush3.xpose.msk.msra.mxu1 %vm494_vm7, %v1002_v28  ;;  %2269 = vmatprep.mubr.msk.f32.mxu1 %vm2708_vm6, %v2707_v2  ;;  %v1676_v34 = vpop.permute.xlu1 %1675 }
 0x4fd   : >> { %2277 = vmatprep.subr.mxu1 %v2707_v2 }
 0x4ff   : >> { %2270 = vmatmul.mubr.msk.f32.vlgmr.msra.gmra.mxu1 %vm494_vm7, %v1000_v21 }
 0x500   : >> { %2278 = vmatpush3.xpose.msk.msra.mxu1 %vm494_vm7, %v1171_v25  ;;  %2279 = vmatprep.mubr.msk.f32.mxu1 %vm2708_vm6, %v2707_v2 }
 0x501   : >> { %2287 = vmatprep.subr.mxu1 %v2707_v2 }
 0x503   : >> { %2280 = vmatmul.mubr.msk.f32.vlgmr.msra.gmra.mxu1 %vm494_vm7, %v1169_v27 }
 0x504   : >> { %2288 = vmatpush3.xpose.msk.msra.mxu1 %vm494_vm7, %v1340_v29  ;;  %2289 = vmatprep.mubr.msk.f32.mxu1 %vm2708_vm6, %v2707_v2 }
 0x505   : >> { %2297 = vmatprep.subr.mxu1 %v2707_v2 }
 0x507   : >> { %2290 = vmatmul.mubr.msk.f32.vlgmr.msra.gmra.mxu1 %vm494_vm7, %v1338_v30 }
 0x508   : >> { %2298 = vmatpush3.xpose.msk.msra.mxu1 %vm494_vm7, %v1509_v31  ;;  %2299 = vmatprep.mubr.msk.f32.mxu1 %vm2708_vm6, %v2707_v2 }
 0x509   : >> { %2307 = vmatprep.subr.mxu1 %v2707_v2 }
 0x50b   : >> { %2300 = vmatmul.mubr.msk.f32.vlgmr.msra.gmra.mxu1 %vm494_vm7, %v1507_v32 }
 0x50c   : >> { %2308 = vmatpush3.xpose.msk.msra.mxu1 %vm494_vm7, %v1678_v33  ;;  %2309 = vmatprep.mubr.msk.f32.mxu1 %vm2708_vm6, %v2707_v2 }
 0x50f   : >> { %2310 = vmatmul.mubr.msk.f32.vlgmr.msra.gmra.mxu1 %vm494_vm7, %v1676_v34 }
 0x5b3   : >> { %v3065_v35 = vpop.f32.mrf.mxu1 }
 0x5b5   : >> { %v2246_v36 = vpop.f32.mrf.mxu1 }
 0x5b7   : >> { %v735_v37 = vpop.f32.mrf.mxu1 }
 0x5b8   : >> { %v739_v38 = vmul.f32 0.5, %v735_v37 }
 0x5b9   : >> { %v2251_v39 = vpop.f32.mrf.mxu1 }
 0x5ba   : >> { %v740_v40 = vsel %vm570_vm8, %v739_v38, -inf }
 0x5bb   : >> { %741 = vmax.xlane.f32.xlu0 %v740_v40  ;;  %v904_v41 = vpop.f32.mrf.mxu1 }
 0x5bc   : >> { %v908_v42 = vmul.f32 0.5, %v904_v41 }
 0x5bd   : >> { %v2261_v43 = vpop.f32.mrf.mxu1 }
 0x5be   : >> { %v909_v44 = vsel %vm570_vm8, %v908_v42, -inf }
 0x5bf   : >> { %910 = vmax.xlane.f32.xlu1 %v909_v44  ;;  %v1073_v45 = vpop.f32.mrf.mxu1 }
 0x5c0   : >> { %v1077_v46 = vmul.f32 0.5, %v1073_v45 }
 0x5c1   : >> { %v2271_v47 = vpop.f32.mrf.mxu1 }
 0x5c2   : >> { %v1078_v48 = vsel %vm570_vm8, %v1077_v46, -inf }
 0x5c3   : >> { %1079 = vmax.xlane.f32.xlu0 %v1078_v48  ;;  %v1242_v49 = vpop.f32.mrf.mxu1 }
 0x5c4   : >> { %v1246_v50 = vmul.f32 0.5, %v1242_v49 }
 0x5c5   : >> { %v2281_v51 = vpop.f32.mrf.mxu1 }
 0x5c6   : >> { %v1247_v52 = vsel %vm570_vm8, %v1246_v50, -inf }
 0x5c7   : >> { %1248 = vmax.xlane.f32.xlu0 %v1247_v52  ;;  %v1411_v53 = vpop.f32.mrf.mxu1 }
 0x5c8   : >> { %v1415_v54 = vmul.f32 0.5, %v1411_v53 }
 0x5c9   : >> { %v2291_v55 = vpop.f32.mrf.mxu1 }
 0x5ca   : >> { %v1416_v56 = vsel %vm570_vm8, %v1415_v54, -inf }
 0x5cb   : >> { %1417 = vmax.xlane.f32.xlu1 %v1416_v56  ;;  %v1580_v58 = vpop.f32.mrf.mxu1 }
 0x5cc   : >> { %v3072_v60 = vmul.f32 0.5, %v1580_v58 }
 0x5cd   : >> { %v2301_v62 = vpop.f32.mrf.mxu1 }
 0x5ce   : >> { %v1585_v4 = vsel %vm570_vm8, %v3072_v60, -inf }
 0x5cf   : >> { %1586 = vmax.xlane.f32.xlu0 %v1585_v4  ;;  %v1749_v5 = vpop.f32.mrf.mxu1 }
 0x5d0   : >> { %v1753_v7 = vmul.f32 0.5, %v1749_v5 }
 0x5d1   : >> { %v2311_v6 = vpop.f32.mrf.mxu1 }
 0x5d2   : >> { %v1754_v8 = vsel %vm570_vm8, %v1753_v7, -inf }
 0x5dc   : >> { %754 = vrot.lane.b32.xlu1 %v3003_v3, %s2725_s11  ;;  %s2736_s11 = smov 20  }
 0x600   : >> { %1755 = vmax.xlane.f32.xlu1 %v1754_v8 }
 0x644   : >> { %v742_v9 = vpop.xlane.xlu0 %741 }
 0x645   : >> { %v743_v10 = vsub.f32 %v739_v38, %v742_v9 }
 0x647   : >> { %v744_v11 = vmul.f32 1.442695, %v743_v10 }
 0x648   : >> { %v911_v12 = vpop.xlane.xlu1 %910 }
 0x649   : >> { %2474 = vpow2.f32 %v744_v11  ;;  %v912_v13 = vsub.f32 %v908_v42, %v911_v12 }
 0x64b   : >> { %v913_v14 = vmul.f32 1.442695, %v912_v13 }
 0x64c   : >> { %v1080_v15 = vpop.xlane.xlu0 %1079 }
 0x64d   : >> { %2476 = vpow2.f32 %v913_v14  ;;  %v1081_v16 = vsub.f32 %v1077_v46, %v1080_v15 }
 0x64f   : >> { %v1082_v17 = vmul.f32 1.442695, %v1081_v16 }
 0x650   : >> { %v1249_v26 = vpop.xlane.xlu0 %1248 }
 0x651   : >> { %2478 = vpow2.f32 %v1082_v17  ;;  %v1250_v27 = vsub.f32 %v1246_v50, %v1249_v26 }
 0x653   : >> { %v1251_v28 = vmul.f32 1.442695, %v1250_v27 }
 0x654   : >> { %v1418_v18 = vpop.xlane.xlu1 %1417 }
 0x655   : >> { %v1419_v29 = vsub.f32 %v1415_v54, %v1418_v18  ;;  %2480 = vpow2.f32 %v1251_v28 }
 0x656   : >> { %v3078_v19 = vpop.eup %2474 }
 0x657   : >> { %v746_v20 = vsel %vm570_vm8, %v3078_v19, 0.0  ;;  %v1420_v30 = vmul.f32 1.442695, %v1419_v29 }
 0x658   : >> { %747 = vadd.xlane.f32.xlu0 %v746_v20  ;;  %v755_v21 = vpop.permute.xlu1 %754  ;;  %v1587_v41 = vpop.xlane.xlu0 %1586 }
 0x659   : >> { %2253 = vmatpush3.msra.mxu0 %v755_v21  ;;  %2482 = vpow2.f32 %v1420_v30  ;;  %v1588_v42 = vsub.f32 %v3072_v60, %v1587_v41 }
 0x65a   : >> { %v3082_v22 = vpop.eup %2476  ;;  %2262 = vmatprep.subr.mxu0 %v2707_v2 }
 0x65b   : >> { %v915_v23 = vsel %vm570_vm8, %v3082_v22, 0.0  ;;  %v1589_v43 = vmul.f32 1.442695, %v1588_v42 }
 0x65c   : >> { %916 = vadd.xlane.f32.xlu1 %v915_v23 }
 0x65e   : >> { %v3087_v24 = vpop.eup %2478 }
 0x65f   : >> { %v1084_v25 = vsel %vm570_vm8, %v3087_v24, 0.0 }
 0x660   : >> { %1085 = vadd.xlane.f32.xlu0 %v1084_v25 }
 0x662   : >> { %v3093_v34 = vpop.eup %2480 }
 0x663   : >> { %v1253_v36 = vsel %vm570_vm8, %v3093_v34, 0.0 }
 0x666   : >> { %v3097_v37 = vpop.eup %2482 }
 0x667   : >> { %v1422_v38 = vsel %vm570_vm8, %v3097_v37, 0.0 }
 0x66d   : >> { %1092 = vrot.lane.b32.xlu1 %v3003_v3, %s2726_s27  ;;  %s2737_s27 = smov 24  }
 0x676   : >> { %923 = vrot.lane.b32.xlu0 %v3003_v3, %s2727_s29  ;;  %s2738_s29 = smov 28  }
 0x689   : >> { %v1756_v31 = vpop.xlane.xlu1 %1755 }
 0x68a   : >> { %v1757_v32 = vsub.f32 %v1753_v7, %v1756_v31 }
 0x68c   : >> { %v1758_v33 = vmul.f32 1.442695, %v1757_v32 }
 0x68e   : >> { %2484 = vpow2.f32 %v1758_v33 }
 0x68f   : >> { %2486 = vpow2.f32 %v1589_v43 }
 0x691   : >> { %1254 = vadd.xlane.f32.xlu1 %v1253_v36 }
 0x695   : >> { %1423 = vadd.xlane.f32.xlu0 %v1422_v38 }
 0x69b   : >> { %v3101_v39 = vpop.eup %2484 }
 0x69c   : >> { %v1760_v40 = vsel %vm570_vm8, %v3101_v39, 0.0  ;;  %v3109_v44 = vpop.eup %2486 }
 0x69d   : >> { %1761 = vadd.xlane.f32.xlu0 %v1760_v40  ;;  %v1591_v45 = vsel %vm570_vm8, %v3109_v44, 0.0 }
 0x6a2   : >> { %1261 = vrot.lane.b32.xlu1 %v3003_v3, %s2728_s26  ;;  %s1884_s26 = scalar_lea.vmem [#allocation3], %s2163_s30  ;;  %s2740_s30 = smov (%p484_p9), 32  }
 0x6b3   : >> { %1430 = vrot.lane.b32.xlu0 %v3003_v3, %s2729_s9  ;;  %s2198_s9 = sshll.u32 (%p484_p9), %s2800_s25, 8 }
 0x6b7   : >> { %1768 = vrot.lane.b32.xlu0 %v3003_v3, %s2730_s17  ;;  %s2033_s17 = sshll.u32 (%p484_p9), %s2987_s14, 4  ;;  %s3170_s17 = int_to_ptr.vmem [resolvable:$true] %s2033_s17 }
 0x6b8   : > { %s2616_s25 = scalar_lea.vmem (%p484_p9), %s3170_s17, 256 }
 0x6b9   : > { %p2617_p12 = scmp.ne.s32.totalorder (%p484_p9), %s3170_s17, %s2616_s25 }
 0x6bb   : > { %p2618_p1 = pnand (%p484_p9), %p2617_p12, %p3243_p7 }
 0x6bd   : > { %p2619_p10 = pneg (%p484_p9), %p2618_p1 }
 0x6c6   : >> { %1592 = vadd.xlane.f32.xlu1 %v1591_v45 }
 0x6d7   : >> { %1599 = vrot.lane.b32.xlu1 %v3003_v3, %s2731_s18 }
 0x6e1   : >> { %v748_v46 = vpop.xlane.xlu0 %747 }
 0x6e2   : >> { %2488 = vrcp.f32 %v748_v46 }
 0x6e5   : >> { %v917_v47 = vpop.xlane.xlu1 %916 }
 0x6e6   : >> { %2490 = vrcp.f32 %v917_v47 }
 0x6e9   : >> { %v1086_v48 = vpop.xlane.xlu0 %1085  ;;  %v1093_v6 = vpop.permute.xlu1 %1092 }
 0x6ea   : >> { %2492 = vrcp.f32 %v1086_v48 }
 0x6ed   : >> { %v924_v58 = vpop.permute.xlu0 %923 }
 0x6ef   : >> { %v2489_v49 = vpop.eup %2488 }
 0x6f0   : >> { %v750_v50 = vmul.f32 %v2489_v49, %v748_v46 }
 0x6f2   : >> { %v751_v51 = vsub.f32 2.0, %v750_v50 }
 0x6f3   : >> { %v2491_v52 = vpop.eup %2490 }
 0x6f4   : >> { %v752_v53 = vmul.f32 %v2489_v49, %v751_v51  ;;  %v919_v54 = vmul.f32 %v2491_v52, %v917_v47 }
 0x6f6   : >> { %v753_v55 = vmul.f32 %v3078_v19, %v752_v53  ;;  %v920_v56 = vsub.f32 2.0, %v919_v54 }
 0x6f7   : >> { %v2493_v60 = vpop.eup %2492 }
 0x6f8   : >> { %v921_v62 = vmul.f32 %v2491_v52, %v920_v56  ;;  %v1088_v4 = vmul.f32 %v2493_v60, %v1086_v48  ;;  %2255 = vmatmul.mubr.msk.f32.vlgmr.msra.gmra.mxu0 %vm570_vm8, %v753_v55 }
 0x6f9   : >> { %2263 = vmatpush3.msra.mxu0 %v924_v58  ;;  %2264 = vmatprep.mubr.msk.f32.mxu0 %vm2708_vm6, %v2707_v2 }
 0x6fa   : >> { %v922_v3 = vmul.f32 %v3082_v22, %v921_v62  ;;  %v1089_v5 = vsub.f32 2.0, %v1088_v4  ;;  %2272 = vmatprep.subr.mxu0 %v2707_v2 }
 0x6fc   : >> { %v1090_v7 = vmul.f32 %v2493_v60, %v1089_v5  ;;  %2265 = vmatmul.mubr.msk.f32.vlgmr.msra.gmra.mxu0 %vm570_vm8, %v922_v3 }
 0x6fd   : >> { %2273 = vmatpush3.msra.mxu0 %v1093_v6  ;;  %2274 = vmatprep.mubr.msk.f32.mxu0 %vm2708_vm6, %v2707_v2 }
 0x6fe   : >> { %v1091_v8 = vmul.f32 %v3087_v24, %v1090_v7  ;;  %2282 = vmatprep.subr.mxu0 %v2707_v2 }
 0x700   : >> { %2275 = vmatmul.mubr.msk.f32.vlgmr.msra.gmra.mxu0 %vm570_vm8, %v1091_v8  ;;  %v1890_v8 = vld [vmem:[#allocation10 + $0x10] sm:$0xff] (%p484_p9) }
 0x701   : >> { %2284 = vmatprep.mubr.msk.f32.mxu0 %vm2708_vm6, %v2707_v2 }
 0x71a   : >> { %v1255_v9 = vpop.xlane.xlu1 %1254 }
 0x71b   : >> { %2494 = vrcp.f32 %v1255_v9 }
 0x71e   : >> { %v1262_v10 = vpop.permute.xlu1 %1261  ;;  %v1424_v11 = vpop.xlane.xlu0 %1423 }
 0x71f   : >> { %2496 = vrcp.f32 %v1424_v11  ;;  %2283 = vmatpush3.msra.mxu0 %v1262_v10  ;;  %v1889_v10 = vld [vmem:[#allocation10 + $0x8] sm:$0xff] (%p484_p9) }
 0x720   : >> { %2292 = vmatprep.subr.mxu0 %v2707_v2 }
 0x726   : >> { %v1762_v15 = vpop.xlane.xlu0 %1761 }
 0x727   : >> { %2498 = vrcp.f32 %v1762_v15 }
 0x728   : >> { %v2495_v12 = vpop.eup %2494 }
 0x729   : >> { %v1257_v13 = vmul.f32 %v2495_v12, %v1255_v9 }
 0x72a   : >> { %v1431_v21 = vpop.permute.xlu0 %1430 }
 0x72b   : >> { %v1258_v14 = vsub.f32 2.0, %v1257_v13 }
 0x72c   : >> { %v2497_v16 = vpop.eup %2496 }
 0x72d   : >> { %v1259_v17 = vmul.f32 %v2495_v12, %v1258_v14  ;;  %v1426_v18 = vmul.f32 %v2497_v16, %v1424_v11  ;;  %v1888_v11 = vld [vmem:[#allocation10] sm:$0xff] (%p484_p9) }
 0x72e   : >> { %v1769_v36 = vpop.permute.xlu0 %1768 }
 0x72f   : >> { %v1260_v19 = vmul.f32 %v3093_v34, %v1259_v17  ;;  %v1427_v20 = vsub.f32 2.0, %v1426_v18 }
 0x731   : >> { %v1428_v22 = vmul.f32 %v2497_v16, %v1427_v20  ;;  %2285 = vmatmul.mubr.msk.f32.vlgmr.msra.gmra.mxu0 %vm570_vm8, %v1260_v19 }
 0x732   : >> { %2293 = vmatpush3.msra.mxu0 %v1431_v21  ;;  %2294 = vmatprep.mubr.msk.f32.mxu0 %vm2708_vm6, %v2707_v2 }
 0x733   : >> { %v1429_v23 = vmul.f32 %v3097_v37, %v1428_v22  ;;  %2302 = vmatprep.subr.mxu0 %v2707_v2 }
 0x734   : >> { %v2499_v26 = vpop.eup %2498 }
 0x735   : >> { %2295 = vmatmul.mubr.msk.f32.vlgmr.msra.gmra.mxu0 %vm570_vm8, %v1429_v23  ;;  %v1764_v27 = vmul.f32 %v2499_v26, %v1762_v15 }
 0x736   : >> { %2304 = vmatprep.mubr.msk.f32.mxu0 %vm2708_vm6, %v2707_v2 }
 0x737   : >> { %v1765_v30 = vsub.f32 2.0, %v1764_v27 }
 0x739   : >> { %v1766_v33 = vmul.f32 %v2499_v26, %v1765_v30 }
 0x73b   : >> { %v1767_v37 = vmul.f32 %v3101_v39, %v1766_v33 }
 0x74f   : >> { %v1593_v24 = vpop.xlane.xlu1 %1592 }
 0x750   : >> { %2500 = vrcp.f32 %v1593_v24 }
 0x753   : >> { %v1600_v25 = vpop.permute.xlu1 %1599 }
 0x754   : >> { %2303 = vmatpush3.msra.mxu0 %v1600_v25 }
 0x755   : >> { %2312 = vmatprep.subr.mxu0 %v2707_v2 }
 0x75d   : >> { %v2501_v28 = vpop.eup %2500 }
 0x75e   : >> { %v1595_v29 = vmul.f32 %v2501_v28, %v1593_v24 }
 0x760   : >> { %v1596_v31 = vsub.f32 2.0, %v1595_v29 }
 0x762   : >> { %v1597_v32 = vmul.f32 %v2501_v28, %v1596_v31 }
 0x764   : >> { %v1598_v34 = vmul.f32 %v3109_v44, %v1597_v32 }
 0x766   : >> { %2305 = vmatmul.mubr.msk.f32.vlgmr.msra.gmra.mxu0 %vm570_vm8, %v1598_v34 }
 0x767   : >> { %2313 = vmatpush3.msra.mxu0 %v1769_v36  ;;  %2314 = vmatprep.mubr.msk.f32.mxu0 %vm2708_vm6, %v2707_v2 }
 0x76a   : >> { %2315 = vmatmul.mubr.msk.f32.vlgmr.msra.gmra.mxu0 %vm570_vm8, %v1767_v37 }
 0x7b8   : >> { %v826_v38 = vpop.f32.mrf.mxu0 }
 0x7b9   : >> { %1845 = vrot.lane.b32.xlu1 %v826_v38, %s2732_s15 }
 0x7ba   : >> { %v2256_v40 = vpop.f32.mrf.mxu0 }
 0x7bc   : >> { %v995_v41 = vpop.f32.mrf.mxu0 }
 0x7bd   : >> { %1849 = vrot.lane.b32.xlu0 %v995_v41, %s2733_s19  ;;  %s3168_s19 = scalar_lea.hbm (%p484_p9), %s3222_s6, %s2198_s9 }
 0x7be   : >> { %v2266_v42 = vpop.f32.mrf.mxu0 }
 0x7c0   : >> { %v1164_v43 = vpop.f32.mrf.mxu0 }
 0x7c1   : >> { %1853 = vrot.lane.b32.xlu1 %v1164_v43, %s2734_s8  ;;  %s2020_s8 = scalar_lea.sflag (%p484_p9), [#allocation6], %s2927_s7 }
 0x7c2   : >> { %v2276_v44 = vpop.f32.mrf.mxu0 }
 0x7f1   : >> { %v1333_v45 = vpop.f32.mrf.mxu0 }
 0x7f2   : >> { %1857 = vrot.lane.b32.xlu0 %v1333_v45, %s2735_s12  ;;  %s2741_s12 = smov (%p484_p9), [#allocation12]  }
 0x7f3   : >> { %v2286_v2 = vpop.f32.mrf.mxu0 }
 0x7f5   : >> { %v1502_v46 = vpop.f32.mrf.mxu0 }
 0x7f6   : >> { %1861 = vrot.lane.b32.xlu1 %v1502_v46, %s2736_s11  ;;  %s2620_s11 = sshll.u32 (%p484_p9), %s2741_s12, 4  ;;  %s2621_s11 = int_to_ptr.vmem [resolvable:$false] %s2620_s11 }
 0x7f7   : >> { %v2296_v39 = vpop.f32.mrf.mxu0  ;;  %p2623_p13 = scmp.lt.s32.totalorder (%p484_p9), %s3170_s17, %s2621_s11 }
 0x826   : >> { %v1671_v47 = vpop.f32.mrf.mxu0 }
 0x827   : >> { %1865 = vrot.lane.b32.xlu0 %v1671_v47, %s2737_s27  ;;  %s2622_s27 = scalar_lea.vmem (%p484_p9), %s2621_s11, 512 }
 0x828   : >> { %v2306_v48 = vpop.f32.mrf.mxu0  ;;  %p2624_p2 = scmp.lt.s32.totalorder (%p484_p9), %s2622_s27, %s2616_s25 }
 0x82a   : >> { %v1840_v49 = vpop.f32.mrf.mxu0  ;;  %p2625_p3 = por (%p484_p9), %p2624_p2, %p2623_p13 }
 0x82b   : >> { %1869 = vrot.lane.b32.xlu1 %v1840_v49, %s2738_s29  ;;  %v1846_v51 = vpop.permute.xlu1 %1845 }
 0x82c   : >> { %v2316_v50 = vpop.f32.mrf.mxu0  ;;  %v1872_v55 = vsel %vm494_vm7, %v3065_v35, %v1846_v51  ;;  %v1891_v35 = vld [vmem:[#allocation10 + $0x18] sm:$0xff] (%p484_p9)  ;;  %p2626_p6 = pnand (%p484_p9), %p2625_p3, %p2619_p10 }
 0x82d   : > { %2317 = vmatprep.subr.mxu0 (%p484_p9), %v1891_v35 }
 0x82e   : > { %2318 = vmatpush3.msra.mxu0 (%p484_p9), %v1891_v35 }
 0x82f   : >> { %v1850_v52 = vpop.permute.xlu0 %1849  ;;  %2319 = vmatprep.subr.mxu0 (%p484_p9), %v1890_v8 }
 0x830   : >> { %v1873_v56 = vsel %vm570_vm8, %v1872_v55, %v1850_v52  ;;  %2320 = vmatpush3.msra.mxu0 (%p484_p9), %v1890_v8 }
 0x831   : > { %2321 = vmatprep.subr.mxu0 (%p484_p9), %v1889_v10 }
 0x832   : > { %2322 = vmatpush3.msra.mxu0 (%p484_p9), %v1889_v10 }
 0x833   : >> { %v1854_v53 = vpop.permute.xlu1 %1853  ;;  %2323 = vmatprep.subr.mxu0 (%p484_p9), %v1888_v11 }
 0x834   : >> { %v1875_v60 = vsel %vm1874_vm9, %v1873_v56, %v1854_v53  ;;  %2324 = vmatpush3.msra.mxu0 (%p484_p9), %v1888_v11 }
 0x864   : >> { %v1858_v54 = vpop.permute.xlu0 %1857 }
 0x865   : >> { %v1877_v4 = vsel %vm1876_vm10, %v1875_v60, %v1858_v54 }
 0x868   : >> { %v1862_v58 = vpop.permute.xlu1 %1861 }
 0x869   : >> { %v1879_v3 = vsel %vm1878_vm11, %v1877_v4, %v1862_v58 }
 0x899   : >> { %v1866_v62 = vpop.permute.xlu0 %1865 }
 0x89a   : >> { %v1881_v5 = vsel %vm1880_vm12, %v1879_v3, %v1866_v62 }
 0x89b   : > { %486 = sbr.rel (!%p484_p9) target bundleno = 629 (0x275), region = 110 }
 0x89d   : >> { %v1870_v6 = vpop.permute.xlu1 %1869 }
 0x89e   : >> { %v1883_v7 = vsel %vm1882_vm13, %v1881_v5, %v1870_v6 }
 0x89f   : >> { %1885 = vst.msk [vmem:[%s1884_s26] sm:$0xff] %vm318_vm0, %v1883_v7 }
 0x8a6   : > { %v1886_v9 = vld [vmem:[#allocation3] sm:$0xff]  ;;  %v1887_v12 = vld [vmem:[#allocation3 + $0x8] sm:$0xff] }
 0x8a7   : > { %2325 = vmatprep.mubr.msk.f32.mxu0 %vm318_vm0, %v1886_v9 }
 0x8a8   : > { %2326 = vmatmul.mubr.msk.f32.vlgmr.msra.gmra.mxu0 %vm318_vm0, %v1887_v12 }
 0x968   : > { %v2327_v13 = vpop.f32.mrf.mxu0 }
 0x96a   : > { %v1964_v14 = vpop.f32.mrf.mxu0 }
 0x96b   : > { %1975 = vrot.lane.b32.xlu0 %v1964_v14, %s2739_s20 }
 0x96f   : > { %1977 = vrot.lane.b32.xlu0 %v2327_v13, %s2739_s20 }
 0x9dd   : > { %v1976_v15 = vpop.permute.xlu0 %1975 }
 0x9de   : > { %v1982_v16 = vadd.f32 %v1976_v15, %v2978_v59  ;;  %v1981_v59 = vadd.f32 %v1976_v15, %v2975_v57 }
 0x9e0   : > { %v2190_v17 = vmul.f32 -1.442695, %v1982_v16 }
 0x9e1   : > { %v1978_v18 = vpop.permute.xlu0 %1977 }
 0x9e2   : > { %2502 = vpow2.f32 %v2190_v17  ;;  %v1984_v19 = vadd.f32 %v1978_v18, %v2983_v63  ;;  %v1983_v63 = vadd.f32 %v1978_v18, %v2980_v61 }
 0x9e4   : > { %v2191_v20 = vmul.f32 -1.442695, %v1984_v19 }
 0x9e6   : > { %2504 = vpow2.f32 %v2191_v20 }
 0x9ef   : > { %v2503_v21 = vpop.eup %2502 }
 0x9f0   : > { %v1991_v22 = vadd.f32 1.0, %v2503_v21 }
 0x9f2   : > { %2506 = vrcp.f32 %v1991_v22 }
 0x9f3   : > { %v2505_v23 = vpop.eup %2504 }
 0x9f4   : > { %v1992_v24 = vadd.f32 1.0, %v2505_v23 }
 0x9f6   : > { %2508 = vrcp.f32 %v1992_v24 }
 0x9ff   : > { %v2507_v25 = vpop.eup %2506 }
 0xa00   : > { %1999 = vrot.lane.b32.xlu1 %v2507_v25, %s2739_s20 }
 0xa03   : > { %v2509_v26 = vpop.eup %2508 }
 0xa04   : > { %2001 = vrot.lane.b32.xlu1 %v2509_v26, %s2739_s20 }
 0xa72   : > { %v2000_v27 = vpop.permute.xlu1 %1999 }
 0xa73   : > { %v2005_v28 = vmul.f32 %v2000_v27, %v1981_v59 }
 0xa75   : > { %2009 = vrot.lane.b32.xlu0 %v2005_v28, %s2740_s30 }
 0xa76   : > { %v2002_v29 = vpop.permute.xlu1 %2001 }
 0xa77   : > { %v2006_v30 = vmul.f32 %v2002_v29, %v1983_v63 }
 0xa79   : > { %2011 = vrot.lane.b32.xlu1 %v2006_v30, %s2740_s30 }
 0xae7   : > { %v2010_v31 = vpop.permute.xlu0 %2009 }
 0xae8   : > { %v2015_v32 = vadd.f32 %v2010_v31, %v2945_v0 }
 0xaea   : > { %2017 = vst.msk [vmem:[%s2987_s14] sm:$0xff] %vm318_vm0, %v2015_v32 }
 0xaeb   : > { %v2012_v57 = vpop.permute.xlu1 %2011 }
 0xaec   : > { %v2016_v61 = vadd.f32 %v2012_v57, %v2947_v1 }
 0xaee   : > { %2018 = vst.msk [vmem:[%s2987_s14 + $0x8] sm:$0xff] %vm318_vm0, %v2016_v61 }
 0xaef   : > { %2629 = shalt.err (!%p2626_p6)
}
 0xaf0   : > { %s2630_s14 = scalar_lea.hbm %s3168_s19, 256  ;;  %s2634_s20 = scalar_lea.hbm %s3222_s6, 512 }
 0xaf1   : > { %p2631_p4 = scmp.ne.s32.totalorder %s3168_s19, %s2630_s14  ;;  %p2635_p11 = scmp.lt.s32.totalorder %s3168_s19, %s3222_s6 }
 0xaf2   : > { %p2636_p0 = scmp.lt.s32.totalorder %s2634_s20, %s2630_s14 }
 0xaf3   : > { %p2632_p8 = pnand %p2631_p4, %p3243_p7 }
 0xaf4   : > { %p2637_p9 = por %p2636_p0, %p2635_p11 }
 0xaf5   : > { %p2633_p5 = pneg %p2632_p8 }
 0xaf7   : > { %p2638_p12 = pnand %p2637_p9, %p2633_p5 }
 0xaf9   : > { %2641 = shalt.err (!%p2638_p12)
}
 0xafa   : > { %s2742_s18 = smov 128   ;;  %s2743_s15 = smov 8  }
 0xafb   : > { %2350 = dma.vmem_to_hbm [thread:$0]  (%p3243_p7), %s3170_s17, 256, %s3168_s19, %s2020_s8, %s2742_s18, %s2742_s18, %s2743_s15  }
 0xafc PF: > { %s2048_s25 = sand.u32 1, %s2680_s21   ;;  %p3244_p1 = scmp.ne.s32.totalorder %s3230_s28, 0 }
 0xafd   : > { %p3245_p10 = scmp.ge.s32.totalorder %s2692_s24, 2  ;;  %s2049_s12 = scalar_lea.sflag [#allocation6], %s2048_s25 }
 0xaff   : > { %p2367_p13 = pnand %p3245_p10, %p3244_p1 }
 0xb01   : > { %p2368_p2 = pneg %p2367_p13 }
 0xb03   : > { %2675 = dma.done.wait (%p2368_p2), %s2049_s12, 256  }
 0xb04   : > { %2677 = vsyncadd (%p2368_p2), %s2049_s12, 4294967040  ;;  %p21_p3 = scmp.ge.s32.totalorder %s2869_s13, 4   ;;  %s3246_s21 = smov %s2684_s22 }
 0xb05   : > { %s3247_s22 = smov %s2688_s23  ;;  %s3248_s23 = smov %s2879_s16 }
 0xb06   : > { %s3249_s24 = smov %s2869_s13  ;;  %23 = sbr.rel (!%p21_p3) target bundleno = 7 (0x7), region = 121 }
 0xb0b   :  { %2054 = vsyncpa [#allocation5], 1 }
 0xb0c   :  { %2056 = vsyncpa [#allocation5 + $0x1], 1 }
 0xb0d   :  { %2057 = vsyncpa [#allocation8], 1 }
 0xb0e   :  { %2058 = vsyncpa [#allocation11], 1 }
 0xb0f   :  { %2059 = vsyncpa [#allocation6], 1 }
 0xb10   :  { %2061 = vsyncpa [#allocation6 + $0x1], 1 }

</bundles_post_ra>
